<compile_context>
chip_gen: v7x
topology: tpu7x:2x2x1
jax: 0.10.0
libtpu: 0.0.40
codegen_flags: <defaults>
</compile_context>

<pallas_src>
import math
from functools import partial

import jax
import jax.numpy as jnp
from jax.experimental import pallas as pl
from jax.experimental.pallas import tpu as pltpu

LANE = 128


# --------------------------------------------------------------------------------------
# helpers
# --------------------------------------------------------------------------------------
def _round_up(v, m):
    return ((v + m - 1) // m) * m


def _act(h, activation):
    if activation == "relu":
        return jnp.maximum(h, 0.0)
    # TODO(synk): exact erf-based F.gelu replaced by the tanh approximation (guaranteed
    #             Mosaic transcendental support); |diff| ~ 1e-3.
    return jax.nn.gelu(h, approximate=True)


def _parallel():
    return pltpu.CompilerParams(dimension_semantics=("parallel",))


def _seq_spec(L, C):
    return pl.BlockSpec((1, L, C), lambda b: (b, 0, 0))


def _rep_spec(shape):
    zeros = (0,) * len(shape)
    return pl.BlockSpec(shape, lambda b: zeros)


# --------------------------------------------------------------------------------------
# in-kernel building blocks
# --------------------------------------------------------------------------------------
def _decomp_scratch(y, pad_ref, k):
    """series_decomp of a VMEM-resident [1, L, D] value.  Edge replication is staged in a
    VMEM scratch (no HBM padded tensor).  Returns (residual, moving_mean)."""
    L = y.shape[1]
    front = (k - 1) // 2
    back = k - 1 - front
    # TODO(synk): for even kernel sizes the reference moving_avg changes sequence length;
    #             the asymmetric padding used here keeps length (odd k matches exactly).
    pad_ref[:, front:front + L, :] = y
    for i in range(front):
        pad_ref[:, i:i + 1, :] = y[:, 0:1, :]
    for i in range(back):
        pad_ref[:, front + L + i:front + L + i + 1, :] = y[:, L - 1:L, :]
    acc = pad_ref[:, 0:L, :]
    for j in range(1, k):
        acc = acc + pad_ref[:, j:j + L, :]
    mean = acc * (1.0 / k)
    return y - mean, mean


def _circular_conv3(x2d, w, pad_ref):
    """k=3 circular conv of a [L, Cin] value with w [3*Cin, N]: circular padding staged in
    a [L+2, Cin] VMEM scratch, then three shifted MXU matmuls (f32 accumulation)."""
    L, C = x2d.shape
    pad_ref[1:L + 1, :] = x2d
    pad_ref[0:1, :] = x2d[L - 1:L, :]
    pad_ref[L + 1:L + 2, :] = x2d[0:1, :]
    acc = None
    for j in range(3):
        xj = pad_ref[j:j + L, :].astype(jnp.bfloat16)
        pj = jnp.dot(xj, w[j * C:(j + 1) * C, :], preferred_element_type=jnp.float32)
        acc = pj if acc is None else acc + pj
    return acc


def _my_layernorm(x, g, b, d_model):
    """my_Layernorm on a lane-padded [1, L, Dp] value: LayerNorm statistics over the first
    d_model (valid) channels, gamma/beta zero-padded so padded lanes stay exactly zero,
    then subtraction of the per-channel time mean."""
    xv = x[..., :d_model]
    mu = jnp.mean(xv, axis=-1, keepdims=True)
    var = jnp.mean(jnp.square(xv - mu), axis=-1, keepdims=True)
    xhat = (x - mu) * jax.lax.rsqrt(var + 1e-5) * g + b
    return xhat - jnp.mean(xhat, axis=1, keepdims=True)


# --------------------------------------------------------------------------------------
# Pallas kernels (all: grid=(B,), one full sequence per step, lane-dense 128-wide outputs)
# --------------------------------------------------------------------------------------
def _decomp_kernel(x_ref, res_ref, mean_ref, pad_ref, *, k):
    res, mean = _decomp_scratch(x_ref[...], pad_ref, k)
    res_ref[...] = res
    mean_ref[...] = mean


def _embed_kernel(x_ref, temp_ref, w_ref, o_ref, pad_ref):
    # TokenEmbedding (Conv1d k=3, circular, no bias) + temporal-embedding add, fused.
    _, L, C = x_ref.shape
    y = _circular_conv3(x_ref[...].reshape(L, C), w_ref[...], pad_ref)
    o_ref[...] = temp_ref[...] + y.reshape(1, L, -1)


def _linear_kernel(x_ref, w_ref, b_ref, o_ref):
    # y = x @ W + b ; bf16 MXU inputs, f32 accumulation, 128-multiple output lanes.
    _, L, K = x_ref.shape
    y = jnp.dot(x_ref[...].reshape(L, K).astype(jnp.bfloat16), w_ref[...],
                preferred_element_type=jnp.float32) + b_ref[...]
    o_ref[...] = y.reshape(1, L, -1)


def _attn_proj_decomp_kernel(attn_ref, x_ref, wo_ref, bo_ref, res_ref, mean_ref, pad_ref, *, k):
    # out_projection(attn) + residual add + series_decomp, fused into one launch.
    _, L, H = attn_ref.shape
    y = jnp.dot(attn_ref[...].reshape(L, H).astype(jnp.bfloat16), wo_ref[...],
                preferred_element_type=jnp.float32) + bo_ref[...]
    y = x_ref[...] + y.reshape(1, L, -1)
    res, mean = _decomp_scratch(y, pad_ref, k)
    res_ref[...] = res
    mean_ref[...] = mean


def _ffn_decomp_kernel(x_ref, w1_ref, w2_ref, res_ref, mean_ref, pad_ref, *, k, activation):
    # x + conv2(act(conv1(x)))  (k=1 convs as matmuls) + series_decomp, fused.
    _, L, D = x_ref.shape
    x = x_ref[...]
    h = jnp.dot(x.reshape(L, D).astype(jnp.bfloat16), w1_ref[...],
                preferred_element_type=jnp.float32)
    h = _act(h, activation)
    y = jnp.dot(h.astype(jnp.bfloat16), w2_ref[...], preferred_element_type=jnp.float32)
    y = x + y.reshape(1, L, D)
    res, mean = _decomp_scratch(y, pad_ref, k)
    res_ref[...] = res
    mean_ref[...] = mean


def _trend_kernel(t1_ref, t2_ref, t3_ref, prev_ref, w_ref, o_ref, pad_ref):
    # (trend1+trend2+trend3) -> Conv1d(d_model, c_out, 3, circular, no bias) -> + running trend.
    _, L, D = t1_ref.shape
    t = (t1_ref[...] + t2_ref[...] + t3_ref[...]).reshape(L, D)
    y = _circular_conv3(t, w_ref[...], pad_ref)
    o_ref[...] = prev_ref[...] + y.reshape(1, L, -1)


def _norm_kernel(x_ref, g_ref, b_ref, o_ref, *, d_model):
    o_ref[...] = _my_layernorm(x_ref[...], g_ref[...], b_ref[...], d_model)


def _final_kernel(x_ref, trend_ref, g_ref, b_ref, w_ref, pb_ref, o_ref, *, d_model):
    # my_Layernorm + final Linear(d_model, c_out) + trend add, fused.
    _, L, D = x_ref.shape
    xn = _my_layernorm(x_ref[...], g_ref[...], b_ref[...], d_model)
    y = jnp.dot(xn.reshape(L, D).astype(jnp.bfloat16), w_ref[...],
                preferred_element_type=jnp.float32) + pb_ref[...]
    o_ref[...] = trend_ref[...] + y.reshape(1, L, -1)


# --------------------------------------------------------------------------------------
# Pallas wrappers
# --------------------------------------------------------------------------------------
def decomp_pallas(x, k):
    B, L, C = x.shape
    return pl.pallas_call(
        partial(_decomp_kernel, k=k),
        out_shape=(jax.ShapeDtypeStruct((B, L, C), jnp.float32),) * 2,
        grid=(B,),
        in_specs=[_seq_spec(L, C)],
        out_specs=(_seq_spec(L, C), _seq_spec(L, C)),
        scratch_shapes=[pltpu.VMEM((1, L + k - 1, C), jnp.float32)],
        compiler_params=_parallel(),
    )(x)


def embed_pallas(x, temp, w):
    B, L, C = x.shape
    D = w.shape[-1]
    return pl.pallas_call(
        _embed_kernel,
        out_shape=jax.ShapeDtypeStruct((B, L, D), jnp.float32),
        grid=(B,),
        in_specs=[_seq_spec(L, C), _seq_spec(L, D), _rep_spec(w.shape)],
        out_specs=_seq_spec(L, D),
        scratch_shapes=[pltpu.VMEM((L + 2, C), jnp.float32)],
        compiler_params=_parallel(),
    )(x, temp, w)


def linear_pallas(x, w, b):
    B, L, K = x.shape
    N = w.shape[-1]
    return pl.pallas_call(
        _linear_kernel,
        out_shape=jax.ShapeDtypeStruct((B, L, N), jnp.float32),
        grid=(B,),
        in_specs=[_seq_spec(L, K), _rep_spec(w.shape), _rep_spec(b.shape)],
        out_specs=_seq_spec(L, N),
        compiler_params=_parallel(),
    )(x, w, b)


def attn_proj_decomp_pallas(attn, x, wo, bo, k):
    B, L, H = attn.shape
    D = x.shape[-1]
    return pl.pallas_call(
        partial(_attn_proj_decomp_kernel, k=k),
        out_shape=(jax.ShapeDtypeStruct((B, L, D), jnp.float32),) * 2,
        grid=(B,),
        in_specs=[_seq_spec(L, H), _seq_spec(L, D), _rep_spec(wo.shape), _rep_spec(bo.shape)],
        out_specs=(_seq_spec(L, D), _seq_spec(L, D)),
        scratch_shapes=[pltpu.VMEM((1, L + k - 1, D), jnp.float32)],
        compiler_params=_parallel(),
    )(attn, x, wo, bo)


def ffn_decomp_pallas(x, w1, w2, k, activation):
    B, L, D = x.shape
    return pl.pallas_call(
        partial(_ffn_decomp_kernel, k=k, activation=activation),
        out_shape=(jax.ShapeDtypeStruct((B, L, D), jnp.float32),) * 2,
        grid=(B,),
        in_specs=[_seq_spec(L, D), _rep_spec(w1.shape), _rep_spec(w2.shape)],
        out_specs=(_seq_spec(L, D), _seq_spec(L, D)),
        scratch_shapes=[pltpu.VMEM((1, L + k - 1, D), jnp.float32)],
        compiler_params=_parallel(),
    )(x, w1, w2)


def trend_proj_pallas(t1, t2, t3, prev, w):
    B, L, D = t1.shape
    C = prev.shape[-1]
    return pl.pallas_call(
        _trend_kernel,
        out_shape=jax.ShapeDtypeStruct((B, L, C), jnp.float32),
        grid=(B,),
        in_specs=[_seq_spec(L, D), _seq_spec(L, D), _seq_spec(L, D),
                  _seq_spec(L, C), _rep_spec(w.shape)],
        out_specs=_seq_spec(L, C),
        scratch_shapes=[pltpu.VMEM((L + 2, D), jnp.float32)],
        compiler_params=_parallel(),
    )(t1, t2, t3, prev, w)


def norm_pallas(x, g, b, d_model):
    B, L, D = x.shape
    return pl.pallas_call(
        partial(_norm_kernel, d_model=d_model),
        out_shape=jax.ShapeDtypeStruct((B, L, D), jnp.float32),
        grid=(B,),
        in_specs=[_seq_spec(L, D), _rep_spec(g.shape), _rep_spec(b.shape)],
        out_specs=_seq_spec(L, D),
        compiler_params=_parallel(),
    )(x, g, b)


def final_pallas(x, trend, g, b, w, pb, d_model):
    B, L, D = x.shape
    C = w.shape[-1]
    return pl.pallas_call(
        partial(_final_kernel, d_model=d_model),
        out_shape=jax.ShapeDtypeStruct((B, L, C), jnp.float32),
        grid=(B,),
        in_specs=[_seq_spec(L, D), _seq_spec(L, C), _rep_spec(g.shape), _rep_spec(b.shape),
                  _rep_spec(w.shape), _rep_spec(pb.shape)],
        out_specs=_seq_spec(L, C),
        compiler_params=_parallel(),
    )(x, trend, g, b, w, pb)


# --------------------------------------------------------------------------------------
# AutoCorrelation (glue kept in plain JAX; see TODO)
# --------------------------------------------------------------------------------------
def auto_correlation(q, k, v, factor):
    """AutoCorrelation with inference-time top-k time-delay aggregation.
    q: [B, L, H, E], k/v: [B, S, H, E]; returns [B, L, H*E].
    TODO(synk): the top-k delay selection and the per-batch dynamic circular shifts have
                no clean Pallas TPU equivalent at these shapes, so the period scoring
                (direct circular-correlation contraction, exactly equivalent to the
                reference mean over heads of irfft(rfft(q)*conj(rfft(k)))), top_k and the
                one-shot shift-matrix aggregation stay in plain JAX."""
    B, L, H, E = q.shape
    S = k.shape[1]
    if L > S:
        pad = jnp.zeros((B, L - S, H, E), q.dtype)
        k = jnp.concatenate([k, pad], axis=1)
        v = jnp.concatenate([v, pad], axis=1)
    else:
        k = k[:, :L]
        v = v[:, :L]
    D = H * E
    q2 = q.reshape(B, L, D)
    k2 = k.reshape(B, L, D)
    v2 = v.reshape(B, L, D)

    # mean (over heads/channels) circular correlation: mc[b,tau] = (1/D) sum_t <q[t], k[(t-tau)%L]>
    t_idx = jnp.arange(L)
    gram = jnp.einsum('btd,bsd->bts', q2, k2)
    sel = jax.nn.one_hot((t_idx[:, None] - t_idx[None, :]) % L, L, dtype=gram.dtype)  # [t,tau,s]
    mean_value = jnp.einsum('bts,tus->bu', gram, sel) / D

    top_k = int(factor * math.log(L))
    weights, delay = jax.lax.top_k(mean_value, top_k)
    tmp_corr = jax.nn.softmax(weights, axis=-1)

    # delays_agg[b,t,:] = sum_i tmp_corr[b,i] * v[b, (t + delay[b,i]) % L, :]
    idx = (t_idx[None, None, :] + delay[:, :, None]) % L                      # [B, k, L]
    smat = jnp.einsum('bk,bkts->bts', tmp_corr, jax.nn.one_hot(idx, L, dtype=v2.dtype))
    return jnp.einsum('bts,bsd->btd', smat, v2)


def auto_corr_attention(p, queries, keys, n_heads, d_model, factor, fuse_qkv):
    """Q/K/V projections (fused, lane-dense Pallas matmuls) + AutoCorrelation.
    Returns the pre-output-projection heads, [B, L, d_model]."""
    B, Lq, _ = queries.shape
    S = keys.shape[1]
    if fuse_qkv:                      # self-attention: one fused Q|K|V matmul
        qkv = linear_pallas(queries, p["wqkv"], p["bqkv"])
        q = qkv[..., 0 * d_model:1 * d_model]
        kk = qkv[..., 1 * d_model:2 * d_model]
        v = qkv[..., 2 * d_model:3 * d_model]
    else:                             # cross-attention: fused K|V matmul on the shared source
        q = linear_pallas(queries, p["wq"], p["bq"])[..., :d_model]
        kv = linear_pallas(keys, p["wkv"], p["bkv"])
        kk = kv[..., :d_model]
        v = kv[..., d_model:2 * d_model]
    E = d_model // n_heads
    q = q.reshape(B, Lq, n_heads, E)
    kk = kk.reshape(B, S, n_heads, E)
    v = v.reshape(B, S, n_heads, E)
    return auto_correlation(q, kk, v, factor)


# --------------------------------------------------------------------------------------
# Model composition
# --------------------------------------------------------------------------------------
def temporal_embed(pe, x_mark):
    xm = x_mark.astype(jnp.int32)
    # TODO(synk): embedding-table gathers kept in plain JAX (jnp.take); no clean Pallas gather.
    return (jnp.take(pe["month_emb"], xm[:, :, 0], axis=0)
            + jnp.take(pe["day_emb"], xm[:, :, 1], axis=0)
            + jnp.take(pe["weekday_emb"], xm[:, :, 2], axis=0)
            + jnp.take(pe["hour_emb"], xm[:, :, 3], axis=0)
            + jnp.take(pe["minute_emb"], xm[:, :, 4], axis=0))


def encoder_layer(lp, x, cfg):
    attn = auto_corr_attention(lp["attn"], x, x, cfg["n_heads"], cfg["d_model"],
                               cfg["factor"], fuse_qkv=True)
    x, _ = attn_proj_decomp_pallas(attn, x, lp["attn"]["wo"], lp["attn"]["bo"],
                                   cfg["moving_avg"])
    res, _ = ffn_decomp_pallas(x, lp["conv1_w"], lp["conv2_w"], cfg["moving_avg"],
                               cfg["activation"])
    return res


def decoder_layer(lp, x, cross, trend, cfg):
    k, act = cfg["moving_avg"], cfg["activation"]
    sa = auto_corr_attention(lp["self_attn"], x, x, cfg["n_heads"], cfg["d_model"],
                             cfg["factor"], fuse_qkv=True)
    x, t1 = attn_proj_decomp_pallas(sa, x, lp["self_attn"]["wo"], lp["self_attn"]["bo"], k)
    ca = auto_corr_attention(lp["cross_attn"], x, cross, cfg["n_heads"], cfg["d_model"],
                             cfg["factor"], fuse_qkv=False)
    x, t2 = attn_proj_decomp_pallas(ca, x, lp["cross_attn"]["wo"], lp["cross_attn"]["bo"], k)
    x, t3 = ffn_decomp_pallas(x, lp["conv1_w"], lp["conv2_w"], k, act)
    trend = trend_proj_pallas(t1, t2, t3, trend, lp["proj_w"])
    return x, trend


def autoformer_forward(pp, cfg, x_enc, x_mark_enc, x_dec, x_mark_dec):
    B = x_enc.shape[0]
    pred_len, label_len = cfg["pred_len"], cfg["label_len"]
    k = cfg["moving_avg"]
    Cp = _round_up(max(cfg["enc_in"], cfg["dec_in"], cfg["c_out"]), LANE)

    # Pad the raw input channels once to the lane-dense width; the padded layout is then
    # carried end-to-end (every later kernel reads/writes 128-lane tensors).
    x_enc_p = jnp.pad(x_enc.astype(jnp.float32),
                      ((0, 0), (0, 0), (0, Cp - x_enc.shape[-1])))

    seasonal_full, trend_full = decomp_pallas(x_enc_p, k)
    mean = jnp.broadcast_to(jnp.mean(x_enc_p, axis=1, keepdims=True), (B, pred_len, Cp))
    zeros = jnp.zeros((B, pred_len, Cp), jnp.float32)
    trend_init = jnp.concatenate([trend_full[:, -label_len:, :], mean], axis=1)
    seasonal_init = jnp.concatenate([seasonal_full[:, -label_len:, :], zeros], axis=1)

    # encoder
    enc_out = embed_pallas(x_enc_p, temporal_embed(pp["enc_emb"], x_mark_enc),
                           pp["enc_emb"]["token_w"])
    for lp in pp["enc_layers"]:
        enc_out = encoder_layer(lp, enc_out, cfg)
    enc_out = norm_pallas(enc_out, pp["enc_norm_g"], pp["enc_norm_b"], cfg["d_model"])

    # decoder
    x = embed_pallas(seasonal_init, temporal_embed(pp["dec_emb"], x_mark_dec),
                     pp["dec_emb"]["token_w"])
    trend = trend_init
    for lp in pp["dec_layers"]:
        x, trend = decoder_layer(lp, x, enc_out, trend, cfg)

    out = final_pallas(x, trend, pp["dec_norm_g"], pp["dec_norm_b"],
                       pp["dec_proj_w"], pp["dec_proj_b"], cfg["d_model"])
    return out[:, -pred_len:, :cfg["c_out"]]


# --------------------------------------------------------------------------------------
# One-time weight preparation (hoisted OUT of the jitted forward)
# --------------------------------------------------------------------------------------
def prepare_params(params, cfg):
    """Fuse Q|K|V / K|V weights, transpose conv weights, pad everything to 128 lanes and
    pre-cast matmul weights to bf16, once, outside the jitted forward."""
    d_model, d_ff, c_out = cfg["d_model"], cfg["d_ff"], cfg["c_out"]
    Dp = _round_up(d_model, LANE)
    Fp = _round_up(d_ff, LANE)
    Cp = _round_up(max(cfg["enc_in"], cfg["dec_in"], c_out), LANE)

    def pad2(w, rows, cols, dtype=jnp.bfloat16):
        w = w.astype(jnp.float32)
        return jnp.pad(w, ((0, rows - w.shape[0]), (0, cols - w.shape[1]))).astype(dtype)

    def pad_bias(b, n):
        return jnp.pad(b.astype(jnp.float32), (0, n - b.shape[0])).reshape(1, n)

    def pad_gamma(v, n):
        return jnp.pad(v.astype(jnp.float32), (0, n - v.shape[0])).reshape(1, 1, n)

    def prep_conv3(w, cin_p, cout_p):
        # torch Conv1d weight [Cout, Cin, 3] -> [3*Cin_p, Cout_p] (tap-major rows), bf16
        wt = jnp.transpose(w, (2, 1, 0)).astype(jnp.float32)           # [3, Cin, Cout]
        wt = jnp.pad(wt, ((0, 0), (0, cin_p - wt.shape[1]), (0, cout_p - wt.shape[2])))
        return wt.reshape(3 * cin_p, cout_p).astype(jnp.bfloat16)

    def prep_emb(pe):
        padw = lambda t: jnp.pad(t.astype(jnp.float32), ((0, 0), (0, Dp - d_model)))
        return dict(
            token_w=prep_conv3(pe["token_w"], Cp, Dp),
            month_emb=padw(pe["month_emb"]),
            day_emb=padw(pe["day_emb"]),
            weekday_emb=padw(pe["weekday_emb"]),
            hour_emb=padw(pe["hour_emb"]),
            minute_emb=padw(pe["minute_emb"]),
        )

    def prep_attn(pa, fuse_qkv):
        out = dict(wo=pad2(pa["wo"], d_model, Dp), bo=pad_bias(pa["bo"], Dp))
        if fuse_qkv:
            wqkv = jnp.concatenate([pa["wq"], pa["wk"], pa["wv"]], axis=1)
            bqkv = jnp.concatenate([pa["bq"], pa["bk"], pa["bv"]])
            n = _round_up(3 * d_model, LANE)
            out["wqkv"] = pad2(wqkv, Dp, n)
            out["bqkv"] = pad_bias(bqkv, n)
        else:
            wkv = jnp.concatenate([pa["wk"], pa["wv"]], axis=1)
            bkv = jnp.concatenate([pa["bk"], pa["bv"]])
            out["wq"] = pad2(pa["wq"], Dp, _round_up(d_model, LANE))
            out["bq"] = pad_bias(pa["bq"], _round_up(d_model, LANE))
            out["wkv"] = pad2(wkv, Dp, _round_up(2 * d_model, LANE))
            out["bkv"] = pad_bias(bkv, _round_up(2 * d_model, LANE))
        return out

    enc_layers = [dict(attn=prep_attn(lp["attn"], True),
                       conv1_w=pad2(lp["conv1_w"], Dp, Fp),
                       conv2_w=pad2(lp["conv2_w"], Fp, Dp))
                  for lp in params["enc_layers"]]
    dec_layers = [dict(self_attn=prep_attn(lp["self_attn"], True),
                       cross_attn=prep_attn(lp["cross_attn"], False),
                       conv1_w=pad2(lp["conv1_w"], Dp, Fp),
                       conv2_w=pad2(lp["conv2_w"], Fp, Dp),
                       proj_w=prep_conv3(lp["proj_w"], Dp, Cp))
                  for lp in params["dec_layers"]]

    return dict(
        enc_emb=prep_emb(params["enc_emb"]),
        dec_emb=prep_emb(params["dec_emb"]),
        enc_layers=enc_layers,
        enc_norm_g=pad_gamma(params["enc_norm_g"], Dp),
        enc_norm_b=pad_gamma(params["enc_norm_b"], Dp),
        dec_layers=dec_layers,
        dec_norm_g=pad_gamma(params["dec_norm_g"], Dp),
        dec_norm_b=pad_gamma(params["dec_norm_b"], Dp),
        dec_proj_w=pad2(params["dec_proj_w"], Dp, Cp),
        dec_proj_b=pad_bias(params["dec_proj_b"], Cp),
    )


# --------------------------------------------------------------------------------------
# Deterministic parameter init (synthetic; shapes follow the PyTorch __init__)
# --------------------------------------------------------------------------------------
def init_params(key, cfg):
    d_model, d_ff = cfg["d_model"], cfg["d_ff"]
    c_out = cfg["c_out"]
    kiter = iter(jax.random.split(key, 512))

    def nrm(shape, scale=0.02):
        return scale * jax.random.normal(next(kiter), shape, dtype=jnp.float32)

    def emb(c_in):
        return dict(
            token_w=nrm((d_model, c_in, 3)),          # TokenEmbedding Conv1d weight
            month_emb=nrm((13, d_model)),
            day_emb=nrm((32, d_model)),
            weekday_emb=nrm((7, d_model)),
            hour_emb=nrm((24, d_model)),
            minute_emb=nrm((4, d_model)),
        )

    def attn():
        return dict(
            wq=nrm((d_model, d_model)), bq=nrm((d_model,)),
            wk=nrm((d_model, d_model)), bk=nrm((d_model,)),
            wv=nrm((d_model, d_model)), bv=nrm((d_model,)),
            wo=nrm((d_model, d_model)), bo=nrm((d_model,)),
        )

    return dict(
        enc_emb=emb(cfg["enc_in"]),
        dec_emb=emb(cfg["dec_in"]),
        enc_layers=[dict(attn=attn(),
                         conv1_w=nrm((d_model, d_ff)),
                         conv2_w=nrm((d_ff, d_model)))
                    for _ in range(cfg["e_layers"])],
        enc_norm_g=jnp.ones((d_model,), jnp.float32),
        enc_norm_b=jnp.zeros((d_model,), jnp.float32),
        dec_layers=[dict(self_attn=attn(), cross_attn=attn(),
                         conv1_w=nrm((d_model, d_ff)),
                         conv2_w=nrm((d_ff, d_model)),
                         proj_w=nrm((c_out, d_model, 3)))
                    for _ in range(cfg["d_layers"])],
        dec_norm_g=jnp.ones((d_model,), jnp.float32),
        dec_norm_b=jnp.zeros((d_model,), jnp.float32),
        dec_proj_w=nrm((d_model, c_out)),
        dec_proj_b=nrm((c_out,)),
    )


# --------------------------------------------------------------------------------------
if __name__ == "__main__":
    cfg = dict(seq_len=16, label_len=8, pred_len=16, moving_avg=5,
               enc_in=1, dec_in=1, c_out=1, d_model=32, d_ff=64,
               n_heads=4, e_layers=1, d_layers=1, factor=2,
               activation="gelu", freq="t")

    key = jax.random.PRNGKey(0)
    kp, k1, k2, k3, k4 = jax.random.split(key, 5)
    params = init_params(kp, cfg)
    pp = prepare_params(params, cfg)     # one-time weight fusion / padding / bf16 cast

    B = 2
    dec_len = cfg["label_len"] + cfg["pred_len"]
    x_enc = jax.random.normal(k1, (B, cfg["seq_len"], cfg["enc_in"]), jnp.float32)
    x_dec = jax.random.normal(k2, (B, dec_len, cfg["dec_in"]), jnp.float32)
    # time marks for freq='t': [month, day, weekday, hour, minute//15] integer features
    maxes = jnp.array([13, 32, 7, 24, 4], jnp.int32)
    x_mark_enc = jax.random.randint(k3, (B, cfg["seq_len"], 5), 0, 10_000) % maxes
    x_mark_dec = jax.random.randint(k4, (B, dec_len, 5), 0, 10_000) % maxes

    fwd = jax.jit(lambda p, xe, me, xd, md: autoformer_forward(p, cfg, xe, me, xd, md))
    out = fwd(pp, x_enc, x_mark_enc, x_dec, x_mark_dec)
    jax.block_until_ready(out)

    assert out.shape == (B, cfg["pred_len"], cfg["c_out"]), out.shape
    assert bool(jnp.all(jnp.isfinite(out)))
    print("KERNEL_OK")
</pallas_src>

<mosaic_0001>
module attributes {stable_mosaic.version = 11 : i64} {
  func.func @_embed_kernel(%arg0: i32, %arg1: memref<1x16x128xf32, #tpu.memory_space<vmem>>, %arg2: memref<1x16x128xf32, #tpu.memory_space<vmem>>, %arg3: memref<384x128xbf16, #tpu.memory_space<vmem>>, %arg4: memref<1x16x128xf32, #tpu.memory_space<vmem>>, %arg5: memref<18x128xf32, #tpu.memory_space<vmem>>) attributes {dimension_semantics = [#tpu.dimension_semantics<parallel>], iteration_bounds = array<i64: 2>, scalar_prefetch = 0 : i64, scratch_operands = 1 : i64, tpu.core_type = #tpu.core_type<tc>, window_params = [{transform_indices = @transform_0, window_bounds = array<i64: 1, 16, 128>}, {transform_indices = @transform_1, window_bounds = array<i64: 1, 16, 128>}, {pipeline_mode = #tpu.pipeline_mode<synchronous>, transform_indices = @transform_2, window_bounds = array<i64: 384, 128>}, {transform_indices = @transform_3, window_bounds = array<i64: 1, 16, 128>}]} {
    %c0 = arith.constant 0 : index
    %c0_0 = arith.constant 0 : index
    %c0_1 = arith.constant 0 : index
    %0 = vector.load %arg1[%c0, %c0_0, %c0_1] : memref<1x16x128xf32, #tpu.memory_space<vmem>>, vector<1x16x128xf32>
    %1 = vector.shape_cast %0 : vector<1x16x128xf32> to vector<16x128xf32>
    %c0_2 = arith.constant 0 : index
    %c0_3 = arith.constant 0 : index
    %2 = vector.load %arg3[%c0_2, %c0_3] : memref<384x128xbf16, #tpu.memory_space<vmem>>, vector<384x128xbf16>
    %c1 = arith.constant 1 : index
    %c0_4 = arith.constant 0 : index
    %3 = vector.load %arg5[%c1, %c0_4] : memref<18x128xf32, #tpu.memory_space<vmem>>, vector<16x128xf32>
    tpu.vector_store %arg5[%c1, %c0_4], %1 {strides = array<i32>} : memref<18x128xf32, #tpu.memory_space<vmem>>, vector<16x128xf32>,
    %4 = vector.extract_strided_slice %1 {offsets = [15, 0], sizes = [1, 128], strides = [1, 1]} : vector<16x128xf32> to vector<1x128xf32>
    %c0_5 = arith.constant 0 : index
    %c0_6 = arith.constant 0 : index
    %5 = vector.load %arg5[%c0_5, %c0_6] : memref<18x128xf32, #tpu.memory_space<vmem>>, vector<1x128xf32>
    tpu.vector_store %arg5[%c0_5, %c0_6], %4 {strides = array<i32>} : memref<18x128xf32, #tpu.memory_space<vmem>>, vector<1x128xf32>,
    %6 = vector.extract_strided_slice %1 {offsets = [0, 0], sizes = [1, 128], strides = [1, 1]} : vector<16x128xf32> to vector<1x128xf32>
    %c17 = arith.constant 17 : index
    %c0_7 = arith.constant 0 : index
    %7 = vector.load %arg5[%c17, %c0_7] : memref<18x128xf32, #tpu.memory_space<vmem>>, vector<1x128xf32>
    tpu.vector_store %arg5[%c17, %c0_7], %6 {strides = array<i32>} : memref<18x128xf32, #tpu.memory_space<vmem>>, vector<1x128xf32>,
    %c0_8 = arith.constant 0 : index
    %c0_9 = arith.constant 0 : index
    %8 = vector.load %arg5[%c0_8, %c0_9] : memref<18x128xf32, #tpu.memory_space<vmem>>, vector<16x128xf32>
    %9 = arith.truncf %8 : vector<16x128xf32> to vector<16x128xbf16>
    %10 = vector.extract_strided_slice %2 {offsets = [0, 0], sizes = [128, 128], strides = [1, 1]} : vector<384x128xbf16> to vector<128x128xbf16>
    %cst = arith.constant dense<0.000000e+00> : vector<16x128xf32>
    %11 = tpu.matmul %9, %10, %cst {dimension_numbers = #tpu.dot_dimension_numbers<[1], [0], [0], [1], [0, 0, 1, 1], [], []>} : vector<16x128xbf16>, vector<128x128xbf16>, vector<16x128xf32> -> vector<16x128xf32>
    %c1_10 = arith.constant 1 : index
    %c0_11 = arith.constant 0 : index
    %12 = vector.load %arg5[%c1_10, %c0_11] : memref<18x128xf32, #tpu.memory_space<vmem>>, vector<16x128xf32>
    %13 = arith.truncf %12 : vector<16x128xf32> to vector<16x128xbf16>
    %14 = vector.extract_strided_slice %2 {offsets = [128, 0], sizes = [128, 128], strides = [1, 1]} : vector<384x128xbf16> to vector<128x128xbf16>
    %cst_12 = arith.constant dense<0.000000e+00> : vector<16x128xf32>
    %15 = tpu.matmul %13, %14, %cst_12 {dimension_numbers = #tpu.dot_dimension_numbers<[1], [0], [0], [1], [0, 0, 1, 1], [], []>} : vector<16x128xbf16>, vector<128x128xbf16>, vector<16x128xf32> -> vector<16x128xf32>
    %16 = arith.addf %11, %15 : vector<16x128xf32>
    %c2 = arith.constant 2 : index
    %c0_13 = arith.constant 0 : index
    %17 = vector.load %arg5[%c2, %c0_13] : memref<18x128xf32, #tpu.memory_space<vmem>>, vector<16x128xf32>
    %18 = arith.truncf %17 : vector<16x128xf32> to vector<16x128xbf16>
    %19 = vector.extract_strided_slice %2 {offsets = [256, 0], sizes = [128, 128], strides = [1, 1]} : vector<384x128xbf16> to vector<128x128xbf16>
    %cst_14 = arith.constant dense<0.000000e+00> : vector<16x128xf32>
    %20 = tpu.matmul %18, %19, %cst_14 {dimension_numbers = #tpu.dot_dimension_numbers<[1], [0], [0], [1], [0, 0, 1, 1], [], []>} : vector<16x128xbf16>, vector<128x128xbf16>, vector<16x128xf32> -> vector<16x128xf32>
    %21 = arith.addf %16, %20 : vector<16x128xf32>
    %c0_15 = arith.constant 0 : index
    %c0_16 = arith.constant 0 : index
    %c0_17 = arith.constant 0 : index
    %22 = vector.load %arg2[%c0_15, %c0_16, %c0_17] : memref<1x16x128xf32, #tpu.memory_space<vmem>>, vector<1x16x128xf32>
    %23 = vector.shape_cast %21 : vector<16x128xf32> to vector<1x16x128xf32>
    %24 = arith.addf %22, %23 : vector<1x16x128xf32>
    %c0_18 = arith.constant 0 : index
    %c0_19 = arith.constant 0 : index
    %c0_20 = arith.constant 0 : index
    %25 = vector.load %arg4[%c0_18, %c0_19, %c0_20] : memref<1x16x128xf32, #tpu.memory_space<vmem>>, vector<1x16x128xf32>
    tpu.vector_store %arg4[%c0_18, %c0_19, %c0_20], %24 {strides = array<i32>} : memref<1x16x128xf32, #tpu.memory_space<vmem>>, vector<1x16x128xf32>,
    return
  }
  func.func @transform_0(%arg0: i32) -> (i32, i32, i32) {
    %c0_i32 = arith.constant 0 : i32
    %c0_i32_0 = arith.constant 0 : i32
    %c0_i32_1 = arith.constant 0 : i32
    return %arg0, %c0_i32, %c0_i32_0 : i32, i32, i32
  }
  func.func @transform_1(%arg0: i32) -> (i32, i32, i32) {
    %c0_i32 = arith.constant 0 : i32
    %c0_i32_0 = arith.constant 0 : i32
    %c0_i32_1 = arith.constant 0 : i32
    return %arg0, %c0_i32, %c0_i32_0 : i32, i32, i32
  }
  func.func @transform_2(%arg0: i32) -> (i32, i32) {
    %c0_i32 = arith.constant 0 : i32
    %c0_i32_0 = arith.constant 0 : i32
    %c0_i32_1 = arith.constant 0 : i32
    return %c0_i32, %c0_i32_0 : i32, i32
  }
  func.func @transform_3(%arg0: i32) -> (i32, i32, i32) {
    %c0_i32 = arith.constant 0 : i32
    %c0_i32_0 = arith.constant 0 : i32
    %c0_i32_1 = arith.constant 0 : i32
    return %arg0, %c0_i32, %c0_i32_0 : i32, i32, i32
  }
}

module attributes {stable_mosaic.version = 11 : i64} {
  func.func @_linear_kernel(%arg0: i32, %arg1: memref<1x16x128xf32, #tpu.memory_space<vmem>>, %arg2: memref<128x128xbf16, #tpu.memory_space<vmem>>, %arg3: memref<1x128xf32, #tpu.memory_space<vmem>>, %arg4: memref<1x16x128xf32, #tpu.memory_space<vmem>>) attributes {dimension_semantics = [#tpu.dimension_semantics<parallel>], iteration_bounds = array<i64: 2>, scalar_prefetch = 0 : i64, scratch_operands = 0 : i64, tpu.core_type = #tpu.core_type<tc>, window_params = [{transform_indices = @transform_0, window_bounds = array<i64: 1, 16, 128>}, {pipeline_mode = #tpu.pipeline_mode<synchronous>, transform_indices = @transform_1, window_bounds = array<i64: 128, 128>}, {pipeline_mode = #tpu.pipeline_mode<synchronous>, transform_indices = @transform_2, window_bounds = array<i64: 1, 128>}, {transform_indices = @transform_3, window_bounds = array<i64: 1, 16, 128>}]} {
    %c0 = arith.constant 0 : index
    %c0_0 = arith.constant 0 : index
    %c0_1 = arith.constant 0 : index
    %0 = vector.load %arg1[%c0, %c0_0, %c0_1] : memref<1x16x128xf32, #tpu.memory_space<vmem>>, vector<1x16x128xf32>
    %1 = vector.shape_cast %0 : vector<1x16x128xf32> to vector<16x128xf32>
    %2 = arith.truncf %1 : vector<16x128xf32> to vector<16x128xbf16>
    %c0_2 = arith.constant 0 : index
    %c0_3 = arith.constant 0 : index
    %3 = vector.load %arg2[%c0_2, %c0_3] : memref<128x128xbf16, #tpu.memory_space<vmem>>, vector<128x128xbf16>
    %cst = arith.constant dense<0.000000e+00> : vector<16x128xf32>
    %4 = tpu.matmul %2, %3, %cst {dimension_numbers = #tpu.dot_dimension_numbers<[1], [0], [0], [1], [0, 0, 1, 1], [], []>} : vector<16x128xbf16>, vector<128x128xbf16>, vector<16x128xf32> -> vector<16x128xf32>
    %c0_4 = arith.constant 0 : index
    %c0_5 = arith.constant 0 : index
    %5 = vector.load %arg3[%c0_4, %c0_5] : memref<1x128xf32, #tpu.memory_space<vmem>>, vector<1x128xf32>
    %6 = vector.broadcast %5 : vector<1x128xf32> to vector<16x128xf32>
    %7 = arith.addf %4, %6 : vector<16x128xf32>
    %8 = vector.shape_cast %7 : vector<16x128xf32> to vector<1x16x128xf32>
    %c0_6 = arith.constant 0 : index
    %c0_7 = arith.constant 0 : index
    %c0_8 = arith.constant 0 : index
    %9 = vector.load %arg4[%c0_6, %c0_7, %c0_8] : memref<1x16x128xf32, #tpu.memory_space<vmem>>, vector<1x16x128xf32>
    tpu.vector_store %arg4[%c0_6, %c0_7, %c0_8], %8 {strides = array<i32>} : memref<1x16x128xf32, #tpu.memory_space<vmem>>, vector<1x16x128xf32>,
    return
  }
  func.func @transform_0(%arg0: i32) -> (i32, i32, i32) {
    %c0_i32 = arith.constant 0 : i32
    %c0_i32_0 = arith.constant 0 : i32
    %c0_i32_1 = arith.constant 0 : i32
    return %arg0, %c0_i32, %c0_i32_0 : i32, i32, i32
  }
  func.func @transform_1(%arg0: i32) -> (i32, i32) {
    %c0_i32 = arith.constant 0 : i32
    %c0_i32_0 = arith.constant 0 : i32
    %c0_i32_1 = arith.constant 0 : i32
    return %c0_i32, %c0_i32_0 : i32, i32
  }
  func.func @transform_2(%arg0: i32) -> (i32, i32) {
    %c0_i32 = arith.constant 0 : i32
    %c0_i32_0 = arith.constant 0 : i32
    %c0_i32_1 = arith.constant 0 : i32
    return %c0_i32, %c0_i32_0 : i32, i32
  }
  func.func @transform_3(%arg0: i32) -> (i32, i32, i32) {
    %c0_i32 = arith.constant 0 : i32
    %c0_i32_0 = arith.constant 0 : i32
    %c0_i32_1 = arith.constant 0 : i32
    return %arg0, %c0_i32, %c0_i32_0 : i32, i32, i32
  }
}

module attributes {stable_mosaic.version = 11 : i64} {
  func.func @_attn_proj_decomp_kernel(%arg0: i32, %arg1: memref<1x16x32xf32, #tpu.memory_space<vmem>>, %arg2: memref<1x16x128xf32, #tpu.memory_space<vmem>>, %arg3: memref<32x128xbf16, #tpu.memory_space<vmem>>, %arg4: memref<1x128xf32, #tpu.memory_space<vmem>>, %arg5: memref<1x16x128xf32, #tpu.memory_space<vmem>>, %arg6: memref<1x16x128xf32, #tpu.memory_space<vmem>>, %arg7: memref<1x20x128xf32, #tpu.memory_space<vmem>>) attributes {dimension_semantics = [#tpu.dimension_semantics<parallel>], iteration_bounds = array<i64: 2>, scalar_prefetch = 0 : i64, scratch_operands = 1 : i64, tpu.core_type = #tpu.core_type<tc>, window_params = [{transform_indices = @transform_0, window_bounds = array<i64: 1, 16, 32>}, {transform_indices = @transform_1, window_bounds = array<i64: 1, 16, 128>}, {pipeline_mode = #tpu.pipeline_mode<synchronous>, transform_indices = @transform_2, window_bounds = array<i64: 32, 128>}, {pipeline_mode = #tpu.pipeline_mode<synchronous>, transform_indices = @transform_3, window_bounds = array<i64: 1, 128>}, {transform_indices = @transform_4, window_bounds = array<i64: 1, 16, 128>}, {transform_indices = @transform_5, window_bounds = array<i64: 1, 16, 128>}]} {
    %c0 = arith.constant 0 : index
    %c0_0 = arith.constant 0 : index
    %c0_1 = arith.constant 0 : index
    %0 = vector.load %arg1[%c0, %c0_0, %c0_1] : memref<1x16x32xf32, #tpu.memory_space<vmem>>, vector<1x16x32xf32>
    %1 = vector.shape_cast %0 : vector<1x16x32xf32> to vector<16x32xf32>
    %2 = arith.truncf %1 : vector<16x32xf32> to vector<16x32xbf16>
    %c0_2 = arith.constant 0 : index
    %c0_3 = arith.constant 0 : index
    %3 = vector.load %arg3[%c0_2, %c0_3] : memref<32x128xbf16, #tpu.memory_space<vmem>>, vector<32x128xbf16>
    %cst = arith.constant dense<0.000000e+00> : vector<16x128xf32>
    %4 = tpu.matmul %2, %3, %cst {dimension_numbers = #tpu.dot_dimension_numbers<[1], [0], [0], [1], [0, 0, 1, 1], [], []>} : vector<16x32xbf16>, vector<32x128xbf16>, vector<16x128xf32> -> vector<16x128xf32>
    %c0_4 = arith.constant 0 : index
    %c0_5 = arith.constant 0 : index
    %5 = vector.load %arg4[%c0_4, %c0_5] : memref<1x128xf32, #tpu.memory_space<vmem>>, vector<1x128xf32>
    %6 = vector.broadcast %5 : vector<1x128xf32> to vector<16x128xf32>
    %7 = arith.addf %4, %6 : vector<16x128xf32>
    %c0_6 = arith.constant 0 : index
    %c0_7 = arith.constant 0 : index
    %c0_8 = arith.constant 0 : index
    %8 = vector.load %arg2[%c0_6, %c0_7, %c0_8] : memref<1x16x128xf32, #tpu.memory_space<vmem>>, vector<1x16x128xf32>
    %9 = vector.shape_cast %7 : vector<16x128xf32> to vector<1x16x128xf32>
    %10 = arith.addf %8, %9 : vector<1x16x128xf32>
    %c0_9 = arith.constant 0 : index
    %c2 = arith.constant 2 : index
    %c0_10 = arith.constant 0 : index
    %11 = vector.load %arg7[%c0_9, %c2, %c0_10] : memref<1x20x128xf32, #tpu.memory_space<vmem>>, vector<1x16x128xf32>
    tpu.vector_store %arg7[%c0_9, %c2, %c0_10], %10 {strides = array<i32>} : memref<1x20x128xf32, #tpu.memory_space<vmem>>, vector<1x16x128xf32>,
    %12 = vector.extract_strided_slice %10 {offsets = [0, 0, 0], sizes = [1, 1, 128], strides = [1, 1, 1]} : vector<1x16x128xf32> to vector<1x1x128xf32>
    %c0_11 = arith.constant 0 : index
    %c0_12 = arith.constant 0 : index
    %c0_13 = arith.constant 0 : index
    %13 = vector.load %arg7[%c0_11, %c0_12, %c0_13] : memref<1x20x128xf32, #tpu.memory_space<vmem>>, vector<1x1x128xf32>
    tpu.vector_store %arg7[%c0_11, %c0_12, %c0_13], %12 {strides = array<i32>} : memref<1x20x128xf32, #tpu.memory_space<vmem>>, vector<1x1x128xf32>,
    %14 = vector.extract_strided_slice %10 {offsets = [0, 0, 0], sizes = [1, 1, 128], strides = [1, 1, 1]} : vector<1x16x128xf32> to vector<1x1x128xf32>
    %c0_14 = arith.constant 0 : index
    %c1 = arith.constant 1 : index
    %c0_15 = arith.constant 0 : index
    %15 = vector.load %arg7[%c0_14, %c1, %c0_15] : memref<1x20x128xf32, #tpu.memory_space<vmem>>, vector<1x1x128xf32>
    tpu.vector_store %arg7[%c0_14, %c1, %c0_15], %14 {strides = array<i32>} : memref<1x20x128xf32, #tpu.memory_space<vmem>>, vector<1x1x128xf32>,
    %16 = vector.extract_strided_slice %10 {offsets = [0, 15, 0], sizes = [1, 1, 128], strides = [1, 1, 1]} : vector<1x16x128xf32> to vector<1x1x128xf32>
    %c0_16 = arith.constant 0 : index
    %c18 = arith.constant 18 : index
    %c0_17 = arith.constant 0 : index
    %17 = vector.load %arg7[%c0_16, %c18, %c0_17] : memref<1x20x128xf32, #tpu.memory_space<vmem>>, vector<1x1x128xf32>
    tpu.vector_store %arg7[%c0_16, %c18, %c0_17], %16 {strides = array<i32>} : memref<1x20x128xf32, #tpu.memory_space<vmem>>, vector<1x1x128xf32>,
    %18 = vector.extract_strided_slice %10 {offsets = [0, 15, 0], sizes = [1, 1, 128], strides = [1, 1, 1]} : vector<1x16x128xf32> to vector<1x1x128xf32>
    %c0_18 = arith.constant 0 : index
    %c19 = arith.constant 19 : index
    %c0_19 = arith.constant 0 : index
    %19 = vector.load %arg7[%c0_18, %c19, %c0_19] : memref<1x20x128xf32, #tpu.memory_space<vmem>>, vector<1x1x128xf32>
    tpu.vector_store %arg7[%c0_18, %c19, %c0_19], %18 {strides = array<i32>} : memref<1x20x128xf32, #tpu.memory_space<vmem>>, vector<1x1x128xf32>,
    %c0_20 = arith.constant 0 : index
    %c0_21 = arith.constant 0 : index
    %c0_22 = arith.constant 0 : index
    %20 = vector.load %arg7[%c0_20, %c0_21, %c0_22] : memref<1x20x128xf32, #tpu.memory_space<vmem>>, vector<1x16x128xf32>
    %c0_23 = arith.constant 0 : index
    %c1_24 = arith.constant 1 : index
    %c0_25 = arith.constant 0 : index
    %21 = vector.load %arg7[%c0_23, %c1_24, %c0_25] : memref<1x20x128xf32, #tpu.memory_space<vmem>>, vector<1x16x128xf32>
    %22 = arith.addf %20, %21 : vector<1x16x128xf32>
    %c0_26 = arith.constant 0 : index
    %c2_27 = arith.constant 2 : index
    %c0_28 = arith.constant 0 : index
    %23 = vector.load %arg7[%c0_26, %c2_27, %c0_28] : memref<1x20x128xf32, #tpu.memory_space<vmem>>, vector<1x16x128xf32>
    %24 = arith.addf %22, %23 : vector<1x16x128xf32>
    %c0_29 = arith.constant 0 : index
    %c3 = arith.constant 3 : index
    %c0_30 = arith.constant 0 : index
    %25 = vector.load %arg7[%c0_29, %c3, %c0_30] : memref<1x20x128xf32, #tpu.memory_space<vmem>>, vector<1x16x128xf32>
    %26 = arith.addf %24, %25 : vector<1x16x128xf32>
    %c0_31 = arith.constant 0 : index
    %c4 = arith.constant 4 : index
    %c0_32 = arith.constant 0 : index
    %27 = vector.load %arg7[%c0_31, %c4, %c0_32] : memref<1x20x128xf32, #tpu.memory_space<vmem>>, vector<1x16x128xf32>
    %28 = arith.addf %26, %27 : vector<1x16x128xf32>
    %cst_33 = arith.constant 2.000000e-01 : f32
    %29 = vector.broadcast %cst_33 : f32 to vector<1x16x128xf32>
    %30 = arith.mulf %28, %29 : vector<1x16x128xf32>
    %31 = arith.subf %10, %30 : vector<1x16x128xf32>
    %c0_34 = arith.constant 0 : index
    %c0_35 = arith.constant 0 : index
    %c0_36 = arith.constant 0 : index
    %32 = vector.load %arg5[%c0_34, %c0_35, %c0_36] : memref<1x16x128xf32, #tpu.memory_space<vmem>>, vector<1x16x128xf32>
    tpu.vector_store %arg5[%c0_34, %c0_35, %c0_36], %31 {strides = array<i32>} : memref<1x16x128xf32, #tpu.memory_space<vmem>>, vector<1x16x128xf32>,
    %c0_37 = arith.constant 0 : index
    %c0_38 = arith.constant 0 : index
    %c0_39 = arith.constant 0 : index
    %33 = vector.load %arg6[%c0_37, %c0_38, %c0_39] : memref<1x16x128xf32, #tpu.memory_space<vmem>>, vector<1x16x128xf32>
    tpu.vector_store %arg6[%c0_37, %c0_38, %c0_39], %30 {strides = array<i32>} : memref<1x16x128xf32, #tpu.memory_space<vmem>>, vector<1x16x128xf32>,
    return
  }
  func.func @transform_0(%arg0: i32) -> (i32, i32, i32) {
    %c0_i32 = arith.constant 0 : i32
    %c0_i32_0 = arith.constant 0 : i32
    %c0_i32_1 = arith.constant 0 : i32
    return %arg0, %c0_i32, %c0_i32_0 : i32, i32, i32
  }
  func.func @transform_1(%arg0: i32) -> (i32, i32, i32) {
    %c0_i32 = arith.constant 0 : i32
    %c0_i32_0 = arith.constant 0 : i32
    %c0_i32_1 = arith.constant 0 : i32
    return %arg0, %c0_i32, %c0_i32_0 : i32, i32, i32
  }
  func.func @transform_2(%arg0: i32) -> (i32, i32) {
    %c0_i32 = arith.constant 0 : i32
    %c0_i32_0 = arith.constant 0 : i32
    %c0_i32_1 = arith.constant 0 : i32
    return %c0_i32, %c0_i32_0 : i32, i32
  }
  func.func @transform_3(%arg0: i32) -> (i32, i32) {
    %c0_i32 = arith.constant 0 : i32
    %c0_i32_0 = arith.constant 0 : i32
    %c0_i32_1 = arith.constant 0 : i32
    return %c0_i32, %c0_i32_0 : i32, i32
  }
  func.func @transform_4(%arg0: i32) -> (i32, i32, i32) {
    %c0_i32 = arith.constant 0 : i32
    %c0_i32_0 = arith.constant 0 : i32
    %c0_i32_1 = arith.constant 0 : i32
    return %arg0, %c0_i32, %c0_i32_0 : i32, i32, i32
  }
  func.func @transform_5(%arg0: i32) -> (i32, i32, i32) {
    %c0_i32 = arith.constant 0 : i32
    %c0_i32_0 = arith.constant 0 : i32
    %c0_i32_1 = arith.constant 0 : i32
    return %arg0, %c0_i32, %c0_i32_0 : i32, i32, i32
  }
}

module attributes {stable_mosaic.version = 11 : i64} {
  func.func @_ffn_decomp_kernel(%arg0: i32, %arg1: memref<1x16x128xf32, #tpu.memory_space<vmem>>, %arg2: memref<128x128xbf16, #tpu.memory_space<vmem>>, %arg3: memref<128x128xbf16, #tpu.memory_space<vmem>>, %arg4: memref<1x16x128xf32, #tpu.memory_space<vmem>>, %arg5: memref<1x16x128xf32, #tpu.memory_space<vmem>>, %arg6: memref<1x20x128xf32, #tpu.memory_space<vmem>>) attributes {dimension_semantics = [#tpu.dimension_semantics<parallel>], iteration_bounds = array<i64: 2>, scalar_prefetch = 0 : i64, scratch_operands = 1 : i64, tpu.core_type = #tpu.core_type<tc>, window_params = [{transform_indices = @transform_0, window_bounds = array<i64: 1, 16, 128>}, {pipeline_mode = #tpu.pipeline_mode<synchronous>, transform_indices = @transform_1, window_bounds = array<i64: 128, 128>}, {pipeline_mode = #tpu.pipeline_mode<synchronous>, transform_indices = @transform_2, window_bounds = array<i64: 128, 128>}, {transform_indices = @transform_3, window_bounds = array<i64: 1, 16, 128>}, {transform_indices = @transform_4, window_bounds = array<i64: 1, 16, 128>}]} {
    %c0 = arith.constant 0 : index
    %c0_0 = arith.constant 0 : index
    %c0_1 = arith.constant 0 : index
    %0 = vector.load %arg1[%c0, %c0_0, %c0_1] : memref<1x16x128xf32, #tpu.memory_space<vmem>>, vector<1x16x128xf32>
    %1 = vector.shape_cast %0 : vector<1x16x128xf32> to vector<16x128xf32>
    %2 = arith.truncf %1 : vector<16x128xf32> to vector<16x128xbf16>
    %c0_2 = arith.constant 0 : index
    %c0_3 = arith.constant 0 : index
    %3 = vector.load %arg2[%c0_2, %c0_3] : memref<128x128xbf16, #tpu.memory_space<vmem>>, vector<128x128xbf16>
    %cst = arith.constant dense<0.000000e+00> : vector<16x128xf32>
    %4 = tpu.matmul %2, %3, %cst {dimension_numbers = #tpu.dot_dimension_numbers<[1], [0], [0], [1], [0, 0, 1, 1], [], []>} : vector<16x128xbf16>, vector<128x128xbf16>, vector<16x128xf32> -> vector<16x128xf32>
    %5 = arith.mulf %4, %4 : vector<16x128xf32>
    %6 = arith.mulf %4, %5 : vector<16x128xf32>
    %cst_4 = arith.constant 4.471500e-02 : f32
    %7 = vector.broadcast %cst_4 : f32 to vector<16x128xf32>
    %8 = arith.mulf %7, %6 : vector<16x128xf32>
    %9 = arith.addf %4, %8 : vector<16x128xf32>
    %cst_5 = arith.constant 0.797884583 : f32
    %10 = vector.broadcast %cst_5 : f32 to vector<16x128xf32>
    %11 = arith.mulf %10, %9 : vector<16x128xf32>
    %12 = math.tanh %11 : vector<16x128xf32>
    %cst_6 = arith.constant 1.000000e+00 : f32
    %13 = vector.broadcast %cst_6 : f32 to vector<16x128xf32>
    %14 = arith.addf %13, %12 : vector<16x128xf32>
    %cst_7 = arith.constant 5.000000e-01 : f32
    %15 = vector.broadcast %cst_7 : f32 to vector<16x128xf32>
    %16 = arith.mulf %15, %14 : vector<16x128xf32>
    %17 = arith.mulf %4, %16 : vector<16x128xf32>
    %18 = arith.truncf %17 : vector<16x128xf32> to vector<16x128xbf16>
    %c0_8 = arith.constant 0 : index
    %c0_9 = arith.constant 0 : index
    %19 = vector.load %arg3[%c0_8, %c0_9] : memref<128x128xbf16, #tpu.memory_space<vmem>>, vector<128x128xbf16>
    %cst_10 = arith.constant dense<0.000000e+00> : vector<16x128xf32>
    %20 = tpu.matmul %18, %19, %cst_10 {dimension_numbers = #tpu.dot_dimension_numbers<[1], [0], [0], [1], [0, 0, 1, 1], [], []>} : vector<16x128xbf16>, vector<128x128xbf16>, vector<16x128xf32> -> vector<16x128xf32>
    %21 = vector.shape_cast %20 : vector<16x128xf32> to vector<1x16x128xf32>
    %22 = arith.addf %0, %21 : vector<1x16x128xf32>
    %c0_11 = arith.constant 0 : index
    %c2 = arith.constant 2 : index
    %c0_12 = arith.constant 0 : index
    %23 = vector.load %arg6[%c0_11, %c2, %c0_12] : memref<1x20x128xf32, #tpu.memory_space<vmem>>, vector<1x16x128xf32>
    tpu.vector_store %arg6[%c0_11, %c2, %c0_12], %22 {strides = array<i32>} : memref<1x20x128xf32, #tpu.memory_space<vmem>>, vector<1x16x128xf32>,
    %24 = vector.extract_strided_slice %22 {offsets = [0, 0, 0], sizes = [1, 1, 128], strides = [1, 1, 1]} : vector<1x16x128xf32> to vector<1x1x128xf32>
    %c0_13 = arith.constant 0 : index
    %c0_14 = arith.constant 0 : index
    %c0_15 = arith.constant 0 : index
    %25 = vector.load %arg6[%c0_13, %c0_14, %c0_15] : memref<1x20x128xf32, #tpu.memory_space<vmem>>, vector<1x1x128xf32>
    tpu.vector_store %arg6[%c0_13, %c0_14, %c0_15], %24 {strides = array<i32>} : memref<1x20x128xf32, #tpu.memory_space<vmem>>, vector<1x1x128xf32>,
    %26 = vector.extract_strided_slice %22 {offsets = [0, 0, 0], sizes = [1, 1, 128], strides = [1, 1, 1]} : vector<1x16x128xf32> to vector<1x1x128xf32>
    %c0_16 = arith.constant 0 : index
    %c1 = arith.constant 1 : index
    %c0_17 = arith.constant 0 : index
    %27 = vector.load %arg6[%c0_16, %c1, %c0_17] : memref<1x20x128xf32, #tpu.memory_space<vmem>>, vector<1x1x128xf32>
    tpu.vector_store %arg6[%c0_16, %c1, %c0_17], %26 {strides = array<i32>} : memref<1x20x128xf32, #tpu.memory_space<vmem>>, vector<1x1x128xf32>,
    %28 = vector.extract_strided_slice %22 {offsets = [0, 15, 0], sizes = [1, 1, 128], strides = [1, 1, 1]} : vector<1x16x128xf32> to vector<1x1x128xf32>
    %c0_18 = arith.constant 0 : index
    %c18 = arith.constant 18 : index
    %c0_19 = arith.constant 0 : index
    %29 = vector.load %arg6[%c0_18, %c18, %c0_19] : memref<1x20x128xf32, #tpu.memory_space<vmem>>, vector<1x1x128xf32>
    tpu.vector_store %arg6[%c0_18, %c18, %c0_19], %28 {strides = array<i32>} : memref<1x20x128xf32, #tpu.memory_space<vmem>>, vector<1x1x128xf32>,
    %30 = vector.extract_strided_slice %22 {offsets = [0, 15, 0], sizes = [1, 1, 128], strides = [1, 1, 1]} : vector<1x16x128xf32> to vector<1x1x128xf32>
    %c0_20 = arith.constant 0 : index
    %c19 = arith.constant 19 : index
    %c0_21 = arith.constant 0 : index
    %31 = vector.load %arg6[%c0_20, %c19, %c0_21] : memref<1x20x128xf32, #tpu.memory_space<vmem>>, vector<1x1x128xf32>
    tpu.vector_store %arg6[%c0_20, %c19, %c0_21], %30 {strides = array<i32>} : memref<1x20x128xf32, #tpu.memory_space<vmem>>, vector<1x1x128xf32>,
    %c0_22 = arith.constant 0 : index
    %c0_23 = arith.constant 0 : index
    %c0_24 = arith.constant 0 : index
    %32 = vector.load %arg6[%c0_22, %c0_23, %c0_24] : memref<1x20x128xf32, #tpu.memory_space<vmem>>, vector<1x16x128xf32>
    %c0_25 = arith.constant 0 : index
    %c1_26 = arith.constant 1 : index
    %c0_27 = arith.constant 0 : index
    %33 = vector.load %arg6[%c0_25, %c1_26, %c0_27] : memref<1x20x128xf32, #tpu.memory_space<vmem>>, vector<1x16x128xf32>
    %34 = arith.addf %32, %33 : vector<1x16x128xf32>
    %c0_28 = arith.constant 0 : index
    %c2_29 = arith.constant 2 : index
    %c0_30 = arith.constant 0 : index
    %35 = vector.load %arg6[%c0_28, %c2_29, %c0_30] : memref<1x20x128xf32, #tpu.memory_space<vmem>>, vector<1x16x128xf32>
    %36 = arith.addf %34, %35 : vector<1x16x128xf32>
    %c0_31 = arith.constant 0 : index
    %c3 = arith.constant 3 : index
    %c0_32 = arith.constant 0 : index
    %37 = vector.load %arg6[%c0_31, %c3, %c0_32] : memref<1x20x128xf32, #tpu.memory_space<vmem>>, vector<1x16x128xf32>
    %38 = arith.addf %36, %37 : vector<1x16x128xf32>
    %c0_33 = arith.constant 0 : index
    %c4 = arith.constant 4 : index
    %c0_34 = arith.constant 0 : index
    %39 = vector.load %arg6[%c0_33, %c4, %c0_34] : memref<1x20x128xf32, #tpu.memory_space<vmem>>, vector<1x16x128xf32>
    %40 = arith.addf %38, %39 : vector<1x16x128xf32>
    %cst_35 = arith.constant 2.000000e-01 : f32
    %41 = vector.broadcast %cst_35 : f32 to vector<1x16x128xf32>
    %42 = arith.mulf %40, %41 : vector<1x16x128xf32>
    %43 = arith.subf %22, %42 : vector<1x16x128xf32>
    %c0_36 = arith.constant 0 : index
    %c0_37 = arith.constant 0 : index
    %c0_38 = arith.constant 0 : index
    %44 = vector.load %arg4[%c0_36, %c0_37, %c0_38] : memref<1x16x128xf32, #tpu.memory_space<vmem>>, vector<1x16x128xf32>
    tpu.vector_store %arg4[%c0_36, %c0_37, %c0_38], %43 {strides = array<i32>} : memref<1x16x128xf32, #tpu.memory_space<vmem>>, vector<1x16x128xf32>,
    %c0_39 = arith.constant 0 : index
    %c0_40 = arith.constant 0 : index
    %c0_41 = arith.constant 0 : index
    %45 = vector.load %arg5[%c0_39, %c0_40, %c0_41] : memref<1x16x128xf32, #tpu.memory_space<vmem>>, vector<1x16x128xf32>
    tpu.vector_store %arg5[%c0_39, %c0_40, %c0_41], %42 {strides = array<i32>} : memref<1x16x128xf32, #tpu.memory_space<vmem>>, vector<1x16x128xf32>,
    return
  }
  func.func @transform_0(%arg0: i32) -> (i32, i32, i32) {
    %c0_i32 = arith.constant 0 : i32
    %c0_i32_0 = arith.constant 0 : i32
    %c0_i32_1 = arith.constant 0 : i32
    return %arg0, %c0_i32, %c0_i32_0 : i32, i32, i32
  }
  func.func @transform_1(%arg0: i32) -> (i32, i32) {
    %c0_i32 = arith.constant 0 : i32
    %c0_i32_0 = arith.constant 0 : i32
    %c0_i32_1 = arith.constant 0 : i32
    return %c0_i32, %c0_i32_0 : i32, i32
  }
  func.func @transform_2(%arg0: i32) -> (i32, i32) {
    %c0_i32 = arith.constant 0 : i32
    %c0_i32_0 = arith.constant 0 : i32
    %c0_i32_1 = arith.constant 0 : i32
    return %c0_i32, %c0_i32_0 : i32, i32
  }
  func.func @transform_3(%arg0: i32) -> (i32, i32, i32) {
    %c0_i32 = arith.constant 0 : i32
    %c0_i32_0 = arith.constant 0 : i32
    %c0_i32_1 = arith.constant 0 : i32
    return %arg0, %c0_i32, %c0_i32_0 : i32, i32, i32
  }
  func.func @transform_4(%arg0: i32) -> (i32, i32, i32) {
    %c0_i32 = arith.constant 0 : i32
    %c0_i32_0 = arith.constant 0 : i32
    %c0_i32_1 = arith.constant 0 : i32
    return %arg0, %c0_i32, %c0_i32_0 : i32, i32, i32
  }
}

module attributes {stable_mosaic.version = 11 : i64} {
  func.func @_norm_kernel(%arg0: i32, %arg1: memref<1x16x128xf32, #tpu.memory_space<vmem>>, %arg2: memref<1x1x128xf32, #tpu.memory_space<vmem>>, %arg3: memref<1x1x128xf32, #tpu.memory_space<vmem>>, %arg4: memref<1x16x128xf32, #tpu.memory_space<vmem>>) attributes {dimension_semantics = [#tpu.dimension_semantics<parallel>], iteration_bounds = array<i64: 2>, scalar_prefetch = 0 : i64, scratch_operands = 0 : i64, tpu.core_type = #tpu.core_type<tc>, window_params = [{transform_indices = @transform_0, window_bounds = array<i64: 1, 16, 128>}, {pipeline_mode = #tpu.pipeline_mode<synchronous>, transform_indices = @transform_1, window_bounds = array<i64: 1, 1, 128>}, {pipeline_mode = #tpu.pipeline_mode<synchronous>, transform_indices = @transform_2, window_bounds = array<i64: 1, 1, 128>}, {transform_indices = @transform_3, window_bounds = array<i64: 1, 16, 128>}]} {
    %c0 = arith.constant 0 : index
    %c0_0 = arith.constant 0 : index
    %c0_1 = arith.constant 0 : index
    %0 = vector.load %arg1[%c0, %c0_0, %c0_1] : memref<1x16x128xf32, #tpu.memory_space<vmem>>, vector<1x16x128xf32>
    %c0_2 = arith.constant 0 : index
    %c0_3 = arith.constant 0 : index
    %c0_4 = arith.constant 0 : index
    %1 = vector.load %arg2[%c0_2, %c0_3, %c0_4] : memref<1x1x128xf32, #tpu.memory_space<vmem>>, vector<1x1x128xf32>
    %c0_5 = arith.constant 0 : index
    %c0_6 = arith.constant 0 : index
    %c0_7 = arith.constant 0 : index
    %2 = vector.load %arg3[%c0_5, %c0_6, %c0_7] : memref<1x1x128xf32, #tpu.memory_space<vmem>>, vector<1x1x128xf32>
    %3 = vector.extract_strided_slice %0 {offsets = [0, 0, 0], sizes = [1, 16, 32], strides = [1, 1, 1]} : vector<1x16x128xf32> to vector<1x16x32xf32>
    %cst = arith.constant dense<0.000000e+00> : vector<1x16xf32>
    %4 = vector.multi_reduction <add>, %3, %cst [2] : vector<1x16x32xf32> to vector<1x16xf32>
    %5 = vector.shape_cast %4 : vector<1x16xf32> to vector<1x16x1xf32>
    %cst_8 = arith.constant 3.200000e+01 : f32
    %6 = vector.broadcast %cst_8 : f32 to vector<1x16x1xf32>
    %7 = arith.divf %5, %6 : vector<1x16x1xf32>
    %8 = vector.broadcast %7 : vector<1x16x1xf32> to vector<1x16x32xf32>
    %9 = arith.subf %3, %8 : vector<1x16x32xf32>
    %10 = arith.mulf %9, %9 : vector<1x16x32xf32>
    %cst_9 = arith.constant dense<0.000000e+00> : vector<1x16xf32>
    %11 = vector.multi_reduction <add>, %10, %cst_9 [2] : vector<1x16x32xf32> to vector<1x16xf32>
    %12 = vector.shape_cast %11 : vector<1x16xf32> to vector<1x16x1xf32>
    %cst_10 = arith.constant 3.200000e+01 : f32
    %13 = vector.broadcast %cst_10 : f32 to vector<1x16x1xf32>
    %14 = arith.divf %12, %13 : vector<1x16x1xf32>
    %15 = vector.broadcast %7 : vector<1x16x1xf32> to vector<1x16x128xf32>
    %16 = arith.subf %0, %15 : vector<1x16x128xf32>
    %cst_11 = arith.constant 9.99999974E-6 : f32
    %17 = vector.broadcast %cst_11 : f32 to vector<1x16x1xf32>
    %18 = arith.addf %14, %17 : vector<1x16x1xf32>
    %19 = math.rsqrt %18 : vector<1x16x1xf32>
    %20 = vector.broadcast %19 : vector<1x16x1xf32> to vector<1x16x128xf32>
    %21 = arith.mulf %16, %20 : vector<1x16x128xf32>
    %22 = vector.broadcast %1 : vector<1x1x128xf32> to vector<1x16x128xf32>
    %23 = arith.mulf %21, %22 : vector<1x16x128xf32>
    %24 = vector.broadcast %2 : vector<1x1x128xf32> to vector<1x16x128xf32>
    %25 = arith.addf %23, %24 : vector<1x16x128xf32>
    %cst_12 = arith.constant dense<0.000000e+00> : vector<1x128xf32>
    %26 = vector.multi_reduction <add>, %25, %cst_12 [1] : vector<1x16x128xf32> to vector<1x128xf32>
    %27 = vector.shape_cast %26 : vector<1x128xf32> to vector<1x1x128xf32>
    %cst_13 = arith.constant 1.600000e+01 : f32
    %28 = vector.broadcast %cst_13 : f32 to vector<1x1x128xf32>
    %29 = arith.divf %27, %28 : vector<1x1x128xf32>
    %30 = vector.broadcast %29 : vector<1x1x128xf32> to vector<1x16x128xf32>
    %31 = arith.subf %25, %30 : vector<1x16x128xf32>
    %c0_14 = arith.constant 0 : index
    %c0_15 = arith.constant 0 : index
    %c0_16 = arith.constant 0 : index
    %32 = vector.load %arg4[%c0_14, %c0_15, %c0_16] : memref<1x16x128xf32, #tpu.memory_space<vmem>>, vector<1x16x128xf32>
    tpu.vector_store %arg4[%c0_14, %c0_15, %c0_16], %31 {strides = array<i32>} : memref<1x16x128xf32, #tpu.memory_space<vmem>>, vector<1x16x128xf32>,
    return
  }
  func.func @transform_0(%arg0: i32) -> (i32, i32, i32) {
    %c0_i32 = arith.constant 0 : i32
    %c0_i32_0 = arith.constant 0 : i32
    %c0_i32_1 = arith.constant 0 : i32
    return %arg0, %c0_i32, %c0_i32_0 : i32, i32, i32
  }
  func.func @transform_1(%arg0: i32) -> (i32, i32, i32) {
    %c0_i32 = arith.constant 0 : i32
    %c0_i32_0 = arith.constant 0 : i32
    %c0_i32_1 = arith.constant 0 : i32
    %c0_i32_2 = arith.constant 0 : i32
    return %c0_i32, %c0_i32_0, %c0_i32_1 : i32, i32, i32
  }
  func.func @transform_2(%arg0: i32) -> (i32, i32, i32) {
    %c0_i32 = arith.constant 0 : i32
    %c0_i32_0 = arith.constant 0 : i32
    %c0_i32_1 = arith.constant 0 : i32
    %c0_i32_2 = arith.constant 0 : i32
    return %c0_i32, %c0_i32_0, %c0_i32_1 : i32, i32, i32
  }
  func.func @transform_3(%arg0: i32) -> (i32, i32, i32) {
    %c0_i32 = arith.constant 0 : i32
    %c0_i32_0 = arith.constant 0 : i32
    %c0_i32_1 = arith.constant 0 : i32
    return %arg0, %c0_i32, %c0_i32_0 : i32, i32, i32
  }
}

module attributes {stable_mosaic.version = 11 : i64} {
  func.func @_decomp_kernel(%arg0: i32, %arg1: memref<1x16x128xf32, #tpu.memory_space<vmem>>, %arg2: memref<1x16x128xf32, #tpu.memory_space<vmem>>, %arg3: memref<1x16x128xf32, #tpu.memory_space<vmem>>, %arg4: memref<1x20x128xf32, #tpu.memory_space<vmem>>) attributes {dimension_semantics = [#tpu.dimension_semantics<parallel>], iteration_bounds = array<i64: 2>, scalar_prefetch = 0 : i64, scratch_operands = 1 : i64, tpu.core_type = #tpu.core_type<tc>, window_params = [{transform_indices = @transform_0, window_bounds = array<i64: 1, 16, 128>}, {transform_indices = @transform_1, window_bounds = array<i64: 1, 16, 128>}, {transform_indices = @transform_2, window_bounds = array<i64: 1, 16, 128>}]} {
    %c0 = arith.constant 0 : index
    %c0_0 = arith.constant 0 : index
    %c0_1 = arith.constant 0 : index
    %0 = vector.load %arg1[%c0, %c0_0, %c0_1] : memref<1x16x128xf32, #tpu.memory_space<vmem>>, vector<1x16x128xf32>
    %c0_2 = arith.constant 0 : index
    %c2 = arith.constant 2 : index
    %c0_3 = arith.constant 0 : index
    %1 = vector.load %arg4[%c0_2, %c2, %c0_3] : memref<1x20x128xf32, #tpu.memory_space<vmem>>, vector<1x16x128xf32>
    tpu.vector_store %arg4[%c0_2, %c2, %c0_3], %0 {strides = array<i32>} : memref<1x20x128xf32, #tpu.memory_space<vmem>>, vector<1x16x128xf32>,
    %2 = vector.extract_strided_slice %0 {offsets = [0, 0, 0], sizes = [1, 1, 128], strides = [1, 1, 1]} : vector<1x16x128xf32> to vector<1x1x128xf32>
    %c0_4 = arith.constant 0 : index
    %c0_5 = arith.constant 0 : index
    %c0_6 = arith.constant 0 : index
    %3 = vector.load %arg4[%c0_4, %c0_5, %c0_6] : memref<1x20x128xf32, #tpu.memory_space<vmem>>, vector<1x1x128xf32>
    tpu.vector_store %arg4[%c0_4, %c0_5, %c0_6], %2 {strides = array<i32>} : memref<1x20x128xf32, #tpu.memory_space<vmem>>, vector<1x1x128xf32>,
    %4 = vector.extract_strided_slice %0 {offsets = [0, 0, 0], sizes = [1, 1, 128], strides = [1, 1, 1]} : vector<1x16x128xf32> to vector<1x1x128xf32>
    %c0_7 = arith.constant 0 : index
    %c1 = arith.constant 1 : index
    %c0_8 = arith.constant 0 : index
    %5 = vector.load %arg4[%c0_7, %c1, %c0_8] : memref<1x20x128xf32, #tpu.memory_space<vmem>>, vector<1x1x128xf32>
    tpu.vector_store %arg4[%c0_7, %c1, %c0_8], %4 {strides = array<i32>} : memref<1x20x128xf32, #tpu.memory_space<vmem>>, vector<1x1x128xf32>,
    %6 = vector.extract_strided_slice %0 {offsets = [0, 15, 0], sizes = [1, 1, 128], strides = [1, 1, 1]} : vector<1x16x128xf32> to vector<1x1x128xf32>
    %c0_9 = arith.constant 0 : index
    %c18 = arith.constant 18 : index
    %c0_10 = arith.constant 0 : index
    %7 = vector.load %arg4[%c0_9, %c18, %c0_10] : memref<1x20x128xf32, #tpu.memory_space<vmem>>, vector<1x1x128xf32>
    tpu.vector_store %arg4[%c0_9, %c18, %c0_10], %6 {strides = array<i32>} : memref<1x20x128xf32, #tpu.memory_space<vmem>>, vector<1x1x128xf32>,
    %8 = vector.extract_strided_slice %0 {offsets = [0, 15, 0], sizes = [1, 1, 128], strides = [1, 1, 1]} : vector<1x16x128xf32> to vector<1x1x128xf32>
    %c0_11 = arith.constant 0 : index
    %c19 = arith.constant 19 : index
    %c0_12 = arith.constant 0 : index
    %9 = vector.load %arg4[%c0_11, %c19, %c0_12] : memref<1x20x128xf32, #tpu.memory_space<vmem>>, vector<1x1x128xf32>
    tpu.vector_store %arg4[%c0_11, %c19, %c0_12], %8 {strides = array<i32>} : memref<1x20x128xf32, #tpu.memory_space<vmem>>, vector<1x1x128xf32>,
    %c0_13 = arith.constant 0 : index
    %c0_14 = arith.constant 0 : index
    %c0_15 = arith.constant 0 : index
    %10 = vector.load %arg4[%c0_13, %c0_14, %c0_15] : memref<1x20x128xf32, #tpu.memory_space<vmem>>, vector<1x16x128xf32>
    %c0_16 = arith.constant 0 : index
    %c1_17 = arith.constant 1 : index
    %c0_18 = arith.constant 0 : index
    %11 = vector.load %arg4[%c0_16, %c1_17, %c0_18] : memref<1x20x128xf32, #tpu.memory_space<vmem>>, vector<1x16x128xf32>
    %12 = arith.addf %10, %11 : vector<1x16x128xf32>
    %c0_19 = arith.constant 0 : index
    %c2_20 = arith.constant 2 : index
    %c0_21 = arith.constant 0 : index
    %13 = vector.load %arg4[%c0_19, %c2_20, %c0_21] : memref<1x20x128xf32, #tpu.memory_space<vmem>>, vector<1x16x128xf32>
    %14 = arith.addf %12, %13 : vector<1x16x128xf32>
    %c0_22 = arith.constant 0 : index
    %c3 = arith.constant 3 : index
    %c0_23 = arith.constant 0 : index
    %15 = vector.load %arg4[%c0_22, %c3, %c0_23] : memref<1x20x128xf32, #tpu.memory_space<vmem>>, vector<1x16x128xf32>
    %16 = arith.addf %14, %15 : vector<1x16x128xf32>
    %c0_24 = arith.constant 0 : index
    %c4 = arith.constant 4 : index
    %c0_25 = arith.constant 0 : index
    %17 = vector.load %arg4[%c0_24, %c4, %c0_25] : memref<1x20x128xf32, #tpu.memory_space<vmem>>, vector<1x16x128xf32>
    %18 = arith.addf %16, %17 : vector<1x16x128xf32>
    %cst = arith.constant 2.000000e-01 : f32
    %19 = vector.broadcast %cst : f32 to vector<1x16x128xf32>
    %20 = arith.mulf %18, %19 : vector<1x16x128xf32>
    %21 = arith.subf %0, %20 : vector<1x16x128xf32>
    %c0_26 = arith.constant 0 : index
    %c0_27 = arith.constant 0 : index
    %c0_28 = arith.constant 0 : index
    %22 = vector.load %arg2[%c0_26, %c0_27, %c0_28] : memref<1x16x128xf32, #tpu.memory_space<vmem>>, vector<1x16x128xf32>
    tpu.vector_store %arg2[%c0_26, %c0_27, %c0_28], %21 {strides = array<i32>} : memref<1x16x128xf32, #tpu.memory_space<vmem>>, vector<1x16x128xf32>,
    %c0_29 = arith.constant 0 : index
    %c0_30 = arith.constant 0 : index
    %c0_31 = arith.constant 0 : index
    %23 = vector.load %arg3[%c0_29, %c0_30, %c0_31] : memref<1x16x128xf32, #tpu.memory_space<vmem>>, vector<1x16x128xf32>
    tpu.vector_store %arg3[%c0_29, %c0_30, %c0_31], %20 {strides = array<i32>} : memref<1x16x128xf32, #tpu.memory_space<vmem>>, vector<1x16x128xf32>,
    return
  }
  func.func @transform_0(%arg0: i32) -> (i32, i32, i32) {
    %c0_i32 = arith.constant 0 : i32
    %c0_i32_0 = arith.constant 0 : i32
    %c0_i32_1 = arith.constant 0 : i32
    return %arg0, %c0_i32, %c0_i32_0 : i32, i32, i32
  }
  func.func @transform_1(%arg0: i32) -> (i32, i32, i32) {
    %c0_i32 = arith.constant 0 : i32
    %c0_i32_0 = arith.constant 0 : i32
    %c0_i32_1 = arith.constant 0 : i32
    return %arg0, %c0_i32, %c0_i32_0 : i32, i32, i32
  }
  func.func @transform_2(%arg0: i32) -> (i32, i32, i32) {
    %c0_i32 = arith.constant 0 : i32
    %c0_i32_0 = arith.constant 0 : i32
    %c0_i32_1 = arith.constant 0 : i32
    return %arg0, %c0_i32, %c0_i32_0 : i32, i32, i32
  }
}

module attributes {stable_mosaic.version = 11 : i64} {
  func.func @_linear_kernel(%arg0: i32, %arg1: memref<1x24x128xf32, #tpu.memory_space<vmem>>, %arg2: memref<128x128xbf16, #tpu.memory_space<vmem>>, %arg3: memref<1x128xf32, #tpu.memory_space<vmem>>, %arg4: memref<1x24x128xf32, #tpu.memory_space<vmem>>) attributes {dimension_semantics = [#tpu.dimension_semantics<parallel>], iteration_bounds = array<i64: 2>, scalar_prefetch = 0 : i64, scratch_operands = 0 : i64, tpu.core_type = #tpu.core_type<tc>, window_params = [{transform_indices = @transform_0, window_bounds = array<i64: 1, 24, 128>}, {pipeline_mode = #tpu.pipeline_mode<synchronous>, transform_indices = @transform_1, window_bounds = array<i64: 128, 128>}, {pipeline_mode = #tpu.pipeline_mode<synchronous>, transform_indices = @transform_2, window_bounds = array<i64: 1, 128>}, {transform_indices = @transform_3, window_bounds = array<i64: 1, 24, 128>}]} {
    %c0 = arith.constant 0 : index
    %c0_0 = arith.constant 0 : index
    %c0_1 = arith.constant 0 : index
    %0 = vector.load %arg1[%c0, %c0_0, %c0_1] : memref<1x24x128xf32, #tpu.memory_space<vmem>>, vector<1x24x128xf32>
    %1 = vector.shape_cast %0 : vector<1x24x128xf32> to vector<24x128xf32>
    %2 = arith.truncf %1 : vector<24x128xf32> to vector<24x128xbf16>
    %c0_2 = arith.constant 0 : index
    %c0_3 = arith.constant 0 : index
    %3 = vector.load %arg2[%c0_2, %c0_3] : memref<128x128xbf16, #tpu.memory_space<vmem>>, vector<128x128xbf16>
    %cst = arith.constant dense<0.000000e+00> : vector<24x128xf32>
    %4 = tpu.matmul %2, %3, %cst {dimension_numbers = #tpu.dot_dimension_numbers<[1], [0], [0], [1], [0, 0, 1, 1], [], []>} : vector<24x128xbf16>, vector<128x128xbf16>, vector<24x128xf32> -> vector<24x128xf32>
    %c0_4 = arith.constant 0 : index
    %c0_5 = arith.constant 0 : index
    %5 = vector.load %arg3[%c0_4, %c0_5] : memref<1x128xf32, #tpu.memory_space<vmem>>, vector<1x128xf32>
    %6 = vector.broadcast %5 : vector<1x128xf32> to vector<24x128xf32>
    %7 = arith.addf %4, %6 : vector<24x128xf32>
    %8 = vector.shape_cast %7 : vector<24x128xf32> to vector<1x24x128xf32>
    %c0_6 = arith.constant 0 : index
    %c0_7 = arith.constant 0 : index
    %c0_8 = arith.constant 0 : index
    %9 = vector.load %arg4[%c0_6, %c0_7, %c0_8] : memref<1x24x128xf32, #tpu.memory_space<vmem>>, vector<1x24x128xf32>
    tpu.vector_store %arg4[%c0_6, %c0_7, %c0_8], %8 {strides = array<i32>} : memref<1x24x128xf32, #tpu.memory_space<vmem>>, vector<1x24x128xf32>,
    return
  }
  func.func @transform_0(%arg0: i32) -> (i32, i32, i32) {
    %c0_i32 = arith.constant 0 : i32
    %c0_i32_0 = arith.constant 0 : i32
    %c0_i32_1 = arith.constant 0 : i32
    return %arg0, %c0_i32, %c0_i32_0 : i32, i32, i32
  }
  func.func @transform_1(%arg0: i32) -> (i32, i32) {
    %c0_i32 = arith.constant 0 : i32
    %c0_i32_0 = arith.constant 0 : i32
    %c0_i32_1 = arith.constant 0 : i32
    return %c0_i32, %c0_i32_0 : i32, i32
  }
  func.func @transform_2(%arg0: i32) -> (i32, i32) {
    %c0_i32 = arith.constant 0 : i32
    %c0_i32_0 = arith.constant 0 : i32
    %c0_i32_1 = arith.constant 0 : i32
    return %c0_i32, %c0_i32_0 : i32, i32
  }
  func.func @transform_3(%arg0: i32) -> (i32, i32, i32) {
    %c0_i32 = arith.constant 0 : i32
    %c0_i32_0 = arith.constant 0 : i32
    %c0_i32_1 = arith.constant 0 : i32
    return %arg0, %c0_i32, %c0_i32_0 : i32, i32, i32
  }
}

module attributes {stable_mosaic.version = 11 : i64} {
  func.func @_embed_kernel(%arg0: i32, %arg1: memref<1x24x128xf32, #tpu.memory_space<vmem>>, %arg2: memref<1x24x128xf32, #tpu.memory_space<vmem>>, %arg3: memref<384x128xbf16, #tpu.memory_space<vmem>>, %arg4: memref<1x24x128xf32, #tpu.memory_space<vmem>>, %arg5: memref<26x128xf32, #tpu.memory_space<vmem>>) attributes {dimension_semantics = [#tpu.dimension_semantics<parallel>], iteration_bounds = array<i64: 2>, scalar_prefetch = 0 : i64, scratch_operands = 1 : i64, tpu.core_type = #tpu.core_type<tc>, window_params = [{transform_indices = @transform_0, window_bounds = array<i64: 1, 24, 128>}, {transform_indices = @transform_1, window_bounds = array<i64: 1, 24, 128>}, {pipeline_mode = #tpu.pipeline_mode<synchronous>, transform_indices = @transform_2, window_bounds = array<i64: 384, 128>}, {transform_indices = @transform_3, window_bounds = array<i64: 1, 24, 128>}]} {
    %c0 = arith.constant 0 : index
    %c0_0 = arith.constant 0 : index
    %c0_1 = arith.constant 0 : index
    %0 = vector.load %arg1[%c0, %c0_0, %c0_1] : memref<1x24x128xf32, #tpu.memory_space<vmem>>, vector<1x24x128xf32>
    %1 = vector.shape_cast %0 : vector<1x24x128xf32> to vector<24x128xf32>
    %c0_2 = arith.constant 0 : index
    %c0_3 = arith.constant 0 : index
    %2 = vector.load %arg3[%c0_2, %c0_3] : memref<384x128xbf16, #tpu.memory_space<vmem>>, vector<384x128xbf16>
    %c1 = arith.constant 1 : index
    %c0_4 = arith.constant 0 : index
    %3 = vector.load %arg5[%c1, %c0_4] : memref<26x128xf32, #tpu.memory_space<vmem>>, vector<24x128xf32>
    tpu.vector_store %arg5[%c1, %c0_4], %1 {strides = array<i32>} : memref<26x128xf32, #tpu.memory_space<vmem>>, vector<24x128xf32>,
    %4 = vector.extract_strided_slice %1 {offsets = [23, 0], sizes = [1, 128], strides = [1, 1]} : vector<24x128xf32> to vector<1x128xf32>
    %c0_5 = arith.constant 0 : index
    %c0_6 = arith.constant 0 : index
    %5 = vector.load %arg5[%c0_5, %c0_6] : memref<26x128xf32, #tpu.memory_space<vmem>>, vector<1x128xf32>
    tpu.vector_store %arg5[%c0_5, %c0_6], %4 {strides = array<i32>} : memref<26x128xf32, #tpu.memory_space<vmem>>, vector<1x128xf32>,
    %6 = vector.extract_strided_slice %1 {offsets = [0, 0], sizes = [1, 128], strides = [1, 1]} : vector<24x128xf32> to vector<1x128xf32>
    %c25 = arith.constant 25 : index
    %c0_7 = arith.constant 0 : index
    %7 = vector.load %arg5[%c25, %c0_7] : memref<26x128xf32, #tpu.memory_space<vmem>>, vector<1x128xf32>
    tpu.vector_store %arg5[%c25, %c0_7], %6 {strides = array<i32>} : memref<26x128xf32, #tpu.memory_space<vmem>>, vector<1x128xf32>,
    %c0_8 = arith.constant 0 : index
    %c0_9 = arith.constant 0 : index
    %8 = vector.load %arg5[%c0_8, %c0_9] : memref<26x128xf32, #tpu.memory_space<vmem>>, vector<24x128xf32>
    %9 = arith.truncf %8 : vector<24x128xf32> to vector<24x128xbf16>
    %10 = vector.extract_strided_slice %2 {offsets = [0, 0], sizes = [128, 128], strides = [1, 1]} : vector<384x128xbf16> to vector<128x128xbf16>
    %cst = arith.constant dense<0.000000e+00> : vector<24x128xf32>
    %11 = tpu.matmul %9, %10, %cst {dimension_numbers = #tpu.dot_dimension_numbers<[1], [0], [0], [1], [0, 0, 1, 1], [], []>} : vector<24x128xbf16>, vector<128x128xbf16>, vector<24x128xf32> -> vector<24x128xf32>
    %c1_10 = arith.constant 1 : index
    %c0_11 = arith.constant 0 : index
    %12 = vector.load %arg5[%c1_10, %c0_11] : memref<26x128xf32, #tpu.memory_space<vmem>>, vector<24x128xf32>
    %13 = arith.truncf %12 : vector<24x128xf32> to vector<24x128xbf16>
    %14 = vector.extract_strided_slice %2 {offsets = [128, 0], sizes = [128, 128], strides = [1, 1]} : vector<384x128xbf16> to vector<128x128xbf16>
    %cst_12 = arith.constant dense<0.000000e+00> : vector<24x128xf32>
    %15 = tpu.matmul %13, %14, %cst_12 {dimension_numbers = #tpu.dot_dimension_numbers<[1], [0], [0], [1], [0, 0, 1, 1], [], []>} : vector<24x128xbf16>, vector<128x128xbf16>, vector<24x128xf32> -> vector<24x128xf32>
    %16 = arith.addf %11, %15 : vector<24x128xf32>
    %c2 = arith.constant 2 : index
    %c0_13 = arith.constant 0 : index
    %17 = vector.load %arg5[%c2, %c0_13] : memref<26x128xf32, #tpu.memory_space<vmem>>, vector<24x128xf32>
    %18 = arith.truncf %17 : vector<24x128xf32> to vector<24x128xbf16>
    %19 = vector.extract_strided_slice %2 {offsets = [256, 0], sizes = [128, 128], strides = [1, 1]} : vector<384x128xbf16> to vector<128x128xbf16>
    %cst_14 = arith.constant dense<0.000000e+00> : vector<24x128xf32>
    %20 = tpu.matmul %18, %19, %cst_14 {dimension_numbers = #tpu.dot_dimension_numbers<[1], [0], [0], [1], [0, 0, 1, 1], [], []>} : vector<24x128xbf16>, vector<128x128xbf16>, vector<24x128xf32> -> vector<24x128xf32>
    %21 = arith.addf %16, %20 : vector<24x128xf32>
    %c0_15 = arith.constant 0 : index
    %c0_16 = arith.constant 0 : index
    %c0_17 = arith.constant 0 : index
    %22 = vector.load %arg2[%c0_15, %c0_16, %c0_17] : memref<1x24x128xf32, #tpu.memory_space<vmem>>, vector<1x24x128xf32>
    %23 = vector.shape_cast %21 : vector<24x128xf32> to vector<1x24x128xf32>
    %24 = arith.addf %22, %23 : vector<1x24x128xf32>
    %c0_18 = arith.constant 0 : index
    %c0_19 = arith.constant 0 : index
    %c0_20 = arith.constant 0 : index
    %25 = vector.load %arg4[%c0_18, %c0_19, %c0_20] : memref<1x24x128xf32, #tpu.memory_space<vmem>>, vector<1x24x128xf32>
    tpu.vector_store %arg4[%c0_18, %c0_19, %c0_20], %24 {strides = array<i32>} : memref<1x24x128xf32, #tpu.memory_space<vmem>>, vector<1x24x128xf32>,
    return
  }
  func.func @transform_0(%arg0: i32) -> (i32, i32, i32) {
    %c0_i32 = arith.constant 0 : i32
    %c0_i32_0 = arith.constant 0 : i32
    %c0_i32_1 = arith.constant 0 : i32
    return %arg0, %c0_i32, %c0_i32_0 : i32, i32, i32
  }
  func.func @transform_1(%arg0: i32) -> (i32, i32, i32) {
    %c0_i32 = arith.constant 0 : i32
    %c0_i32_0 = arith.constant 0 : i32
    %c0_i32_1 = arith.constant 0 : i32
    return %arg0, %c0_i32, %c0_i32_0 : i32, i32, i32
  }
  func.func @transform_2(%arg0: i32) -> (i32, i32) {
    %c0_i32 = arith.constant 0 : i32
    %c0_i32_0 = arith.constant 0 : i32
    %c0_i32_1 = arith.constant 0 : i32
    return %c0_i32, %c0_i32_0 : i32, i32
  }
  func.func @transform_3(%arg0: i32) -> (i32, i32, i32) {
    %c0_i32 = arith.constant 0 : i32
    %c0_i32_0 = arith.constant 0 : i32
    %c0_i32_1 = arith.constant 0 : i32
    return %arg0, %c0_i32, %c0_i32_0 : i32, i32, i32
  }
}

module attributes {stable_mosaic.version = 11 : i64} {
  func.func @_attn_proj_decomp_kernel(%arg0: i32, %arg1: memref<1x24x32xf32, #tpu.memory_space<vmem>>, %arg2: memref<1x24x128xf32, #tpu.memory_space<vmem>>, %arg3: memref<32x128xbf16, #tpu.memory_space<vmem>>, %arg4: memref<1x128xf32, #tpu.memory_space<vmem>>, %arg5: memref<1x24x128xf32, #tpu.memory_space<vmem>>, %arg6: memref<1x24x128xf32, #tpu.memory_space<vmem>>, %arg7: memref<1x28x128xf32, #tpu.memory_space<vmem>>) attributes {dimension_semantics = [#tpu.dimension_semantics<parallel>], iteration_bounds = array<i64: 2>, scalar_prefetch = 0 : i64, scratch_operands = 1 : i64, tpu.core_type = #tpu.core_type<tc>, window_params = [{transform_indices = @transform_0, window_bounds = array<i64: 1, 24, 32>}, {transform_indices = @transform_1, window_bounds = array<i64: 1, 24, 128>}, {pipeline_mode = #tpu.pipeline_mode<synchronous>, transform_indices = @transform_2, window_bounds = array<i64: 32, 128>}, {pipeline_mode = #tpu.pipeline_mode<synchronous>, transform_indices = @transform_3, window_bounds = array<i64: 1, 128>}, {transform_indices = @transform_4, window_bounds = array<i64: 1, 24, 128>}, {transform_indices = @transform_5, window_bounds = array<i64: 1, 24, 128>}]} {
    %c0 = arith.constant 0 : index
    %c0_0 = arith.constant 0 : index
    %c0_1 = arith.constant 0 : index
    %0 = vector.load %arg1[%c0, %c0_0, %c0_1] : memref<1x24x32xf32, #tpu.memory_space<vmem>>, vector<1x24x32xf32>
    %1 = vector.shape_cast %0 : vector<1x24x32xf32> to vector<24x32xf32>
    %2 = arith.truncf %1 : vector<24x32xf32> to vector<24x32xbf16>
    %c0_2 = arith.constant 0 : index
    %c0_3 = arith.constant 0 : index
    %3 = vector.load %arg3[%c0_2, %c0_3] : memref<32x128xbf16, #tpu.memory_space<vmem>>, vector<32x128xbf16>
    %cst = arith.constant dense<0.000000e+00> : vector<24x128xf32>
    %4 = tpu.matmul %2, %3, %cst {dimension_numbers = #tpu.dot_dimension_numbers<[1], [0], [0], [1], [0, 0, 1, 1], [], []>} : vector<24x32xbf16>, vector<32x128xbf16>, vector<24x128xf32> -> vector<24x128xf32>
    %c0_4 = arith.constant 0 : index
    %c0_5 = arith.constant 0 : index
    %5 = vector.load %arg4[%c0_4, %c0_5] : memref<1x128xf32, #tpu.memory_space<vmem>>, vector<1x128xf32>
    %6 = vector.broadcast %5 : vector<1x128xf32> to vector<24x128xf32>
    %7 = arith.addf %4, %6 : vector<24x128xf32>
    %c0_6 = arith.constant 0 : index
    %c0_7 = arith.constant 0 : index
    %c0_8 = arith.constant 0 : index
    %8 = vector.load %arg2[%c0_6, %c0_7, %c0_8] : memref<1x24x128xf32, #tpu.memory_space<vmem>>, vector<1x24x128xf32>
    %9 = vector.shape_cast %7 : vector<24x128xf32> to vector<1x24x128xf32>
    %10 = arith.addf %8, %9 : vector<1x24x128xf32>
    %c0_9 = arith.constant 0 : index
    %c2 = arith.constant 2 : index
    %c0_10 = arith.constant 0 : index
    %11 = vector.load %arg7[%c0_9, %c2, %c0_10] : memref<1x28x128xf32, #tpu.memory_space<vmem>>, vector<1x24x128xf32>
    tpu.vector_store %arg7[%c0_9, %c2, %c0_10], %10 {strides = array<i32>} : memref<1x28x128xf32, #tpu.memory_space<vmem>>, vector<1x24x128xf32>,
    %12 = vector.extract_strided_slice %10 {offsets = [0, 0, 0], sizes = [1, 1, 128], strides = [1, 1, 1]} : vector<1x24x128xf32> to vector<1x1x128xf32>
    %c0_11 = arith.constant 0 : index
    %c0_12 = arith.constant 0 : index
    %c0_13 = arith.constant 0 : index
    %13 = vector.load %arg7[%c0_11, %c0_12, %c0_13] : memref<1x28x128xf32, #tpu.memory_space<vmem>>, vector<1x1x128xf32>
    tpu.vector_store %arg7[%c0_11, %c0_12, %c0_13], %12 {strides = array<i32>} : memref<1x28x128xf32, #tpu.memory_space<vmem>>, vector<1x1x128xf32>,
    %14 = vector.extract_strided_slice %10 {offsets = [0, 0, 0], sizes = [1, 1, 128], strides = [1, 1, 1]} : vector<1x24x128xf32> to vector<1x1x128xf32>
    %c0_14 = arith.constant 0 : index
    %c1 = arith.constant 1 : index
    %c0_15 = arith.constant 0 : index
    %15 = vector.load %arg7[%c0_14, %c1, %c0_15] : memref<1x28x128xf32, #tpu.memory_space<vmem>>, vector<1x1x128xf32>
    tpu.vector_store %arg7[%c0_14, %c1, %c0_15], %14 {strides = array<i32>} : memref<1x28x128xf32, #tpu.memory_space<vmem>>, vector<1x1x128xf32>,
    %16 = vector.extract_strided_slice %10 {offsets = [0, 23, 0], sizes = [1, 1, 128], strides = [1, 1, 1]} : vector<1x24x128xf32> to vector<1x1x128xf32>
    %c0_16 = arith.constant 0 : index
    %c26 = arith.constant 26 : index
    %c0_17 = arith.constant 0 : index
    %17 = vector.load %arg7[%c0_16, %c26, %c0_17] : memref<1x28x128xf32, #tpu.memory_space<vmem>>, vector<1x1x128xf32>
    tpu.vector_store %arg7[%c0_16, %c26, %c0_17], %16 {strides = array<i32>} : memref<1x28x128xf32, #tpu.memory_space<vmem>>, vector<1x1x128xf32>,
    %18 = vector.extract_strided_slice %10 {offsets = [0, 23, 0], sizes = [1, 1, 128], strides = [1, 1, 1]} : vector<1x24x128xf32> to vector<1x1x128xf32>
    %c0_18 = arith.constant 0 : index
    %c27 = arith.constant 27 : index
    %c0_19 = arith.constant 0 : index
    %19 = vector.load %arg7[%c0_18, %c27, %c0_19] : memref<1x28x128xf32, #tpu.memory_space<vmem>>, vector<1x1x128xf32>
    tpu.vector_store %arg7[%c0_18, %c27, %c0_19], %18 {strides = array<i32>} : memref<1x28x128xf32, #tpu.memory_space<vmem>>, vector<1x1x128xf32>,
    %c0_20 = arith.constant 0 : index
    %c0_21 = arith.constant 0 : index
    %c0_22 = arith.constant 0 : index
    %20 = vector.load %arg7[%c0_20, %c0_21, %c0_22] : memref<1x28x128xf32, #tpu.memory_space<vmem>>, vector<1x24x128xf32>
    %c0_23 = arith.constant 0 : index
    %c1_24 = arith.constant 1 : index
    %c0_25 = arith.constant 0 : index
    %21 = vector.load %arg7[%c0_23, %c1_24, %c0_25] : memref<1x28x128xf32, #tpu.memory_space<vmem>>, vector<1x24x128xf32>
    %22 = arith.addf %20, %21 : vector<1x24x128xf32>
    %c0_26 = arith.constant 0 : index
    %c2_27 = arith.constant 2 : index
    %c0_28 = arith.constant 0 : index
    %23 = vector.load %arg7[%c0_26, %c2_27, %c0_28] : memref<1x28x128xf32, #tpu.memory_space<vmem>>, vector<1x24x128xf32>
    %24 = arith.addf %22, %23 : vector<1x24x128xf32>
    %c0_29 = arith.constant 0 : index
    %c3 = arith.constant 3 : index
    %c0_30 = arith.constant 0 : index
    %25 = vector.load %arg7[%c0_29, %c3, %c0_30] : memref<1x28x128xf32, #tpu.memory_space<vmem>>, vector<1x24x128xf32>
    %26 = arith.addf %24, %25 : vector<1x24x128xf32>
    %c0_31 = arith.constant 0 : index
    %c4 = arith.constant 4 : index
    %c0_32 = arith.constant 0 : index
    %27 = vector.load %arg7[%c0_31, %c4, %c0_32] : memref<1x28x128xf32, #tpu.memory_space<vmem>>, vector<1x24x128xf32>
    %28 = arith.addf %26, %27 : vector<1x24x128xf32>
    %cst_33 = arith.constant 2.000000e-01 : f32
    %29 = vector.broadcast %cst_33 : f32 to vector<1x24x128xf32>
    %30 = arith.mulf %28, %29 : vector<1x24x128xf32>
    %31 = arith.subf %10, %30 : vector<1x24x128xf32>
    %c0_34 = arith.constant 0 : index
    %c0_35 = arith.constant 0 : index
    %c0_36 = arith.constant 0 : index
    %32 = vector.load %arg5[%c0_34, %c0_35, %c0_36] : memref<1x24x128xf32, #tpu.memory_space<vmem>>, vector<1x24x128xf32>
    tpu.vector_store %arg5[%c0_34, %c0_35, %c0_36], %31 {strides = array<i32>} : memref<1x24x128xf32, #tpu.memory_space<vmem>>, vector<1x24x128xf32>,
    %c0_37 = arith.constant 0 : index
    %c0_38 = arith.constant 0 : index
    %c0_39 = arith.constant 0 : index
    %33 = vector.load %arg6[%c0_37, %c0_38, %c0_39] : memref<1x24x128xf32, #tpu.memory_space<vmem>>, vector<1x24x128xf32>
    tpu.vector_store %arg6[%c0_37, %c0_38, %c0_39], %30 {strides = array<i32>} : memref<1x24x128xf32, #tpu.memory_space<vmem>>, vector<1x24x128xf32>,
    return
  }
  func.func @transform_0(%arg0: i32) -> (i32, i32, i32) {
    %c0_i32 = arith.constant 0 : i32
    %c0_i32_0 = arith.constant 0 : i32
    %c0_i32_1 = arith.constant 0 : i32
    return %arg0, %c0_i32, %c0_i32_0 : i32, i32, i32
  }
  func.func @transform_1(%arg0: i32) -> (i32, i32, i32) {
    %c0_i32 = arith.constant 0 : i32
    %c0_i32_0 = arith.constant 0 : i32
    %c0_i32_1 = arith.constant 0 : i32
    return %arg0, %c0_i32, %c0_i32_0 : i32, i32, i32
  }
  func.func @transform_2(%arg0: i32) -> (i32, i32) {
    %c0_i32 = arith.constant 0 : i32
    %c0_i32_0 = arith.constant 0 : i32
    %c0_i32_1 = arith.constant 0 : i32
    return %c0_i32, %c0_i32_0 : i32, i32
  }
  func.func @transform_3(%arg0: i32) -> (i32, i32) {
    %c0_i32 = arith.constant 0 : i32
    %c0_i32_0 = arith.constant 0 : i32
    %c0_i32_1 = arith.constant 0 : i32
    return %c0_i32, %c0_i32_0 : i32, i32
  }
  func.func @transform_4(%arg0: i32) -> (i32, i32, i32) {
    %c0_i32 = arith.constant 0 : i32
    %c0_i32_0 = arith.constant 0 : i32
    %c0_i32_1 = arith.constant 0 : i32
    return %arg0, %c0_i32, %c0_i32_0 : i32, i32, i32
  }
  func.func @transform_5(%arg0: i32) -> (i32, i32, i32) {
    %c0_i32 = arith.constant 0 : i32
    %c0_i32_0 = arith.constant 0 : i32
    %c0_i32_1 = arith.constant 0 : i32
    return %arg0, %c0_i32, %c0_i32_0 : i32, i32, i32
  }
}

module attributes {stable_mosaic.version = 11 : i64} {
  func.func @_ffn_decomp_kernel(%arg0: i32, %arg1: memref<1x24x128xf32, #tpu.memory_space<vmem>>, %arg2: memref<128x128xbf16, #tpu.memory_space<vmem>>, %arg3: memref<128x128xbf16, #tpu.memory_space<vmem>>, %arg4: memref<1x24x128xf32, #tpu.memory_space<vmem>>, %arg5: memref<1x24x128xf32, #tpu.memory_space<vmem>>, %arg6: memref<1x28x128xf32, #tpu.memory_space<vmem>>) attributes {dimension_semantics = [#tpu.dimension_semantics<parallel>], iteration_bounds = array<i64: 2>, scalar_prefetch = 0 : i64, scratch_operands = 1 : i64, tpu.core_type = #tpu.core_type<tc>, window_params = [{transform_indices = @transform_0, window_bounds = array<i64: 1, 24, 128>}, {pipeline_mode = #tpu.pipeline_mode<synchronous>, transform_indices = @transform_1, window_bounds = array<i64: 128, 128>}, {pipeline_mode = #tpu.pipeline_mode<synchronous>, transform_indices = @transform_2, window_bounds = array<i64: 128, 128>}, {transform_indices = @transform_3, window_bounds = array<i64: 1, 24, 128>}, {transform_indices = @transform_4, window_bounds = array<i64: 1, 24, 128>}]} {
    %c0 = arith.constant 0 : index
    %c0_0 = arith.constant 0 : index
    %c0_1 = arith.constant 0 : index
    %0 = vector.load %arg1[%c0, %c0_0, %c0_1] : memref<1x24x128xf32, #tpu.memory_space<vmem>>, vector<1x24x128xf32>
    %1 = vector.shape_cast %0 : vector<1x24x128xf32> to vector<24x128xf32>
    %2 = arith.truncf %1 : vector<24x128xf32> to vector<24x128xbf16>
    %c0_2 = arith.constant 0 : index
    %c0_3 = arith.constant 0 : index
    %3 = vector.load %arg2[%c0_2, %c0_3] : memref<128x128xbf16, #tpu.memory_space<vmem>>, vector<128x128xbf16>
    %cst = arith.constant dense<0.000000e+00> : vector<24x128xf32>
    %4 = tpu.matmul %2, %3, %cst {dimension_numbers = #tpu.dot_dimension_numbers<[1], [0], [0], [1], [0, 0, 1, 1], [], []>} : vector<24x128xbf16>, vector<128x128xbf16>, vector<24x128xf32> -> vector<24x128xf32>
    %5 = arith.mulf %4, %4 : vector<24x128xf32>
    %6 = arith.mulf %4, %5 : vector<24x128xf32>
    %cst_4 = arith.constant 4.471500e-02 : f32
    %7 = vector.broadcast %cst_4 : f32 to vector<24x128xf32>
    %8 = arith.mulf %7, %6 : vector<24x128xf32>
    %9 = arith.addf %4, %8 : vector<24x128xf32>
    %cst_5 = arith.constant 0.797884583 : f32
    %10 = vector.broadcast %cst_5 : f32 to vector<24x128xf32>
    %11 = arith.mulf %10, %9 : vector<24x128xf32>
    %12 = math.tanh %11 : vector<24x128xf32>
    %cst_6 = arith.constant 1.000000e+00 : f32
    %13 = vector.broadcast %cst_6 : f32 to vector<24x128xf32>
    %14 = arith.addf %13, %12 : vector<24x128xf32>
    %cst_7 = arith.constant 5.000000e-01 : f32
    %15 = vector.broadcast %cst_7 : f32 to vector<24x128xf32>
    %16 = arith.mulf %15, %14 : vector<24x128xf32>
    %17 = arith.mulf %4, %16 : vector<24x128xf32>
    %18 = arith.truncf %17 : vector<24x128xf32> to vector<24x128xbf16>
    %c0_8 = arith.constant 0 : index
    %c0_9 = arith.constant 0 : index
    %19 = vector.load %arg3[%c0_8, %c0_9] : memref<128x128xbf16, #tpu.memory_space<vmem>>, vector<128x128xbf16>
    %cst_10 = arith.constant dense<0.000000e+00> : vector<24x128xf32>
    %20 = tpu.matmul %18, %19, %cst_10 {dimension_numbers = #tpu.dot_dimension_numbers<[1], [0], [0], [1], [0, 0, 1, 1], [], []>} : vector<24x128xbf16>, vector<128x128xbf16>, vector<24x128xf32> -> vector<24x128xf32>
    %21 = vector.shape_cast %20 : vector<24x128xf32> to vector<1x24x128xf32>
    %22 = arith.addf %0, %21 : vector<1x24x128xf32>
    %c0_11 = arith.constant 0 : index
    %c2 = arith.constant 2 : index
    %c0_12 = arith.constant 0 : index
    %23 = vector.load %arg6[%c0_11, %c2, %c0_12] : memref<1x28x128xf32, #tpu.memory_space<vmem>>, vector<1x24x128xf32>
    tpu.vector_store %arg6[%c0_11, %c2, %c0_12], %22 {strides = array<i32>} : memref<1x28x128xf32, #tpu.memory_space<vmem>>, vector<1x24x128xf32>,
    %24 = vector.extract_strided_slice %22 {offsets = [0, 0, 0], sizes = [1, 1, 128], strides = [1, 1, 1]} : vector<1x24x128xf32> to vector<1x1x128xf32>
    %c0_13 = arith.constant 0 : index
    %c0_14 = arith.constant 0 : index
    %c0_15 = arith.constant 0 : index
    %25 = vector.load %arg6[%c0_13, %c0_14, %c0_15] : memref<1x28x128xf32, #tpu.memory_space<vmem>>, vector<1x1x128xf32>
    tpu.vector_store %arg6[%c0_13, %c0_14, %c0_15], %24 {strides = array<i32>} : memref<1x28x128xf32, #tpu.memory_space<vmem>>, vector<1x1x128xf32>,
    %26 = vector.extract_strided_slice %22 {offsets = [0, 0, 0], sizes = [1, 1, 128], strides = [1, 1, 1]} : vector<1x24x128xf32> to vector<1x1x128xf32>
    %c0_16 = arith.constant 0 : index
    %c1 = arith.constant 1 : index
    %c0_17 = arith.constant 0 : index
    %27 = vector.load %arg6[%c0_16, %c1, %c0_17] : memref<1x28x128xf32, #tpu.memory_space<vmem>>, vector<1x1x128xf32>
    tpu.vector_store %arg6[%c0_16, %c1, %c0_17], %26 {strides = array<i32>} : memref<1x28x128xf32, #tpu.memory_space<vmem>>, vector<1x1x128xf32>,
    %28 = vector.extract_strided_slice %22 {offsets = [0, 23, 0], sizes = [1, 1, 128], strides = [1, 1, 1]} : vector<1x24x128xf32> to vector<1x1x128xf32>
    %c0_18 = arith.constant 0 : index
    %c26 = arith.constant 26 : index
    %c0_19 = arith.constant 0 : index
    %29 = vector.load %arg6[%c0_18, %c26, %c0_19] : memref<1x28x128xf32, #tpu.memory_space<vmem>>, vector<1x1x128xf32>
    tpu.vector_store %arg6[%c0_18, %c26, %c0_19], %28 {strides = array<i32>} : memref<1x28x128xf32, #tpu.memory_space<vmem>>, vector<1x1x128xf32>,
    %30 = vector.extract_strided_slice %22 {offsets = [0, 23, 0], sizes = [1, 1, 128], strides = [1, 1, 1]} : vector<1x24x128xf32> to vector<1x1x128xf32>
    %c0_20 = arith.constant 0 : index
    %c27 = arith.constant 27 : index
    %c0_21 = arith.constant 0 : index
    %31 = vector.load %arg6[%c0_20, %c27, %c0_21] : memref<1x28x128xf32, #tpu.memory_space<vmem>>, vector<1x1x128xf32>
    tpu.vector_store %arg6[%c0_20, %c27, %c0_21], %30 {strides = array<i32>} : memref<1x28x128xf32, #tpu.memory_space<vmem>>, vector<1x1x128xf32>,
    %c0_22 = arith.constant 0 : index
    %c0_23 = arith.constant 0 : index
    %c0_24 = arith.constant 0 : index
    %32 = vector.load %arg6[%c0_22, %c0_23, %c0_24] : memref<1x28x128xf32, #tpu.memory_space<vmem>>, vector<1x24x128xf32>
    %c0_25 = arith.constant 0 : index
    %c1_26 = arith.constant 1 : index
    %c0_27 = arith.constant 0 : index
    %33 = vector.load %arg6[%c0_25, %c1_26, %c0_27] : memref<1x28x128xf32, #tpu.memory_space<vmem>>, vector<1x24x128xf32>
    %34 = arith.addf %32, %33 : vector<1x24x128xf32>
    %c0_28 = arith.constant 0 : index
    %c2_29 = arith.constant 2 : index
    %c0_30 = arith.constant 0 : index
    %35 = vector.load %arg6[%c0_28, %c2_29, %c0_30] : memref<1x28x128xf32, #tpu.memory_space<vmem>>, vector<1x24x128xf32>
    %36 = arith.addf %34, %35 : vector<1x24x128xf32>
    %c0_31 = arith.constant 0 : index
    %c3 = arith.constant 3 : index
    %c0_32 = arith.constant 0 : index
    %37 = vector.load %arg6[%c0_31, %c3, %c0_32] : memref<1x28x128xf32, #tpu.memory_space<vmem>>, vector<1x24x128xf32>
    %38 = arith.addf %36, %37 : vector<1x24x128xf32>
    %c0_33 = arith.constant 0 : index
    %c4 = arith.constant 4 : index
    %c0_34 = arith.constant 0 : index
    %39 = vector.load %arg6[%c0_33, %c4, %c0_34] : memref<1x28x128xf32, #tpu.memory_space<vmem>>, vector<1x24x128xf32>
    %40 = arith.addf %38, %39 : vector<1x24x128xf32>
    %cst_35 = arith.constant 2.000000e-01 : f32
    %41 = vector.broadcast %cst_35 : f32 to vector<1x24x128xf32>
    %42 = arith.mulf %40, %41 : vector<1x24x128xf32>
    %43 = arith.subf %22, %42 : vector<1x24x128xf32>
    %c0_36 = arith.constant 0 : index
    %c0_37 = arith.constant 0 : index
    %c0_38 = arith.constant 0 : index
    %44 = vector.load %arg4[%c0_36, %c0_37, %c0_38] : memref<1x24x128xf32, #tpu.memory_space<vmem>>, vector<1x24x128xf32>
    tpu.vector_store %arg4[%c0_36, %c0_37, %c0_38], %43 {strides = array<i32>} : memref<1x24x128xf32, #tpu.memory_space<vmem>>, vector<1x24x128xf32>,
    %c0_39 = arith.constant 0 : index
    %c0_40 = arith.constant 0 : index
    %c0_41 = arith.constant 0 : index
    %45 = vector.load %arg5[%c0_39, %c0_40, %c0_41] : memref<1x24x128xf32, #tpu.memory_space<vmem>>, vector<1x24x128xf32>
    tpu.vector_store %arg5[%c0_39, %c0_40, %c0_41], %42 {strides = array<i32>} : memref<1x24x128xf32, #tpu.memory_space<vmem>>, vector<1x24x128xf32>,
    return
  }
  func.func @transform_0(%arg0: i32) -> (i32, i32, i32) {
    %c0_i32 = arith.constant 0 : i32
    %c0_i32_0 = arith.constant 0 : i32
    %c0_i32_1 = arith.constant 0 : i32
    return %arg0, %c0_i32, %c0_i32_0 : i32, i32, i32
  }
  func.func @transform_1(%arg0: i32) -> (i32, i32) {
    %c0_i32 = arith.constant 0 : i32
    %c0_i32_0 = arith.constant 0 : i32
    %c0_i32_1 = arith.constant 0 : i32
    return %c0_i32, %c0_i32_0 : i32, i32
  }
  func.func @transform_2(%arg0: i32) -> (i32, i32) {
    %c0_i32 = arith.constant 0 : i32
    %c0_i32_0 = arith.constant 0 : i32
    %c0_i32_1 = arith.constant 0 : i32
    return %c0_i32, %c0_i32_0 : i32, i32
  }
  func.func @transform_3(%arg0: i32) -> (i32, i32, i32) {
    %c0_i32 = arith.constant 0 : i32
    %c0_i32_0 = arith.constant 0 : i32
    %c0_i32_1 = arith.constant 0 : i32
    return %arg0, %c0_i32, %c0_i32_0 : i32, i32, i32
  }
  func.func @transform_4(%arg0: i32) -> (i32, i32, i32) {
    %c0_i32 = arith.constant 0 : i32
    %c0_i32_0 = arith.constant 0 : i32
    %c0_i32_1 = arith.constant 0 : i32
    return %arg0, %c0_i32, %c0_i32_0 : i32, i32, i32
  }
}

module attributes {stable_mosaic.version = 11 : i64} {
  func.func @_trend_kernel(%arg0: i32, %arg1: memref<1x24x128xf32, #tpu.memory_space<vmem>>, %arg2: memref<1x24x128xf32, #tpu.memory_space<vmem>>, %arg3: memref<1x24x128xf32, #tpu.memory_space<vmem>>, %arg4: memref<1x24x128xf32, #tpu.memory_space<vmem>>, %arg5: memref<384x128xbf16, #tpu.memory_space<vmem>>, %arg6: memref<1x24x128xf32, #tpu.memory_space<vmem>>, %arg7: memref<26x128xf32, #tpu.memory_space<vmem>>) attributes {dimension_semantics = [#tpu.dimension_semantics<parallel>], iteration_bounds = array<i64: 2>, scalar_prefetch = 0 : i64, scratch_operands = 1 : i64, tpu.core_type = #tpu.core_type<tc>, window_params = [{transform_indices = @transform_0, window_bounds = array<i64: 1, 24, 128>}, {transform_indices = @transform_1, window_bounds = array<i64: 1, 24, 128>}, {transform_indices = @transform_2, window_bounds = array<i64: 1, 24, 128>}, {transform_indices = @transform_3, window_bounds = array<i64: 1, 24, 128>}, {pipeline_mode = #tpu.pipeline_mode<synchronous>, transform_indices = @transform_4, window_bounds = array<i64: 384, 128>}, {transform_indices = @transform_5, window_bounds = array<i64: 1, 24, 128>}]} {
    %c0 = arith.constant 0 : index
    %c0_0 = arith.constant 0 : index
    %c0_1 = arith.constant 0 : index
    %0 = vector.load %arg1[%c0, %c0_0, %c0_1] : memref<1x24x128xf32, #tpu.memory_space<vmem>>, vector<1x24x128xf32>
    %c0_2 = arith.constant 0 : index
    %c0_3 = arith.constant 0 : index
    %c0_4 = arith.constant 0 : index
    %1 = vector.load %arg2[%c0_2, %c0_3, %c0_4] : memref<1x24x128xf32, #tpu.memory_space<vmem>>, vector<1x24x128xf32>
    %2 = arith.addf %0, %1 : vector<1x24x128xf32>
    %c0_5 = arith.constant 0 : index
    %c0_6 = arith.constant 0 : index
    %c0_7 = arith.constant 0 : index
    %3 = vector.load %arg3[%c0_5, %c0_6, %c0_7] : memref<1x24x128xf32, #tpu.memory_space<vmem>>, vector<1x24x128xf32>
    %4 = arith.addf %2, %3 : vector<1x24x128xf32>
    %5 = vector.shape_cast %4 : vector<1x24x128xf32> to vector<24x128xf32>
    %c0_8 = arith.constant 0 : index
    %c0_9 = arith.constant 0 : index
    %6 = vector.load %arg5[%c0_8, %c0_9] : memref<384x128xbf16, #tpu.memory_space<vmem>>, vector<384x128xbf16>
    %c1 = arith.constant 1 : index
    %c0_10 = arith.constant 0 : index
    %7 = vector.load %arg7[%c1, %c0_10] : memref<26x128xf32, #tpu.memory_space<vmem>>, vector<24x128xf32>
    tpu.vector_store %arg7[%c1, %c0_10], %5 {strides = array<i32>} : memref<26x128xf32, #tpu.memory_space<vmem>>, vector<24x128xf32>,
    %8 = vector.extract_strided_slice %5 {offsets = [23, 0], sizes = [1, 128], strides = [1, 1]} : vector<24x128xf32> to vector<1x128xf32>
    %c0_11 = arith.constant 0 : index
    %c0_12 = arith.constant 0 : index
    %9 = vector.load %arg7[%c0_11, %c0_12] : memref<26x128xf32, #tpu.memory_space<vmem>>, vector<1x128xf32>
    tpu.vector_store %arg7[%c0_11, %c0_12], %8 {strides = array<i32>} : memref<26x128xf32, #tpu.memory_space<vmem>>, vector<1x128xf32>,
    %10 = vector.extract_strided_slice %5 {offsets = [0, 0], sizes = [1, 128], strides = [1, 1]} : vector<24x128xf32> to vector<1x128xf32>
    %c25 = arith.constant 25 : index
    %c0_13 = arith.constant 0 : index
    %11 = vector.load %arg7[%c25, %c0_13] : memref<26x128xf32, #tpu.memory_space<vmem>>, vector<1x128xf32>
    tpu.vector_store %arg7[%c25, %c0_13], %10 {strides = array<i32>} : memref<26x128xf32, #tpu.memory_space<vmem>>, vector<1x128xf32>,
    %c0_14 = arith.constant 0 : index
    %c0_15 = arith.constant 0 : index
    %12 = vector.load %arg7[%c0_14, %c0_15] : memref<26x128xf32, #tpu.memory_space<vmem>>, vector<24x128xf32>
    %13 = arith.truncf %12 : vector<24x128xf32> to vector<24x128xbf16>
    %14 = vector.extract_strided_slice %6 {offsets = [0, 0], sizes = [128, 128], strides = [1, 1]} : vector<384x128xbf16> to vector<128x128xbf16>
    %cst = arith.constant dense<0.000000e+00> : vector<24x128xf32>
    %15 = tpu.matmul %13, %14, %cst {dimension_numbers = #tpu.dot_dimension_numbers<[1], [0], [0], [1], [0, 0, 1, 1], [], []>} : vector<24x128xbf16>, vector<128x128xbf16>, vector<24x128xf32> -> vector<24x128xf32>
    %c1_16 = arith.constant 1 : index
    %c0_17 = arith.constant 0 : index
    %16 = vector.load %arg7[%c1_16, %c0_17] : memref<26x128xf32, #tpu.memory_space<vmem>>, vector<24x128xf32>
    %17 = arith.truncf %16 : vector<24x128xf32> to vector<24x128xbf16>
    %18 = vector.extract_strided_slice %6 {offsets = [128, 0], sizes = [128, 128], strides = [1, 1]} : vector<384x128xbf16> to vector<128x128xbf16>
    %cst_18 = arith.constant dense<0.000000e+00> : vector<24x128xf32>
    %19 = tpu.matmul %17, %18, %cst_18 {dimension_numbers = #tpu.dot_dimension_numbers<[1], [0], [0], [1], [0, 0, 1, 1], [], []>} : vector<24x128xbf16>, vector<128x128xbf16>, vector<24x128xf32> -> vector<24x128xf32>
    %20 = arith.addf %15, %19 : vector<24x128xf32>
    %c2 = arith.constant 2 : index
    %c0_19 = arith.constant 0 : index
    %21 = vector.load %arg7[%c2, %c0_19] : memref<26x128xf32, #tpu.memory_space<vmem>>, vector<24x128xf32>
    %22 = arith.truncf %21 : vector<24x128xf32> to vector<24x128xbf16>
    %23 = vector.extract_strided_slice %6 {offsets = [256, 0], sizes = [128, 128], strides = [1, 1]} : vector<384x128xbf16> to vector<128x128xbf16>
    %cst_20 = arith.constant dense<0.000000e+00> : vector<24x128xf32>
    %24 = tpu.matmul %22, %23, %cst_20 {dimension_numbers = #tpu.dot_dimension_numbers<[1], [0], [0], [1], [0, 0, 1, 1], [], []>} : vector<24x128xbf16>, vector<128x128xbf16>, vector<24x128xf32> -> vector<24x128xf32>
    %25 = arith.addf %20, %24 : vector<24x128xf32>
    %c0_21 = arith.constant 0 : index
    %c0_22 = arith.constant 0 : index
    %c0_23 = arith.constant 0 : index
    %26 = vector.load %arg4[%c0_21, %c0_22, %c0_23] : memref<1x24x128xf32, #tpu.memory_space<vmem>>, vector<1x24x128xf32>
    %27 = vector.shape_cast %25 : vector<24x128xf32> to vector<1x24x128xf32>
    %28 = arith.addf %26, %27 : vector<1x24x128xf32>
    %c0_24 = arith.constant 0 : index
    %c0_25 = arith.constant 0 : index
    %c0_26 = arith.constant 0 : index
    %29 = vector.load %arg6[%c0_24, %c0_25, %c0_26] : memref<1x24x128xf32, #tpu.memory_space<vmem>>, vector<1x24x128xf32>
    tpu.vector_store %arg6[%c0_24, %c0_25, %c0_26], %28 {strides = array<i32>} : memref<1x24x128xf32, #tpu.memory_space<vmem>>, vector<1x24x128xf32>,
    return
  }
  func.func @transform_0(%arg0: i32) -> (i32, i32, i32) {
    %c0_i32 = arith.constant 0 : i32
    %c0_i32_0 = arith.constant 0 : i32
    %c0_i32_1 = arith.constant 0 : i32
    return %arg0, %c0_i32, %c0_i32_0 : i32, i32, i32
  }
  func.func @transform_1(%arg0: i32) -> (i32, i32, i32) {
    %c0_i32 = arith.constant 0 : i32
    %c0_i32_0 = arith.constant 0 : i32
    %c0_i32_1 = arith.constant 0 : i32
    return %arg0, %c0_i32, %c0_i32_0 : i32, i32, i32
  }
  func.func @transform_2(%arg0: i32) -> (i32, i32, i32) {
    %c0_i32 = arith.constant 0 : i32
    %c0_i32_0 = arith.constant 0 : i32
    %c0_i32_1 = arith.constant 0 : i32
    return %arg0, %c0_i32, %c0_i32_0 : i32, i32, i32
  }
  func.func @transform_3(%arg0: i32) -> (i32, i32, i32) {
    %c0_i32 = arith.constant 0 : i32
    %c0_i32_0 = arith.constant 0 : i32
    %c0_i32_1 = arith.constant 0 : i32
    return %arg0, %c0_i32, %c0_i32_0 : i32, i32, i32
  }
  func.func @transform_4(%arg0: i32) -> (i32, i32) {
    %c0_i32 = arith.constant 0 : i32
    %c0_i32_0 = arith.constant 0 : i32
    %c0_i32_1 = arith.constant 0 : i32
    return %c0_i32, %c0_i32_0 : i32, i32
  }
  func.func @transform_5(%arg0: i32) -> (i32, i32, i32) {
    %c0_i32 = arith.constant 0 : i32
    %c0_i32_0 = arith.constant 0 : i32
    %c0_i32_1 = arith.constant 0 : i32
    return %arg0, %c0_i32, %c0_i32_0 : i32, i32, i32
  }
}

module attributes {stable_mosaic.version = 11 : i64} {
  func.func @_final_kernel(%arg0: i32, %arg1: memref<1x24x128xf32, #tpu.memory_space<vmem>>, %arg2: memref<1x24x128xf32, #tpu.memory_space<vmem>>, %arg3: memref<1x1x128xf32, #tpu.memory_space<vmem>>, %arg4: memref<1x1x128xf32, #tpu.memory_space<vmem>>, %arg5: memref<128x128xbf16, #tpu.memory_space<vmem>>, %arg6: memref<1x128xf32, #tpu.memory_space<vmem>>, %arg7: memref<1x24x128xf32, #tpu.memory_space<vmem>>) attributes {dimension_semantics = [#tpu.dimension_semantics<parallel>], iteration_bounds = array<i64: 2>, scalar_prefetch = 0 : i64, scratch_operands = 0 : i64, tpu.core_type = #tpu.core_type<tc>, window_params = [{transform_indices = @transform_0, window_bounds = array<i64: 1, 24, 128>}, {transform_indices = @transform_1, window_bounds = array<i64: 1, 24, 128>}, {pipeline_mode = #tpu.pipeline_mode<synchronous>, transform_indices = @transform_2, window_bounds = array<i64: 1, 1, 128>}, {pipeline_mode = #tpu.pipeline_mode<synchronous>, transform_indices = @transform_3, window_bounds = array<i64: 1, 1, 128>}, {pipeline_mode = #tpu.pipeline_mode<synchronous>, transform_indices = @transform_4, window_bounds = array<i64: 128, 128>}, {pipeline_mode = #tpu.pipeline_mode<synchronous>, transform_indices = @transform_5, window_bounds = array<i64: 1, 128>}, {transform_indices = @transform_6, window_bounds = array<i64: 1, 24, 128>}]} {
    %c0 = arith.constant 0 : index
    %c0_0 = arith.constant 0 : index
    %c0_1 = arith.constant 0 : index
    %0 = vector.load %arg1[%c0, %c0_0, %c0_1] : memref<1x24x128xf32, #tpu.memory_space<vmem>>, vector<1x24x128xf32>
    %c0_2 = arith.constant 0 : index
    %c0_3 = arith.constant 0 : index
    %c0_4 = arith.constant 0 : index
    %1 = vector.load %arg3[%c0_2, %c0_3, %c0_4] : memref<1x1x128xf32, #tpu.memory_space<vmem>>, vector<1x1x128xf32>
    %c0_5 = arith.constant 0 : index
    %c0_6 = arith.constant 0 : index
    %c0_7 = arith.constant 0 : index
    %2 = vector.load %arg4[%c0_5, %c0_6, %c0_7] : memref<1x1x128xf32, #tpu.memory_space<vmem>>, vector<1x1x128xf32>
    %3 = vector.extract_strided_slice %0 {offsets = [0, 0, 0], sizes = [1, 24, 32], strides = [1, 1, 1]} : vector<1x24x128xf32> to vector<1x24x32xf32>
    %cst = arith.constant dense<0.000000e+00> : vector<1x24xf32>
    %4 = vector.multi_reduction <add>, %3, %cst [2] : vector<1x24x32xf32> to vector<1x24xf32>
    %5 = vector.shape_cast %4 : vector<1x24xf32> to vector<1x24x1xf32>
    %cst_8 = arith.constant 3.200000e+01 : f32
    %6 = vector.broadcast %cst_8 : f32 to vector<1x24x1xf32>
    %7 = arith.divf %5, %6 : vector<1x24x1xf32>
    %8 = vector.broadcast %7 : vector<1x24x1xf32> to vector<1x24x32xf32>
    %9 = arith.subf %3, %8 : vector<1x24x32xf32>
    %10 = arith.mulf %9, %9 : vector<1x24x32xf32>
    %cst_9 = arith.constant dense<0.000000e+00> : vector<1x24xf32>
    %11 = vector.multi_reduction <add>, %10, %cst_9 [2] : vector<1x24x32xf32> to vector<1x24xf32>
    %12 = vector.shape_cast %11 : vector<1x24xf32> to vector<1x24x1xf32>
    %cst_10 = arith.constant 3.200000e+01 : f32
    %13 = vector.broadcast %cst_10 : f32 to vector<1x24x1xf32>
    %14 = arith.divf %12, %13 : vector<1x24x1xf32>
    %15 = vector.broadcast %7 : vector<1x24x1xf32> to vector<1x24x128xf32>
    %16 = arith.subf %0, %15 : vector<1x24x128xf32>
    %cst_11 = arith.constant 9.99999974E-6 : f32
    %17 = vector.broadcast %cst_11 : f32 to vector<1x24x1xf32>
    %18 = arith.addf %14, %17 : vector<1x24x1xf32>
    %19 = math.rsqrt %18 : vector<1x24x1xf32>
    %20 = vector.broadcast %19 : vector<1x24x1xf32> to vector<1x24x128xf32>
    %21 = arith.mulf %16, %20 : vector<1x24x128xf32>
    %22 = vector.broadcast %1 : vector<1x1x128xf32> to vector<1x24x128xf32>
    %23 = arith.mulf %21, %22 : vector<1x24x128xf32>
    %24 = vector.broadcast %2 : vector<1x1x128xf32> to vector<1x24x128xf32>
    %25 = arith.addf %23, %24 : vector<1x24x128xf32>
    %cst_12 = arith.constant dense<0.000000e+00> : vector<1x128xf32>
    %26 = vector.multi_reduction <add>, %25, %cst_12 [1] : vector<1x24x128xf32> to vector<1x128xf32>
    %27 = vector.shape_cast %26 : vector<1x128xf32> to vector<1x1x128xf32>
    %cst_13 = arith.constant 2.400000e+01 : f32
    %28 = vector.broadcast %cst_13 : f32 to vector<1x1x128xf32>
    %29 = arith.divf %27, %28 : vector<1x1x128xf32>
    %30 = vector.broadcast %29 : vector<1x1x128xf32> to vector<1x24x128xf32>
    %31 = arith.subf %25, %30 : vector<1x24x128xf32>
    %32 = vector.shape_cast %31 : vector<1x24x128xf32> to vector<24x128xf32>
    %33 = arith.truncf %32 : vector<24x128xf32> to vector<24x128xbf16>
    %c0_14 = arith.constant 0 : index
    %c0_15 = arith.constant 0 : index
    %34 = vector.load %arg5[%c0_14, %c0_15] : memref<128x128xbf16, #tpu.memory_space<vmem>>, vector<128x128xbf16>
    %cst_16 = arith.constant dense<0.000000e+00> : vector<24x128xf32>
    %35 = tpu.matmul %33, %34, %cst_16 {dimension_numbers = #tpu.dot_dimension_numbers<[1], [0], [0], [1], [0, 0, 1, 1], [], []>} : vector<24x128xbf16>, vector<128x128xbf16>, vector<24x128xf32> -> vector<24x128xf32>
    %c0_17 = arith.constant 0 : index
    %c0_18 = arith.constant 0 : index
    %36 = vector.load %arg6[%c0_17, %c0_18] : memref<1x128xf32, #tpu.memory_space<vmem>>, vector<1x128xf32>
    %37 = vector.broadcast %36 : vector<1x128xf32> to vector<24x128xf32>
    %38 = arith.addf %35, %37 : vector<24x128xf32>
    %c0_19 = arith.constant 0 : index
    %c0_20 = arith.constant 0 : index
    %c0_21 = arith.constant 0 : index
    %39 = vector.load %arg2[%c0_19, %c0_20, %c0_21] : memref<1x24x128xf32, #tpu.memory_space<vmem>>, vector<1x24x128xf32>
    %40 = vector.shape_cast %38 : vector<24x128xf32> to vector<1x24x128xf32>
    %41 = arith.addf %39, %40 : vector<1x24x128xf32>
    %c0_22 = arith.constant 0 : index
    %c0_23 = arith.constant 0 : index
    %c0_24 = arith.constant 0 : index
    %42 = vector.load %arg7[%c0_22, %c0_23, %c0_24] : memref<1x24x128xf32, #tpu.memory_space<vmem>>, vector<1x24x128xf32>
    tpu.vector_store %arg7[%c0_22, %c0_23, %c0_24], %41 {strides = array<i32>} : memref<1x24x128xf32, #tpu.memory_space<vmem>>, vector<1x24x128xf32>,
    return
  }
  func.func @transform_0(%arg0: i32) -> (i32, i32, i32) {
    %c0_i32 = arith.constant 0 : i32
    %c0_i32_0 = arith.constant 0 : i32
    %c0_i32_1 = arith.constant 0 : i32
    return %arg0, %c0_i32, %c0_i32_0 : i32, i32, i32
  }
  func.func @transform_1(%arg0: i32) -> (i32, i32, i32) {
    %c0_i32 = arith.constant 0 : i32
    %c0_i32_0 = arith.constant 0 : i32
    %c0_i32_1 = arith.constant 0 : i32
    return %arg0, %c0_i32, %c0_i32_0 : i32, i32, i32
  }
  func.func @transform_2(%arg0: i32) -> (i32, i32, i32) {
    %c0_i32 = arith.constant 0 : i32
    %c0_i32_0 = arith.constant 0 : i32
    %c0_i32_1 = arith.constant 0 : i32
    %c0_i32_2 = arith.constant 0 : i32
    return %c0_i32, %c0_i32_0, %c0_i32_1 : i32, i32, i32
  }
  func.func @transform_3(%arg0: i32) -> (i32, i32, i32) {
    %c0_i32 = arith.constant 0 : i32
    %c0_i32_0 = arith.constant 0 : i32
    %c0_i32_1 = arith.constant 0 : i32
    %c0_i32_2 = arith.constant 0 : i32
    return %c0_i32, %c0_i32_0, %c0_i32_1 : i32, i32, i32
  }
  func.func @transform_4(%arg0: i32) -> (i32, i32) {
    %c0_i32 = arith.constant 0 : i32
    %c0_i32_0 = arith.constant 0 : i32
    %c0_i32_1 = arith.constant 0 : i32
    return %c0_i32, %c0_i32_0 : i32, i32
  }
  func.func @transform_5(%arg0: i32) -> (i32, i32) {
    %c0_i32 = arith.constant 0 : i32
    %c0_i32_0 = arith.constant 0 : i32
    %c0_i32_1 = arith.constant 0 : i32
    return %c0_i32, %c0_i32_0 : i32, i32
  }
  func.func @transform_6(%arg0: i32) -> (i32, i32, i32) {
    %c0_i32 = arith.constant 0 : i32
    %c0_i32_0 = arith.constant 0 : i32
    %c0_i32_1 = arith.constant 0 : i32
    return %arg0, %c0_i32, %c0_i32_0 : i32, i32, i32
  }
}

</mosaic_0001>

<bundles_post_ra>
// kernel: _lambda_.17
= control target key start
LH: loop header
LB: loop body
LE: loop exit
PB: predicated region body
PF: predicated region fallthrough
CT: control target
= control target key end

     0   :  { %s443_s12 = smov 0   ;;  %s487_s0 = inlined_call_operand.vmem [shape: f32[2,16,128], index: 0, kind: input, shape index: {}]   ;;  %s488_s1 = inlined_call_operand.vmem [shape: bf16[128,128], index: 1, kind: input, shape index: {}]   ;;  %s489_s2 = inlined_call_operand.vmem [shape: f32[1,128], index: 2, kind: input, shape index: {}]   ;;  %s490_s3 = inlined_call_operand.vmem [shape: f32[2,16,128], index: 3, kind: output, shape index: {}]  }
   0x1 LB: > { %s344_s13 = sadd.s32 4294967295, %s419_s12   ;;  %p348_p0 = scmp.ge.s32.totalorder %s419_s12, 1  ;;  %s419_s12 = sphi %s443_s12, %s13_s12  }
   0x2   : > { %p137_p1 = scmp.lt.s32.totalorder %s419_s12, 3 }
   0x4   : > { %p138_p2 = pnand %p348_p0, %p137_p1 }
   0x5   : > { %v405_v0 = vld [vmem:[%s488_s1] sm:$0xff] (!%p138_p2)   ;;  %v421_v1 = vmov (!%p138_p2), 0.0   ;;  %v406_v2 = vld [vmem:[%s488_s1 + $0x8] sm:$0xff] (!%p138_p2)   ;;  %vm422_vm0 = vmmov (!%p138_p2), 0   ;;  %v407_v3 = vld [vmem:[%s488_s1 + $0x10] sm:$0xff] (!%p138_p2)   ;;  %p161_p3 = scmp.lt.s32.totalorder (!%p138_p2), %s344_s13, 1 }
   0x6   : > { %141 = sbr.rel (%p138_p2) target bundleno = 255 (0xff), region = 32  ;;  %375 = vmatprep.subr.bf16.mxu0 (!%p138_p2), %v421_v1  ;;  %391 = vmatprep.mubr.msk.bf16.mxu0 (!%p138_p2), %vm422_vm0, %v421_v1  ;;  %v408_v4 = vld [vmem:[%s488_s1 + $0x18] sm:$0xff] (!%p138_p2)   ;;  %v409_v5 = vld [vmem:[%s488_s1 + $0x20] sm:$0xff] (!%p138_p2)   ;;  %v410_v6 = vld [vmem:[%s488_s1 + $0x28] sm:$0xff] (!%p138_p2)  }
   0x7   : > { %376 = vmatpush3.bf16.msra.mxu0 (!%p138_p2), %v405_v0  ;;  %v411_v7 = vld [vmem:[%s488_s1 + $0x30] sm:$0xff] (!%p138_p2)   ;;  %v412_v8 = vld [vmem:[%s488_s1 + $0x38] sm:$0xff] (!%p138_p2)   ;;  %v353_v12 = vld [vmem:[%s489_s2] ss:$0 sm:$0xff] (!%p138_p2) }
   0x8   : > { %377 = vmatprep.subr.bf16.mxu0 (!%p138_p2), %v421_v1 }
   0xb   : > { %378 = vmatpush3.bf16.msra.mxu0 (!%p138_p2), %v406_v2 }
   0xc   : > { %379 = vmatprep.subr.bf16.mxu0 (!%p138_p2), %v421_v1 }
   0xd   : > { %s492_s13 = smov (!%p161_p3, %s344_s13), 1 }
   0xe   : > { %s364_s26 = sshll.u32 %s492_s13, 4 }
   0xf   : > { %380 = vmatpush3.bf16.msra.mxu0 %v407_v3  ;;  %s165_s4 = scalar_lea.vmem %s487_s0, %s364_s26  ;;  %s170_s11 = scalar_lea.vmem %s490_s3, %s364_s26 }
  0x10   : > { %381 = vmatprep.subr.bf16.mxu0 %v421_v1  ;;  %v172_v9 = vld [vmem:[%s165_s4] sm:$0xff]  ;;  %v173_v10 = vld [vmem:[%s165_s4 + $0x8] sm:$0xff] }
  0x11   : > { %v174_v11 = vpack.c.bf16 %v173_v10, %v172_v9 }
  0x13   : > { %382 = vmatpush3.bf16.msra.mxu0 %v408_v4 }
  0x14   : > { %383 = vmatprep.subr.bf16.mxu0 %v421_v1 }
  0x17   : > { %384 = vmatpush3.bf16.msra.mxu0 %v409_v5 }
  0x18   : > { %385 = vmatprep.subr.bf16.mxu0 %v421_v1 }
  0x1b   : > { %386 = vmatpush3.bf16.msra.mxu0 %v410_v6 }
  0x1c   : > { %387 = vmatprep.subr.bf16.mxu0 %v421_v1 }
  0x1f   : > { %388 = vmatpush3.bf16.msra.mxu0 %v411_v7 }
  0x20   : > { %389 = vmatprep.subr.bf16.mxu0 %v421_v1 }
  0x23   : > { %390 = vmatpush3.bf16.msra.mxu0 %v412_v8 }
  0x26   : > { %392 = vmatmul.mubr.bf16.vlgmr.msra.gmra.mrb[0].mxu0 %v174_v11 }
  0xf9   : > { %v280_v13 = vpop.f32.mrb[0].mxu0 }
  0xfa   : > { %v281_v14 = vadd.f32 %v353_v12, %v280_v13  ;;  %v393_v15 = vpop.f32.mrb[1].mxu0 }
  0xfb   : > { %v283_v16 = vpop.f32.mrb[2].mxu0 }
  0xfc   : > { %287 = vst [vmem:[%s170_s11] sm:$0xff] %v281_v14  ;;  %v284_v17 = vadd.f32 %v353_v12, %v283_v16  ;;  %v394_v18 = vpop.f32.mrb[3].mxu0 }
  0xfe   : > { %288 = vst [vmem:[%s170_s11 + $0x8] sm:$0xff] %v284_v17 }
  0xff PF: > { %s13_s12 = sadd.s32 1, %s419_s12  }
 0x100   : > { %p10_p4 = scmp.ge.s32.totalorder %s13_s12, 4  }
 0x102   :  { %12 = sbr.rel (!%p10_p4) target bundleno = 1 (0x1), region = 62 }

// kernel: _lambda_.16
= control target key start
LH: loop header
LB: loop body
LE: loop exit
PB: predicated region body
PF: predicated region fallthrough
CT: control target
= control target key end

     0   :  { %s788_s12 = smov 0   ;;  %s915_s0 = inlined_call_operand.vmem [shape: f32[2,16,128], index: 0, kind: input, shape index: {}]   ;;  %s916_s1 = inlined_call_operand.vmem [shape: f32[2,16,128], index: 1, kind: input, shape index: {}]   ;;  %s917_s2 = inlined_call_operand.vmem [shape: bf16[384,128], index: 2, kind: input, shape index: {}]   ;;  %s918_s3 = inlined_call_operand.vmem [shape: f32[2,16,128], index: 3, kind: output, shape index: {}]  }
   0x1 LB: > { %s597_s13 = sadd.s32 4294967295, %s764_s12   ;;  %p601_p0 = scmp.ge.s32.totalorder %s764_s12, 1  ;;  %s764_s12 = sphi %s788_s12, %s13_s12  }
   0x2   : > { %p147_p1 = scmp.lt.s32.totalorder %s764_s12, 3 }
   0x4   : > { %p148_p2 = pnand %p601_p0, %p147_p1 }
   0x5   : > { %v734_v0 = vld [vmem:[%s917_s2 + $0x40] sm:$0xff] (!%p148_p2)   ;;  %v766_v1 = vmov (!%p148_p2), 0.0   ;;  %v736_v3 = vld [vmem:[%s917_s2 + $0x48] sm:$0xff] (!%p148_p2)   ;;  %vm767_vm0 = vmmov (!%p148_p2), 0   ;;  %p176_p3 = scmp.lt.s32.totalorder (!%p148_p2), %s597_s13, 1  ;;  %v738_v5 = vld [vmem:[%s917_s2 + $0x50] sm:$0xff] (!%p148_p2)  }
   0x6   : > { %151 = sbr.rel (%p148_p2) target bundleno = 289 (0x121), region = 32  ;;  %664 = vmatprep.subr.bf16.mxu0 (!%p148_p2), %v766_v1  ;;  %684 = vmatprep.subr.bf16.mxu1 (!%p148_p2), %v766_v1  ;;  %v735_v2 = vld [vmem:[%s917_s2] sm:$0xff] (!%p148_p2)   ;;  %v737_v4 = vld [vmem:[%s917_s2 + $0x8] sm:$0xff] (!%p148_p2)   ;;  %v739_v6 = vld [vmem:[%s917_s2 + $0x10] sm:$0xff] (!%p148_p2)  }
   0x7   : > { %665 = vmatpush3.bf16.msra.mxu0 (!%p148_p2), %v734_v0  ;;  %680 = vmatprep.mubr.msk.bf16.mxu0 (!%p148_p2), %vm767_vm0, %v766_v1  ;;  %v740_v7 = vld [vmem:[%s917_s2 + $0x58] sm:$0xff] (!%p148_p2)   ;;  %v742_v9 = vld [vmem:[%s917_s2 + $0x60] sm:$0xff] (!%p148_p2)   ;;  %v744_v13 = vld [vmem:[%s917_s2 + $0x68] sm:$0xff] (!%p148_p2)  }
   0x8   : > { %685 = vmatpush3.bf16.msra.mxu1 (!%p148_p2), %v735_v2  ;;  %666 = vmatprep.subr.bf16.mxu0 (!%p148_p2), %v766_v1  ;;  %v741_v8 = vld [vmem:[%s917_s2 + $0x18] sm:$0xff] (!%p148_p2)   ;;  %v743_v10 = vld [vmem:[%s917_s2 + $0x20] sm:$0xff] (!%p148_p2)   ;;  %v745_v14 = vld [vmem:[%s917_s2 + $0x28] sm:$0xff] (!%p148_p2)  }
   0x9   : > { %686 = vmatprep.subr.bf16.mxu1 (!%p148_p2), %v766_v1  ;;  %700 = vmatprep.mubr.msk.bf16.mxu1 (!%p148_p2), %vm767_vm0, %v766_v1  ;;  %v746_v15 = vld [vmem:[%s917_s2 + $0x70] sm:$0xff] (!%p148_p2)   ;;  %v748_v17 = vld [vmem:[%s917_s2 + $0x78] sm:$0xff] (!%p148_p2)   ;;  %v750_v23 = vld [vmem:[%s917_s2 + $0x80] sm:$0xff] (!%p148_p2)  }
   0xa   : > { %v747_v16 = vld [vmem:[%s917_s2 + $0x30] sm:$0xff] (!%p148_p2)   ;;  %v749_v18 = vld [vmem:[%s917_s2 + $0x38] sm:$0xff] (!%p148_p2)   ;;  %v751_v24 = vld [vmem:[%s917_s2 + $0x88] sm:$0xff] (!%p148_p2)  }
   0xb   : > { %667 = vmatpush3.bf16.msra.mxu0 (!%p148_p2), %v736_v3  ;;  %v752_v25 = vld [vmem:[%s917_s2 + $0x90] sm:$0xff] (!%p148_p2)   ;;  %v753_v26 = vld [vmem:[%s917_s2 + $0x98] sm:$0xff] (!%p148_p2)   ;;  %v754_v27 = vld [vmem:[%s917_s2 + $0xa0] sm:$0xff] (!%p148_p2)  }
   0xc   : > { %687 = vmatpush3.bf16.msra.mxu1 (!%p148_p2), %v737_v4  ;;  %668 = vmatprep.subr.bf16.mxu0 (!%p148_p2), %v766_v1  ;;  %v755_v28 = vld [vmem:[%s917_s2 + $0xa8] sm:$0xff] (!%p148_p2)   ;;  %v756_v29 = vld [vmem:[%s917_s2 + $0xb0] sm:$0xff] (!%p148_p2)   ;;  %v757_v30 = vld [vmem:[%s917_s2 + $0xb8] sm:$0xff] (!%p148_p2)  }
   0xd   : > { %s920_s13 = smov (!%p176_p3, %s597_s13), 1  ;;  %688 = vmatprep.subr.bf16.mxu1 %v766_v1 }
   0xe   : > { %s827_s28 = sshll.u32 %s920_s13, 4 }
   0xf   : > { %669 = vmatpush3.bf16.msra.mxu0 %v738_v5  ;;  %s180_s6 = scalar_lea.vmem %s915_s0, %s827_s28  ;;  %s185_s17 = scalar_lea.vmem %s916_s1, %s827_s28 }
  0x10   : > { %689 = vmatpush3.bf16.msra.mxu1 %v739_v6  ;;  %670 = vmatprep.subr.bf16.mxu0 %v766_v1  ;;  %v192_v11 = vld [vmem:[%s180_s6] sm:$0xff]  ;;  %v193_v12 = vld [vmem:[%s180_s6 + $0x8] sm:$0xff]  ;;  %s190_s20 = scalar_lea.vmem %s918_s3, %s827_s28 }
  0x11   : > { %690 = vmatprep.subr.bf16.mxu1 %v766_v1  ;;  %242 = vst [vmem:[#allocation2 + $0x1] sm:$0xff] %v192_v11  ;;  %243 = vst [vmem:[#allocation2 + $0x9] sm:$0xff] %v193_v12  ;;  %v251_v21 = vpack.c.bf16 %v193_v12, %v192_v11  ;;  %v524_v45 = vld [vmem:[%s185_s17] sm:$0xff]  ;;  %v525_v49 = vld [vmem:[%s185_s17 + $0x8] sm:$0xff] }
  0x12   : > { %245 = vst [vmem:[#allocation2 + $0x11] sm:$0x1] %v192_v11  ;;  %244 = vst [vmem:[#allocation2 - $0x7] sm:$0x80] %v193_v12 }
  0x13   : > { %671 = vmatpush3.bf16.msra.mxu0 %v740_v7 }
  0x14   : > { %691 = vmatpush3.bf16.msra.mxu1 %v741_v8  ;;  %672 = vmatprep.subr.bf16.mxu0 %v766_v1 }
  0x15   : > { %692 = vmatprep.subr.bf16.mxu1 %v766_v1 }
  0x17   : > { %673 = vmatpush3.bf16.msra.mxu0 %v742_v9 }
  0x18   : > { %693 = vmatpush3.bf16.msra.mxu1 %v743_v10  ;;  %674 = vmatprep.subr.bf16.mxu0 %v766_v1  ;;  %v247_v20 = vld [vmem:[#allocation2 + $0x8] sm:$0xff] }
  0x19   : > { %694 = vmatprep.subr.bf16.mxu1 %v766_v1  ;;  %v246_v19 = vld [vmem:[#allocation2] sm:$0xff]  ;;  %v431_v32 = vld [vmem:[#allocation2 + $0xa] sm:$0xff] }
  0x1a   : > { %v248_v22 = vpack.c.bf16 %v247_v20, %v246_v19  ;;  %v430_v31 = vld [vmem:[#allocation2 + $0x2] sm:$0xff] }
  0x1b   : > { %675 = vmatpush3.bf16.msra.mxu0 %v744_v13  ;;  %v432_v33 = vpack.c.bf16 %v431_v32, %v430_v31 }
  0x1c   : > { %695 = vmatpush3.bf16.msra.mxu1 %v745_v14  ;;  %676 = vmatprep.subr.bf16.mxu0 %v766_v1 }
  0x1d   : > { %696 = vmatprep.subr.bf16.mxu1 %v766_v1 }
  0x1f   : > { %677 = vmatpush3.bf16.msra.mxu0 %v746_v15 }
  0x20   : > { %697 = vmatpush3.bf16.msra.mxu1 %v747_v16  ;;  %678 = vmatprep.subr.bf16.mxu0 %v766_v1 }
  0x21   : > { %698 = vmatprep.subr.bf16.mxu1 %v766_v1 }
  0x23   : > { %679 = vmatpush3.bf16.msra.mxu0 %v748_v17 }
  0x24   : > { %699 = vmatpush3.bf16.msra.mxu1 %v749_v18  ;;  %704 = vmatprep.subr.bf16.mxu0 %v766_v1 }
  0x26   : > { %681 = vmatmul.mubr.bf16.vlgmr.msra.gmra.mrb[0].mxu0 %v251_v21 }
  0x27   : > { %701 = vmatmul.mubr.bf16.vlgmr.msra.gmra.mrb[0].mxu1 %v248_v22  ;;  %705 = vmatpush3.bf16.msra.mxu0 %v750_v23 }
  0x28   : > { %706 = vmatprep.subr.bf16.mxu0 %v766_v1  ;;  %720 = vmatprep.mubr.msk.bf16.mxu0 %vm767_vm0, %v766_v1 }
  0x2b   : > { %707 = vmatpush3.bf16.msra.mxu0 %v751_v24 }
  0x2c   : > { %708 = vmatprep.subr.bf16.mxu0 %v766_v1 }
  0x2f   : > { %709 = vmatpush3.bf16.msra.mxu0 %v752_v25 }
  0x30   : > { %710 = vmatprep.subr.bf16.mxu0 %v766_v1 }
  0x33   : > { %711 = vmatpush3.bf16.msra.mxu0 %v753_v26 }
  0x34   : > { %712 = vmatprep.subr.bf16.mxu0 %v766_v1 }
  0x37   : > { %713 = vmatpush3.bf16.msra.mxu0 %v754_v27 }
  0x38   : > { %714 = vmatprep.subr.bf16.mxu0 %v766_v1 }
  0x3b   : > { %715 = vmatpush3.bf16.msra.mxu0 %v755_v28 }
  0x3c   : > { %716 = vmatprep.subr.bf16.mxu0 %v766_v1 }
  0x3f   : > { %717 = vmatpush3.bf16.msra.mxu0 %v756_v29 }
  0x40   : > { %718 = vmatprep.subr.bf16.mxu0 %v766_v1 }
  0x43   : > { %719 = vmatpush3.bf16.msra.mxu0 %v757_v30 }
  0x46   : > { %721 = vmatmul.mubr.bf16.vlgmr.msra.gmra.mrb[4].mxu0 %v432_v33 }
  0xf9   : > { %v334_v34 = vpop.f32.mrb[0].mxu0 }
  0xfa   : > { %v423_v35 = vpop.f32.mrb[0].mxu1  ;;  %v682_v36 = vpop.f32.mrb[1].mxu0 }
  0xfb   : > { %v424_v37 = vadd.f32 %v423_v35, %v334_v34  ;;  %v702_v38 = vpop.f32.mrb[1].mxu1  ;;  %v337_v39 = vpop.f32.mrb[2].mxu0 }
  0xfc   : > { %v426_v40 = vpop.f32.mrb[2].mxu1  ;;  %v683_v41 = vpop.f32.mrb[3].mxu0 }
  0xfd   : > { %v427_v42 = vadd.f32 %v426_v40, %v337_v39  ;;  %v703_v43 = vpop.f32.mrb[3].mxu1 }
 0x119   : > { %v515_v44 = vpop.f32.mrb[4].mxu0 }
 0x11a   : > { %v522_v46 = vadd.f32 %v515_v44, %v424_v37  ;;  %v722_v47 = vpop.f32.mrb[5].mxu0 }
 0x11b   : > { %v518_v48 = vpop.f32.mrb[6].mxu0 }
 0x11c   : > { %v526_v50 = vadd.f32 %v524_v45, %v522_v46  ;;  %v523_v51 = vadd.f32 %v518_v48, %v427_v42  ;;  %v723_v52 = vpop.f32.mrb[7].mxu0 }
 0x11e   : > { %528 = vst [vmem:[%s190_s20] sm:$0xff] %v526_v50  ;;  %v527_v53 = vadd.f32 %v525_v49, %v523_v51 }
 0x120   : > { %529 = vst [vmem:[%s190_s20 + $0x8] sm:$0xff] %v527_v53 }
 0x121 PF: > { %s13_s12 = sadd.s32 1, %s764_s12  }
 0x122   : > { %p10_p4 = scmp.ge.s32.totalorder %s13_s12, 4  }
 0x124   :  { %12 = sbr.rel (!%p10_p4) target bundleno = 1 (0x1), region = 65 }

// kernel: _lambda_.20
= control target key start
LH: loop header
LB: loop body
LE: loop exit
PB: predicated region body
PF: predicated region fallthrough
CT: control target
= control target key end

     0   :  { %s342_s12 = smov 0   ;;  %s376_s0 = inlined_call_operand.vmem [shape: f32[2,16,128], index: 0, kind: input, shape index: {}]   ;;  %s377_s1 = inlined_call_operand.vmem [shape: f32[1,1,128], index: 1, kind: input, shape index: {}]   ;;  %s378_s2 = inlined_call_operand.vmem [shape: f32[1,1,128], index: 2, kind: input, shape index: {}]   ;;  %s379_s3 = inlined_call_operand.vmem [shape: f32[2,16,128], index: 3, kind: output, shape index: {}]  }
   0x1 LB: > { %s287_s13 = sadd.s32 4294967295, %s320_s12   ;;  %p291_p0 = scmp.ge.s32.totalorder %s320_s12, 1  ;;  %s320_s12 = sphi %s342_s12, %s13_s12  }
   0x2   : > { %p137_p1 = scmp.lt.s32.totalorder %s320_s12, 3 }
   0x4   : > { %p138_p2 = pnand %p291_p0, %p137_p1 }
   0x5   : > { %p161_p3 = scmp.lt.s32.totalorder (!%p138_p2), %s287_s13, 1  ;;  %vm175_vm0 = vcmask (!%p138_p2), 261120   ;;  %v296_v22 = vld [vmem:[%s377_s1] ss:$0 sm:$0xff] (!%p138_p2) }
   0x6   : > { %141 = sbr.rel (%p138_p2) target bundleno = 353 (0x161), region = 32  ;;  %v297_v26 = vld [vmem:[%s378_s2] ss:$0 sm:$0xff] (!%p138_p2) }
   0xd   : > { %s381_s13 = smov (!%p161_p3, %s287_s13), 1 }
   0xe   : > { %s300_s14 = sshll.u32 %s381_s13, 4 }
   0xf   : > { %s165_s17 = scalar_lea.vmem %s376_s0, %s300_s14  ;;  %s170_s24 = scalar_lea.vmem %s379_s3, %s300_s14 }
  0x10   : > { %v171_v0 = vld [vmem:[%s165_s17] sm:$0xff]  ;;  %v172_v1 = vld [vmem:[%s165_s17 + $0x8] sm:$0xff] }
  0x11   : > { %v176_v2 = vsel %vm175_vm0, %v171_v0, 0.0  ;;  %v179_v3 = vsel %vm175_vm0, %v172_v1, 0.0 }
  0x12   : > { %177 = vadd.xlane.f32.xlu0 %v176_v2 }
  0x16   : > { %180 = vadd.xlane.f32.xlu0 %v179_v3 }
  0x9f   : > { %v178_v4 = vpop.xlane.xlu0 %177 }
  0xa0   : > { %v183_v5 = vmul.f32 0.03125, %v178_v4 }
  0xa2   : > { %v185_v6 = vsub.f32 %v171_v0, %v183_v5 }
  0xa3   : > { %v181_v7 = vpop.xlane.xlu0 %180 }
  0xa4   : > { %v184_v8 = vmul.f32 0.03125, %v181_v7  ;;  %v187_v9 = vmul.f32 %v185_v6, %v185_v6 }
  0xa6   : > { %v186_v10 = vsub.f32 %v172_v1, %v184_v8  ;;  %v189_v11 = vsel %vm175_vm0, %v187_v9, 0.0 }
  0xa7   : > { %190 = vadd.xlane.f32.xlu1 %v189_v11 }
  0xa8   : > { %v188_v12 = vmul.f32 %v186_v10, %v186_v10 }
  0xaa   : > { %v192_v13 = vsel %vm175_vm0, %v188_v12, 0.0 }
  0xab   : > { %193 = vadd.xlane.f32.xlu1 %v192_v13 }
 0x134   : > { %v191_v14 = vpop.xlane.xlu1 %190 }
 0x135   : > { %v195_v15 = vmul.f32 0.03125, %v191_v14 }
 0x137   : > { %v197_v16 = vadd.f32 1e-05, %v195_v15 }
 0x138   : > { %v194_v17 = vpop.xlane.xlu1 %193 }
 0x139   : > { %310 = vrsqrt.f32 %v197_v16  ;;  %v196_v18 = vmul.f32 0.03125, %v194_v17 }
 0x13b   : > { %v198_v19 = vadd.f32 1e-05, %v196_v18 }
 0x13d   : > { %312 = vrsqrt.f32 %v198_v19 }
 0x143   : > { %v311_v20 = vpop.eup %310 }
 0x144   : > { %v201_v21 = vmul.f32 %v311_v20, %v185_v6 }
 0x146   : > { %v209_v24 = vmul.f32 %v296_v22, %v201_v21 }
 0x147   : > { %v313_v23 = vpop.eup %312 }
 0x148   : > { %v202_v25 = vmul.f32 %v313_v23, %v186_v10  ;;  %v217_v28 = vadd.f32 %v297_v26, %v209_v24 }
 0x14a   : > { %v210_v27 = vmul.f32 %v296_v22, %v202_v25 }
 0x14c   : > { %v218_v29 = vadd.f32 %v297_v26, %v210_v27 }
 0x14e   : > { %v219_v30 = vadd.f32 %v218_v29, %v217_v28 }
 0x150   : > { %v220_v31 = vrot.slane %v219_v30, 4 }
 0x152   : > { %v221_v32 = vadd.f32 %v220_v31, %v219_v30 }
 0x154   : > { %v222_v33 = vrot.slane %v221_v32, 2 }
 0x156   : > { %v223_v34 = vadd.f32 %v222_v33, %v221_v32 }
 0x158   : > { %v224_v35 = vrot.slane %v223_v34, 1 }
 0x15a   : > { %v225_v36 = vadd.f32 %v224_v35, %v223_v34 }
 0x15c   : > { %v227_v37 = vmul.f32 0.0625, %v225_v36 }
 0x15e   : > { %v228_v38 = vsub.f32 %v217_v28, %v227_v37  ;;  %v229_v39 = vsub.f32 %v218_v29, %v227_v37 }
 0x160   : > { %230 = vst [vmem:[%s170_s24] sm:$0xff] %v228_v38  ;;  %231 = vst [vmem:[%s170_s24 + $0x8] sm:$0xff] %v229_v39 }
 0x161 PF: > { %s13_s12 = sadd.s32 1, %s320_s12  }
 0x162   : > { %p10_p4 = scmp.ge.s32.totalorder %s13_s12, 4  }
 0x164   :  { %12 = sbr.rel (!%p10_p4) target bundleno = 1 (0x1), region = 62 }

// kernel: _lambda_.18
= control target key start
LH: loop header
LB: loop body
LE: loop exit
PB: predicated region body
PF: predicated region fallthrough
CT: control target
= control target key end

     0   :  { %11 = vsyncpa [#allocation4], 0  ;;  %s802_s0 = inlined_call_operand.vmem [shape: f32[2,16,32], index: 0, kind: input, shape index: {}]   ;;  %s803_s1 = inlined_call_operand.vmem [shape: f32[2,16,128], index: 1, kind: input, shape index: {}]   ;;  %s804_s2 = inlined_call_operand.vmem [shape: bf16[32,128], index: 2, kind: input, shape index: {}]   ;;  %s805_s3 = inlined_call_operand.vmem [shape: f32[1,128], index: 3, kind: input, shape index: {}]   ;;  %s806_s4 = inlined_call_operand.vmem [shape: f32[2,16,128], index: 4, kind: output, shape index: {0}]   ;;  %s807_s5 = inlined_call_operand.hbm [shape: f32[2,16,128], index: 5, kind: output, shape index: {1}]  }
   0x1   :  { %13 = vsyncpa [#allocation4 + $0x1], 0  ;;  %s664_s18 = smov 0   ;;  %s666_s19 = smov 0  }
   0x2   :  { %s668_s20 = smov 0   ;;  %s670_s21 = smov 0  }
   0x3 LB: > { %s685_s22 = sadd.s32 4294967295, %s627_s21   ;;  %s485_s23 = sadd.s32 4294967294, %s627_s21   ;;  %s627_s21 = sphi %s670_s21, %s813_s21   ;;  %s623_s20 = sphi %s668_s20, %s812_s20   ;;  %s619_s19 = sphi %s666_s19, %s811_s19   ;;  %s615_s18 = sphi %s664_s18, %s810_s18  }
   0x4   : > { %s689_s24 = sadd.s32 1, %s627_s21   ;;  %s146_s25 = sadd.s32 1, %s623_s20 }
   0x5   : > { %s143_s26 = ssub.s32 %s627_s21, %s689_s24  ;;  %p156_p0 = scmp.ne.s32.totalorder %s623_s20, %s619_s19 }
   0x6   : > { %p144_p1 = scmp.eq.s32.totalorder %s143_s26, 0  ;;  %p157_p2 = scmp.eq.s32.totalorder %s685_s22, 1 }
   0x7   : > { %p162_p3 = scmp.ne.s32.totalorder %s619_s19, %s615_s18  ;;  %p163_p4 = scmp.eq.s32.totalorder %s485_s23, 1 }
   0x8   : > { %s700_s27 = scalar_select %p144_p1, %s623_s20, %s146_s25  }
   0x9   : > { %p702_p5 = por %p157_p2, %p156_p0  ;;  %p706_p6 = por %p163_p4, %p162_p3 }
   0xa   : > { %p488_p7 = scmp.ge.s32.totalorder %s627_s21, 1  ;;  %p203_p8 = scmp.lt.s32.totalorder %s627_s21, 3 }
   0xc   : > { %p204_p9 = pnand %p488_p7, %p203_p8 }
   0xd   : > { %v563_v0 = vld [vmem:[%s804_s2] sm:$0xff] (!%p204_p9)   ;;  %v629_v1 = vmov (!%p204_p9), 0.0   ;;  %v564_v2 = vld [vmem:[%s804_s2 + $0x8] sm:$0xff] (!%p204_p9)   ;;  %vm630_vm0 = vmmov (!%p204_p9), 0   ;;  %p241_p10 = scmp.lt.s32.totalorder (!%p204_p9), %s685_s22, 1  ;;  %vm283_vm1 = vcmask (!%p204_p9), 261120  }
   0xe   : > { %207 = sbr.rel (%p204_p9) target bundleno = 281 (0x119), region = 36  ;;  %512 = vmatprep.subr.bf16.mxu0 (!%p204_p9), %v629_v1  ;;  %516 = vmatprep.mubr.msk.bf16.mxu0 (!%p204_p9), %vm630_vm0, %v629_v1  ;;  %v496_v6 = vld [vmem:[%s805_s3] ss:$0 sm:$0xff] (!%p204_p9)  ;;  %s238_s25 = sand.u32 (!%p204_p9), 1, %s619_s19  }
   0xf   : > { %513 = vmatpush3.bf16.msra.mxu0 (!%p204_p9), %v563_v0  ;;  %s489_s26 = sshll.u32 (!%p204_p9), %s238_s25, 4  ;;  %s508_s30 = sshll.u32 (!%p204_p9), %s685_s22, 8 }
  0x10   : > { %514 = vmatprep.subr.bf16.mxu0 (!%p204_p9), %v629_v1  ;;  %s240_s6 = scalar_lea.vmem (!%p204_p9), [#allocation3], %s489_s26  ;;  %s752_s14 = scalar_lea.hbm (!%p204_p9), %s807_s5, %s508_s30 }
  0x11   : > { %s386_s7 = sshll.u32 (!%p204_p9), %s240_s6, 4  ;;  %s631_s15 = smov (!%p204_p9), [#allocation3]   ;;  %s754_s7 = int_to_ptr.vmem [resolvable:$true] %s386_s7 }
  0x13   : > { %515 = vmatpush3.bf16.msra.mxu0 (!%p204_p9), %v564_v2 }
  0x15   : > { %s242_s9 = scalar_select %p241_p10, %s685_s22, 1 }
  0x16   : > { %s760_s22 = scalar_lea.sflag [#allocation4], %s238_s25 }
  0x17   : > { %s720_s10 = sshll.u32 %s242_s9, 4 }
  0x18   : > { %s245_s13 = scalar_lea.vmem %s802_s0, %s720_s10  ;;  %s250_s16 = scalar_lea.vmem %s803_s1, %s720_s10 }
  0x19   : > { %v257_v3 = vld [vmem:[%s245_s13] sm:$0xff]  ;;  %v258_v4 = vld [vmem:[%s245_s13 + $0x8] sm:$0xff]  ;;  %s747_s11 = scalar_lea.vmem %s806_s4, %s720_s10  ;;  %s565_s10 = scalar_lea.vmem %s754_s7, 256 }
  0x1a   : > { %v259_v5 = vpack.c.bf16 %v258_v4, %v257_v3  ;;  %v328_v8 = vld [vmem:[%s250_s16] sm:$0xff]  ;;  %v329_v12 = vld [vmem:[%s250_s16 + $0x8] sm:$0xff]  ;;  %p566_p11 = scmp.ne.s32.totalorder %s754_s7, %s565_s10  ;;  %s569_s16 = sshll.u32 %s631_s15, 4  ;;  %s570_s16 = int_to_ptr.vmem [resolvable:$false] %s569_s16 }
  0x1b   : > { %s571_s17 = scalar_lea.vmem %s570_s16, 512  ;;  %p572_p0 = scmp.lt.s32.totalorder %s754_s7, %s570_s16 }
  0x1c   : > { %517 = vmatmul.mubr.msk.bf16.vlgmr.msra.gmra.mrb[0].mxu0 %vm283_vm1, %v259_v5  ;;  %p567_p12 = pnand %p566_p11, %p702_p5  ;;  %p573_p1 = scmp.lt.s32.totalorder %s571_s17, %s565_s10 }
  0x1e   : > { %p568_p13 = pneg %p567_p12  ;;  %p574_p2 = por %p573_p1, %p572_p0 }
  0x20   : > { %p575_p3 = pnand %p574_p2, %p568_p13 }
  0xef   : > { %v321_v7 = vpop.f32.mrb[0].mxu0 }
  0xf0   : > { %v322_v9 = vadd.f32 %v496_v6, %v321_v7  ;;  %v518_v10 = vpop.f32.mrb[1].mxu0 }
  0xf1   : > { %v324_v11 = vpop.f32.mrb[2].mxu0 }
  0xf2   : > { %v330_v13 = vadd.f32 %v328_v8, %v322_v9  ;;  %v325_v14 = vadd.f32 %v496_v6, %v324_v11  ;;  %v519_v15 = vpop.f32.mrb[3].mxu0 }
  0xf4   : > { %332 = vst [vmem:[#allocation2 + $0x2] sm:$0xff] %v330_v13  ;;  %334 = vst [vmem:[#allocation2] sm:$0x1] %v330_v13  ;;  %v733_v16 = vadd.f32 %v329_v12, %v325_v14 }
  0xf5   : > { %335 = vst [vmem:[#allocation2 + $0x1] sm:$0x1] %v330_v13 }
  0xf6   : > { %333 = vst [vmem:[#allocation2 + $0xa] sm:$0xff] %v733_v16  ;;  %336 = vst [vmem:[#allocation2 + $0xb] sm:$0x80] %v733_v16 }
  0xf7   : > { %337 = vst [vmem:[#allocation2 + $0xc] sm:$0x80] %v733_v16 }
  0xfc   : > { %v338_v17 = vld [vmem:[#allocation2] sm:$0xff] }
  0xfd   : > { %v340_v18 = vld [vmem:[#allocation2 + $0x1] sm:$0xff]  ;;  %v341_v21 = vld [vmem:[#allocation2 + $0x9] sm:$0xff] }
  0xfe   : > { %v342_v19 = vadd.f32 %v340_v18, %v338_v17  ;;  %v339_v20 = vld [vmem:[#allocation2 + $0x8] sm:$0xff] }
  0xff   : > { %v343_v22 = vadd.f32 %v341_v21, %v339_v20  ;;  %v348_v24 = vld [vmem:[#allocation2 + $0x3] sm:$0xff]  ;;  %v349_v27 = vld [vmem:[#allocation2 + $0xb] sm:$0xff] }
 0x100   : > { %v346_v23 = vadd.f32 %v342_v19, %v330_v13  ;;  %v352_v28 = vld [vmem:[#allocation2 + $0x4] sm:$0xff]  ;;  %v353_v31 = vld [vmem:[#allocation2 + $0xc] sm:$0xff] }
 0x101   : > { %v347_v25 = vadd.f32 %v343_v22, %v733_v16 }
 0x102   : > { %v350_v26 = vadd.f32 %v348_v24, %v346_v23 }
 0x103   : > { %v351_v29 = vadd.f32 %v349_v27, %v347_v25 }
 0x104   : > { %v354_v30 = vadd.f32 %v352_v28, %v350_v26 }
 0x105   : > { %v355_v32 = vadd.f32 %v353_v31, %v351_v29 }
 0x106   : > { %v356_v33 = vmul.f32 0.2, %v354_v30 }
 0x107   : > { %v357_v34 = vmul.f32 0.2, %v355_v32 }
 0x108   : > { %v358_v35 = vsub.f32 %v330_v13, %v356_v33  ;;  %362 = vst [vmem:[%s240_s6] sm:$0xff] %v356_v33 }
 0x109   : > { %v359_v36 = vsub.f32 %v733_v16, %v357_v34  ;;  %363 = vst [vmem:[%s240_s6 + $0x8] sm:$0xff] %v357_v34 }
 0x10a   : > { %360 = vst [vmem:[%s747_s11] sm:$0xff] %v358_v35 }
 0x10b   : > { %578 = shalt.err (!%p575_p3)
}
 0x10c   : > { %s579_s23 = scalar_lea.hbm %s752_s14, 256  ;;  %s583_s30 = scalar_lea.hbm %s807_s5, 512 }
 0x10d   : > { %p580_p4 = scmp.ne.s32.totalorder %s752_s14, %s579_s23  ;;  %p584_p9 = scmp.lt.u32.totalorder %s752_s14, %s807_s5 }
 0x10e   : > { %p585_p10 = scmp.lt.u32.totalorder %s583_s30, %s579_s23  ;;  %p587_p12 = scmp.lt.u32.totalorder %s579_s23, %s752_s14 }
 0x10f   : > { %p581_p7 = pnand %p580_p4, %p702_p5 }
 0x110   : > { %p586_p11 = por %p585_p10, %p584_p9 }
 0x111   : > { %p582_p8 = pneg %p581_p7 }
 0x112   : > { %p588_p13 = por %p587_p12, %p586_p11 }
 0x114   : > { %p589_p0 = pnand %p588_p13, %p582_p8 }
 0x116   : > { %592 = shalt.err (!%p589_p0)
}
 0x117   : > { %s632_s9 = smov 128   ;;  %s633_s12 = smov 8   ;;  %361 = vst [vmem:[%s747_s11 + $0x8] sm:$0xff] %v359_v36 }
 0x118   : > { %520 = dma.vmem_to_hbm [thread:$0]  (%p702_p5), %s754_s7, 256, %s752_s14, %s760_s22, %s632_s9, %s632_s9, %s633_s12  }
 0x119 PF: > { %p526_p1 = scmp.ge.s32.totalorder %s627_s21, 2  ;;  %s409_s13 = sand.u32 1, %s615_s18  }
 0x11a   : > { %s410_s10 = scalar_lea.sflag [#allocation4], %s409_s13 }
 0x11b   : > { %p523_p2 = pnand %p526_p1, %p706_p6 }
 0x11d   : > { %610 = dma.done.wait (!%p523_p2), %s410_s10, 256  }
 0x11e   : > { %612 = vsyncadd (!%p523_p2), %s410_s10, 4294967040  ;;  %p16_p3 = scmp.ge.s32.totalorder %s689_s24, 4   ;;  %s810_s18 = smov %s619_s19 }
 0x11f   : > { %s811_s19 = smov %s623_s20  ;;  %s812_s20 = smov %s700_s27 }
 0x120   : > { %s813_s21 = smov %s689_s24  ;;  %18 = sbr.rel (!%p16_p3) target bundleno = 3 (0x3), region = 86 }
 0x127   :  { %415 = vsyncpa [#allocation4], 1 }
 0x128   :  { %417 = vsyncpa [#allocation4 + $0x1], 1 }

// kernel: _lambda_.15
= control target key start
LH: loop header
LB: loop body
LE: loop exit
PB: predicated region body
PF: predicated region fallthrough
CT: control target
= control target key end

     0   :  { %s326_s9 = smov 0   ;;  %s351_s0 = inlined_call_operand.vmem [shape: f32[2,16,128], index: 0, kind: input, shape index: {}]   ;;  %s352_s1 = inlined_call_operand.vmem [shape: f32[2,16,128], index: 1, kind: output, shape index: {0}]   ;;  %s353_s2 = inlined_call_operand.vmem [shape: f32[2,16,128], index: 2, kind: output, shape index: {1}]  }
   0x1 LB: > { %s279_s10 = sadd.s32 4294967295, %s309_s9   ;;  %p283_p0 = scmp.ge.s32.totalorder %s309_s9, 1  ;;  %s309_s9 = sphi %s326_s9, %s13_s9  }
   0x2   : > { %p115_p1 = scmp.lt.s32.totalorder %s309_s9, 3 }
   0x4   : > { %p116_p2 = pnand %p283_p0, %p115_p1 }
   0x5   : > { %p142_p3 = scmp.lt.s32.totalorder (!%p116_p2), %s279_s10, 1 }
   0x6   : > { %119 = sbr.rel (%p116_p2) target bundleno = 40 (0x28), region = 24 }
   0xd   : > { %s355_s10 = smov (!%p142_p3, %s279_s10), 1 }
   0xe   : > { %s334_s11 = sshll.u32 %s355_s10, 4 }
   0xf   : > { %s146_s14 = scalar_lea.vmem %s351_s0, %s334_s11  ;;  %s156_s17 = scalar_lea.vmem %s353_s2, %s334_s11 }
  0x10   : > { %v157_v0 = vld [vmem:[%s146_s14] sm:$0xff]  ;;  %v158_v1 = vld [vmem:[%s146_s14 + $0x8] sm:$0xff]  ;;  %s151_s20 = scalar_lea.vmem %s352_s1, %s334_s11 }
  0x11   : > { %159 = vst [vmem:[#allocation2 + $0x2] sm:$0xff] %v157_v0  ;;  %161 = vst [vmem:[#allocation2] sm:$0x1] %v157_v0 }
  0x12   : > { %162 = vst [vmem:[#allocation2 + $0x1] sm:$0x1] %v157_v0  ;;  %160 = vst [vmem:[#allocation2 + $0xa] sm:$0xff] %v158_v1 }
  0x13   : > { %163 = vst [vmem:[#allocation2 + $0xb] sm:$0x80] %v158_v1  ;;  %164 = vst [vmem:[#allocation2 + $0xc] sm:$0x80] %v158_v1 }
  0x19   : > { %v165_v2 = vld [vmem:[#allocation2] sm:$0xff]  ;;  %v166_v5 = vld [vmem:[#allocation2 + $0x8] sm:$0xff] }
  0x1a   : > { %v167_v3 = vld [vmem:[#allocation2 + $0x1] sm:$0xff]  ;;  %v168_v6 = vld [vmem:[#allocation2 + $0x9] sm:$0xff] }
  0x1b   : > { %v169_v4 = vadd.f32 %v167_v3, %v165_v2  ;;  %v170_v7 = vadd.f32 %v168_v6, %v166_v5  ;;  %v175_v9 = vld [vmem:[#allocation2 + $0x3] sm:$0xff]  ;;  %v176_v12 = vld [vmem:[#allocation2 + $0xb] sm:$0xff] }
  0x1c   : > { %v179_v13 = vld [vmem:[#allocation2 + $0x4] sm:$0xff]  ;;  %v180_v16 = vld [vmem:[#allocation2 + $0xc] sm:$0xff] }
  0x1d   : > { %v173_v8 = vadd.f32 %v169_v4, %v157_v0  ;;  %v174_v10 = vadd.f32 %v170_v7, %v158_v1 }
  0x1f   : > { %v177_v11 = vadd.f32 %v175_v9, %v173_v8  ;;  %v178_v14 = vadd.f32 %v176_v12, %v174_v10 }
  0x21   : > { %v181_v15 = vadd.f32 %v179_v13, %v177_v11  ;;  %v182_v17 = vadd.f32 %v180_v16, %v178_v14 }
  0x23   : > { %v183_v18 = vmul.f32 0.2, %v181_v15  ;;  %v184_v19 = vmul.f32 0.2, %v182_v17 }
  0x25   : > { %189 = vst [vmem:[%s156_s17] sm:$0xff] %v183_v18  ;;  %v185_v20 = vsub.f32 %v157_v0, %v183_v18  ;;  %190 = vst [vmem:[%s156_s17 + $0x8] sm:$0xff] %v184_v19  ;;  %v186_v21 = vsub.f32 %v158_v1, %v184_v19 }
  0x27   : > { %187 = vst [vmem:[%s151_s20] sm:$0xff] %v185_v20  ;;  %188 = vst [vmem:[%s151_s20 + $0x8] sm:$0xff] %v186_v21 }
  0x28 PF: > { %s13_s9 = sadd.s32 1, %s309_s9  }
  0x29   : > { %p10_p4 = scmp.ge.s32.totalorder %s13_s9, 4  }
  0x2b   :  { %12 = sbr.rel (!%p10_p4) target bundleno = 1 (0x1), region = 66 }

// kernel: _lambda_.19
= control target key start
LH: loop header
LB: loop body
LE: loop exit
PB: predicated region body
PF: predicated region fallthrough
CT: control target
= control target key end

     0   :  { %10 = vsyncpa [#allocation4], 0  ;;  %s1009_s0 = inlined_call_operand.vmem [shape: f32[2,16,128], index: 0, kind: input, shape index: {}]   ;;  %s1010_s1 = inlined_call_operand.vmem [shape: bf16[128,128], index: 1, kind: input, shape index: {}]   ;;  %s1011_s2 = inlined_call_operand.vmem [shape: bf16[128,128], index: 2, kind: input, shape index: {}]   ;;  %s1012_s3 = inlined_call_operand.vmem [shape: f32[2,16,128], index: 3, kind: output, shape index: {0}]   ;;  %s1013_s4 = inlined_call_operand.hbm [shape: f32[2,16,128], index: 4, kind: output, shape index: {1}]  }
   0x1   :  { %12 = vsyncpa [#allocation4 + $0x1], 0  ;;  %s833_s15 = smov 0   ;;  %s835_s16 = smov 0  }
   0x2   :  { %s837_s17 = smov 0   ;;  %s839_s18 = smov 0  }
   0x3 LB: > { %s854_s19 = sadd.s32 4294967295, %s801_s18   ;;  %s585_s20 = sadd.s32 4294967294, %s801_s18   ;;  %s801_s18 = sphi %s839_s18, %s1019_s18   ;;  %s797_s17 = sphi %s837_s17, %s1018_s17   ;;  %s793_s16 = sphi %s835_s16, %s1017_s16   ;;  %s789_s15 = sphi %s833_s15, %s1016_s15  }
   0x4   : > { %s858_s21 = sadd.s32 1, %s801_s18   ;;  %s119_s22 = sadd.s32 1, %s797_s17 }
   0x5   : > { %s116_s23 = ssub.s32 %s801_s18, %s858_s21  ;;  %p129_p0 = scmp.ne.s32.totalorder %s797_s17, %s793_s16 }
   0x6   : > { %p117_p1 = scmp.eq.s32.totalorder %s116_s23, 0  ;;  %p130_p2 = scmp.eq.s32.totalorder %s854_s19, 1 }
   0x7   : > { %p135_p3 = scmp.ne.s32.totalorder %s793_s16, %s789_s15  ;;  %p136_p4 = scmp.eq.s32.totalorder %s585_s20, 1 }
   0x8   : > { %s869_s24 = scalar_select %p117_p1, %s797_s17, %s119_s22  }
   0x9   : > { %p871_p5 = por %p130_p2, %p129_p0  ;;  %p875_p6 = por %p136_p4, %p135_p3 }
   0xa   : > { %p588_p7 = scmp.ge.s32.totalorder %s801_s18, 1  ;;  %p168_p8 = scmp.lt.s32.totalorder %s801_s18, 3 }
   0xc   : > { %p169_p9 = pnand %p588_p7, %p168_p8 }
   0xd   : > { %v719_v0 = vld [vmem:[%s1010_s1] sm:$0xff] (!%p169_p9)   ;;  %v803_v1 = vmov (!%p169_p9), 0.0   ;;  %v720_v2 = vld [vmem:[%s1010_s1 + $0x8] sm:$0xff] (!%p169_p9)   ;;  %vm804_vm0 = vmmov (!%p169_p9), 0   ;;  %v721_v3 = vld [vmem:[%s1010_s1 + $0x10] sm:$0xff] (!%p169_p9)   ;;  %p199_p10 = scmp.lt.s32.totalorder (!%p169_p9), %s854_s19, 1 }
   0xe   : > { %172 = sbr.rel (%p169_p9) target bundleno = 540 (0x21c), region = 32  ;;  %636 = vmatprep.subr.bf16.mxu0 (!%p169_p9), %v803_v1  ;;  %656 = vmatprep.subr.bf16.mxu1 (!%p169_p9), %v803_v1  ;;  %v722_v4 = vld [vmem:[%s1010_s1 + $0x18] sm:$0xff] (!%p169_p9)   ;;  %v723_v5 = vld [vmem:[%s1010_s1 + $0x20] sm:$0xff] (!%p169_p9)   ;;  %v724_v6 = vld [vmem:[%s1010_s1 + $0x28] sm:$0xff] (!%p169_p9)   ;;  %s196_s6 = sand.u32 (!%p169_p9), 1, %s793_s16  }
   0xf   : > { %637 = vmatpush3.bf16.msra.mxu0 (!%p169_p9), %v719_v0  ;;  %652 = vmatprep.mubr.msk.bf16.mxu0 (!%p169_p9), %vm804_vm0, %v803_v1  ;;  %v725_v7 = vld [vmem:[%s1010_s1 + $0x30] sm:$0xff] (!%p169_p9)   ;;  %v726_v8 = vld [vmem:[%s1010_s1 + $0x38] sm:$0xff] (!%p169_p9)   ;;  %v727_v12 = vld [vmem:[%s1011_s2] sm:$0xff] (!%p169_p9)   ;;  %s589_s7 = sshll.u32 (!%p169_p9), %s196_s6, 4  ;;  %s617_s8 = sshll.u32 (!%p169_p9), %s854_s19, 8 }
  0x10   : > { %638 = vmatprep.subr.bf16.mxu0 (!%p169_p9), %v803_v1  ;;  %672 = vmatprep.mubr.msk.bf16.mxu1 (!%p169_p9), %vm804_vm0, %v803_v1  ;;  %v728_v13 = vld [vmem:[%s1011_s2 + $0x8] sm:$0xff] (!%p169_p9)   ;;  %v729_v14 = vld [vmem:[%s1011_s2 + $0x10] sm:$0xff] (!%p169_p9)   ;;  %v730_v15 = vld [vmem:[%s1011_s2 + $0x18] sm:$0xff] (!%p169_p9)   ;;  %s198_s9 = scalar_lea.vmem (!%p169_p9), [#allocation3], %s589_s7  ;;  %s959_s27 = scalar_lea.hbm (!%p169_p9), %s1013_s4, %s617_s8 }
  0x11   : > { %657 = vmatpush3.bf16.msra.mxu1 (!%p169_p9), %v727_v12  ;;  %v731_v16 = vld [vmem:[%s1011_s2 + $0x20] sm:$0xff] (!%p169_p9)   ;;  %v732_v17 = vld [vmem:[%s1011_s2 + $0x28] sm:$0xff] (!%p169_p9)   ;;  %v733_v18 = vld [vmem:[%s1011_s2 + $0x30] sm:$0xff] (!%p169_p9)   ;;  %s498_s10 = sshll.u32 (!%p169_p9), %s198_s9, 4  ;;  %s961_s10 = int_to_ptr.vmem [resolvable:$true] %s498_s10 }
  0x12   : > { %658 = vmatprep.subr.bf16.mxu1 (!%p169_p9), %v803_v1  ;;  %v734_v19 = vld [vmem:[%s1011_s2 + $0x38] sm:$0xff] (!%p169_p9)  }
  0x13   : > { %639 = vmatpush3.bf16.msra.mxu0 (!%p169_p9), %v720_v2 }
  0x14   : > { %640 = vmatprep.subr.bf16.mxu0 (!%p169_p9), %v803_v1 }
  0x15   : > { %s898_s11 = scalar_select %p199_p10, %s854_s19, 1  ;;  %659 = vmatpush3.bf16.msra.mxu1 %v728_v13 }
  0x16   : > { %660 = vmatprep.subr.bf16.mxu1 %v803_v1  ;;  %s967_s19 = scalar_lea.sflag [#allocation4], %s196_s6 }
  0x17   : > { %641 = vmatpush3.bf16.msra.mxu0 %v721_v3  ;;  %s615_s14 = sshll.u32 %s898_s11, 4  ;;  %s739_s11 = scalar_lea.vmem %s961_s10, 256 }
  0x18   : > { %642 = vmatprep.subr.bf16.mxu0 %v803_v1  ;;  %s203_s28 = scalar_lea.vmem %s1009_s0, %s615_s14  ;;  %s954_s20 = scalar_lea.vmem %s1012_s3, %s615_s14 }
  0x19   : > { %v210_v9 = vld [vmem:[%s203_s28] sm:$0xff]  ;;  %v211_v10 = vld [vmem:[%s203_s28 + $0x8] sm:$0xff]  ;;  %661 = vmatpush3.bf16.msra.mxu1 %v729_v14  ;;  %p740_p11 = scmp.ne.s32.totalorder %s961_s10, %s739_s11  ;;  %s805_s14 = smov [#allocation3]  }
  0x1a   : > { %v212_v11 = vpack.c.bf16 %v211_v10, %v210_v9  ;;  %662 = vmatprep.subr.bf16.mxu1 %v803_v1  ;;  %s743_s28 = sshll.u32 %s805_s14, 4  ;;  %s744_s28 = int_to_ptr.vmem [resolvable:$false] %s743_s28 }
  0x1b   : > { %643 = vmatpush3.bf16.msra.mxu0 %v722_v4  ;;  %p741_p12 = pnand %p740_p11, %p871_p5  ;;  %s745_s29 = scalar_lea.vmem %s744_s28, 512 }
  0x1c   : > { %644 = vmatprep.subr.bf16.mxu0 %v803_v1  ;;  %p746_p0 = scmp.lt.s32.totalorder %s961_s10, %s744_s28  ;;  %p747_p1 = scmp.lt.s32.totalorder %s745_s29, %s739_s11 }
  0x1d   : > { %663 = vmatpush3.bf16.msra.mxu1 %v730_v15  ;;  %p742_p13 = pneg %p741_p12 }
  0x1e   : > { %664 = vmatprep.subr.bf16.mxu1 %v803_v1  ;;  %p748_p2 = por %p747_p1, %p746_p0 }
  0x1f   : > { %645 = vmatpush3.bf16.msra.mxu0 %v723_v5 }
  0x20   : > { %646 = vmatprep.subr.bf16.mxu0 %v803_v1  ;;  %p749_p3 = pnand %p748_p2, %p742_p13 }
  0x21   : > { %665 = vmatpush3.bf16.msra.mxu1 %v731_v16 }
  0x22   : > { %666 = vmatprep.subr.bf16.mxu1 %v803_v1 }
  0x23   : > { %647 = vmatpush3.bf16.msra.mxu0 %v724_v6 }
  0x24   : > { %648 = vmatprep.subr.bf16.mxu0 %v803_v1 }
  0x25   : > { %667 = vmatpush3.bf16.msra.mxu1 %v732_v17 }
  0x26   : > { %668 = vmatprep.subr.bf16.mxu1 %v803_v1 }
  0x27   : > { %649 = vmatpush3.bf16.msra.mxu0 %v725_v7 }
  0x28   : > { %650 = vmatprep.subr.bf16.mxu0 %v803_v1 }
  0x29   : > { %669 = vmatpush3.bf16.msra.mxu1 %v733_v18 }
  0x2a   : > { %670 = vmatprep.subr.bf16.mxu1 %v803_v1 }
  0x2b   : > { %651 = vmatpush3.bf16.msra.mxu0 %v726_v8 }
  0x2d   : > { %671 = vmatpush3.bf16.msra.mxu1 %v734_v19 }
  0x2e   : > { %653 = vmatmul.mubr.bf16.vlgmr.msra.gmra.mrb[0].mxu0 %v212_v11 }
 0x101   : > { %v311_v20 = vpop.f32.mrb[0].mxu0 }
 0x102   : > { %v318_v21 = vmul.f32 %v311_v20, %v311_v20  ;;  %v654_v22 = vpop.f32.mrb[1].mxu0 }
 0x103   : > { %v314_v23 = vpop.f32.mrb[2].mxu0 }
 0x104   : > { %v320_v24 = vmul.f32 %v318_v21, %v311_v20  ;;  %v319_v25 = vmul.f32 %v314_v23, %v314_v23  ;;  %v655_v26 = vpop.f32.mrb[3].mxu0 }
 0x106   : > { %v322_v27 = vmul.f32 0.044715, %v320_v24  ;;  %v321_v28 = vmul.f32 %v319_v25, %v314_v23 }
 0x108   : > { %v324_v29 = vadd.f32 %v322_v27, %v311_v20  ;;  %v323_v30 = vmul.f32 0.044715, %v321_v28 }
 0x10a   : > { %v326_v31 = vmul.f32 0.7978846, %v324_v29  ;;  %v325_v32 = vadd.f32 %v323_v30, %v314_v23 }
 0x10c   : > { %735 = vtanh.f32 %v326_v31  ;;  %v327_v33 = vmul.f32 0.7978846, %v325_v32 }
 0x10e   : > { %737 = vtanh.f32 %v327_v33 }
 0x116   : > { %v736_v34 = vpop.eup %735 }
 0x117   : > { %v330_v35 = vadd.f32 1.0, %v736_v34 }
 0x118   : > { %v738_v36 = vpop.eup %737 }
 0x119   : > { %v332_v37 = vmul.f32 0.5, %v330_v35  ;;  %v331_v38 = vadd.f32 1.0, %v738_v36 }
 0x11b   : > { %v333_v39 = vmul.f32 0.5, %v331_v38  ;;  %v334_v40 = vmul.f32 %v332_v37, %v311_v20 }
 0x11d   : > { %v335_v41 = vmul.f32 %v333_v39, %v314_v23 }
 0x11f   : > { %v336_v42 = vpack.c.bf16 %v335_v41, %v334_v40 }
 0x121   : > { %673 = vmatmul.mubr.bf16.vlgmr.msra.gmra.mrb[0].mxu1 %v336_v42 }
 0x1f4   : > { %v435_v43 = vpop.f32.mrb[0].mxu1 }
 0x1f5   : > { %v442_v44 = vadd.f32 %v435_v43, %v210_v9  ;;  %v674_v45 = vpop.f32.mrb[1].mxu1 }
 0x1f6   : > { %v438_v46 = vpop.f32.mrb[2].mxu1 }
 0x1f7   : > { %444 = vst [vmem:[#allocation2 + $0x2] sm:$0xff] %v442_v44  ;;  %446 = vst [vmem:[#allocation2] sm:$0x1] %v442_v44  ;;  %v939_v47 = vadd.f32 %v438_v46, %v211_v10  ;;  %v675_v48 = vpop.f32.mrb[3].mxu1 }
 0x1f8   : > { %447 = vst [vmem:[#allocation2 + $0x1] sm:$0x1] %v442_v44 }
 0x1f9   : > { %445 = vst [vmem:[#allocation2 + $0xa] sm:$0xff] %v939_v47  ;;  %448 = vst [vmem:[#allocation2 + $0xb] sm:$0x80] %v939_v47 }
 0x1fa   : > { %449 = vst [vmem:[#allocation2 + $0xc] sm:$0x80] %v939_v47 }
 0x1ff   : > { %v450_v49 = vld [vmem:[#allocation2] sm:$0xff] }
 0x200   : > { %v452_v50 = vld [vmem:[#allocation2 + $0x1] sm:$0xff]  ;;  %v453_v53 = vld [vmem:[#allocation2 + $0x9] sm:$0xff] }
 0x201   : > { %v454_v51 = vadd.f32 %v452_v50, %v450_v49  ;;  %v451_v52 = vld [vmem:[#allocation2 + $0x8] sm:$0xff] }
 0x202   : > { %v455_v54 = vadd.f32 %v453_v53, %v451_v52  ;;  %v460_v56 = vld [vmem:[#allocation2 + $0x3] sm:$0xff]  ;;  %v461_v59 = vld [vmem:[#allocation2 + $0xb] sm:$0xff] }
 0x203   : > { %v458_v55 = vadd.f32 %v454_v51, %v442_v44  ;;  %v464_v60 = vld [vmem:[#allocation2 + $0x4] sm:$0xff]  ;;  %v465_v63 = vld [vmem:[#allocation2 + $0xc] sm:$0xff] }
 0x204   : > { %v459_v57 = vadd.f32 %v455_v54, %v939_v47 }
 0x205   : > { %v462_v58 = vadd.f32 %v460_v56, %v458_v55 }
 0x206   : > { %v463_v61 = vadd.f32 %v461_v59, %v459_v57 }
 0x207   : > { %v466_v62 = vadd.f32 %v464_v60, %v462_v58 }
 0x208   : > { %v467_v0 = vadd.f32 %v465_v63, %v463_v61 }
 0x209   : > { %v468_v1 = vmul.f32 0.2, %v466_v62 }
 0x20a   : > { %v469_v2 = vmul.f32 0.2, %v467_v0 }
 0x20b   : > { %v470_v3 = vsub.f32 %v442_v44, %v468_v1  ;;  %474 = vst [vmem:[%s198_s9] sm:$0xff] %v468_v1 }
 0x20c   : > { %v471_v4 = vsub.f32 %v939_v47, %v469_v2  ;;  %475 = vst [vmem:[%s198_s9 + $0x8] sm:$0xff] %v469_v2 }
 0x20d   : > { %472 = vst [vmem:[%s954_s20] sm:$0xff] %v470_v3 }
 0x20e   : > { %752 = shalt.err (!%p749_p3)
}
 0x20f   : > { %s753_s30 = scalar_lea.hbm %s959_s27, 256  ;;  %s757_s7 = scalar_lea.hbm %s1013_s4, 512 }
 0x210   : > { %p754_p4 = scmp.ne.s32.totalorder %s959_s27, %s753_s30  ;;  %p758_p9 = scmp.lt.u32.totalorder %s959_s27, %s1013_s4 }
 0x211   : > { %p759_p10 = scmp.lt.u32.totalorder %s757_s7, %s753_s30  ;;  %p761_p12 = scmp.lt.u32.totalorder %s753_s30, %s959_s27 }
 0x212   : > { %p755_p7 = pnand %p754_p4, %p871_p5 }
 0x213   : > { %p760_p11 = por %p759_p10, %p758_p9 }
 0x214   : > { %p756_p8 = pneg %p755_p7 }
 0x215   : > { %p762_p13 = por %p761_p12, %p760_p11 }
 0x217   : > { %p763_p0 = pnand %p762_p13, %p756_p8 }
 0x219   : > { %766 = shalt.err (!%p763_p0)
}
 0x21a   : > { %s806_s12 = smov 128   ;;  %s807_s13 = smov 8   ;;  %473 = vst [vmem:[%s954_s20 + $0x8] sm:$0xff] %v471_v4 }
 0x21b   : > { %676 = dma.vmem_to_hbm [thread:$0]  (%p871_p5), %s961_s10, 256, %s959_s27, %s967_s19, %s806_s12, %s806_s12, %s807_s13  }
 0x21c PF: > { %p682_p1 = scmp.ge.s32.totalorder %s801_s18, 2  ;;  %s521_s22 = sand.u32 1, %s789_s15  }
 0x21d   : > { %s522_s23 = scalar_lea.sflag [#allocation4], %s521_s22 }
 0x21e   : > { %p679_p2 = pnand %p682_p1, %p875_p6 }
 0x220   : > { %784 = dma.done.wait (!%p679_p2), %s522_s23, 256  }
 0x221   : > { %786 = vsyncadd (!%p679_p2), %s522_s23, 4294967040  ;;  %p15_p3 = scmp.ge.s32.totalorder %s858_s21, 4   ;;  %s1016_s15 = smov %s793_s16 }
 0x222   : > { %s1017_s16 = smov %s797_s17  ;;  %s1018_s17 = smov %s869_s24 }
 0x223   : > { %s1019_s18 = smov %s858_s21  ;;  %17 = sbr.rel (!%p15_p3) target bundleno = 3 (0x3), region = 79 }
 0x22a   :  { %527 = vsyncpa [#allocation4], 1 }
 0x22b   :  { %529 = vsyncpa [#allocation4 + $0x1], 1 }

// kernel: _lambda_.22
= control target key start
LH: loop header
LB: loop body
LE: loop exit
PB: predicated region body
PF: predicated region fallthrough
CT: control target
= control target key end

     0   :  { %s447_s12 = smov 0   ;;  %s494_s0 = inlined_call_operand.vmem [shape: f32[2,24,128], index: 0, kind: input, shape index: {}]   ;;  %s495_s1 = inlined_call_operand.vmem [shape: bf16[128,128], index: 1, kind: input, shape index: {}]   ;;  %s496_s2 = inlined_call_operand.vmem [shape: f32[1,128], index: 2, kind: input, shape index: {}]   ;;  %s497_s3 = inlined_call_operand.vmem [shape: f32[2,24,128], index: 3, kind: output, shape index: {}]  }
   0x1 LB: > { %s354_s13 = sadd.s32 4294967295, %s425_s12   ;;  %p358_p0 = scmp.ge.s32.totalorder %s425_s12, 1  ;;  %s425_s12 = sphi %s447_s12, %s13_s12  }
   0x2   : > { %p137_p1 = scmp.lt.s32.totalorder %s425_s12, 3 }
   0x4   : > { %p138_p2 = pnand %p358_p0, %p137_p1 }
   0x5   : > { %v411_v0 = vld [vmem:[%s495_s1] sm:$0xff] (!%p138_p2)   ;;  %p161_p3 = scmp.lt.s32.totalorder (!%p138_p2), %s354_s13, 1  ;;  %v412_v1 = vld [vmem:[%s495_s1 + $0x8] sm:$0xff] (!%p138_p2)   ;;  %v413_v2 = vld [vmem:[%s495_s1 + $0x10] sm:$0xff] (!%p138_p2)  }
   0x6   : > { %141 = sbr.rel (%p138_p2) target bundleno = 256 (0x100), region = 32  ;;  %382 = vmatprep.subr.bf16.mxu0 (!%p138_p2), %v411_v0  ;;  %v414_v3 = vld [vmem:[%s495_s1 + $0x18] sm:$0xff] (!%p138_p2)   ;;  %v415_v7 = vld [vmem:[%s495_s1 + $0x20] sm:$0xff] (!%p138_p2)   ;;  %v416_v8 = vld [vmem:[%s495_s1 + $0x28] sm:$0xff] (!%p138_p2)  }
   0x7   : > { %383 = vmatpush3.bf16.msra.mxu0 (!%p138_p2), %v411_v0  ;;  %v417_v9 = vld [vmem:[%s495_s1 + $0x30] sm:$0xff] (!%p138_p2)   ;;  %v418_v10 = vld [vmem:[%s495_s1 + $0x38] sm:$0xff] (!%p138_p2)   ;;  %v361_v13 = vld [vmem:[%s496_s2] ss:$0 sm:$0xff] (!%p138_p2) }
   0x8   : > { %384 = vmatprep.subr.bf16.mxu0 (!%p138_p2), %v412_v1 }
   0xb   : > { %385 = vmatpush3.bf16.msra.mxu0 (!%p138_p2), %v412_v1 }
   0xc   : > { %386 = vmatprep.subr.bf16.mxu0 (!%p138_p2), %v413_v2 }
   0xd   : > { %s499_s13 = smov (!%p161_p3, %s354_s13), 1 }
   0xe   : > { %s402_s20 = smul.u32 24, %s499_s13 }
   0xf   : > { %387 = vmatpush3.bf16.msra.mxu0 %v413_v2 }
  0x10   : > { %s165_s23 = scalar_lea.vmem %s494_s0, %s402_s20  ;;  %388 = vmatprep.subr.bf16.mxu0 %v414_v3  ;;  %s170_s11 = scalar_lea.vmem %s497_s3, %s402_s20 }
  0x11   : > { %v172_v4 = vld [vmem:[%s165_s23] sm:$0xff]  ;;  %v173_v5 = vld [vmem:[%s165_s23 + $0x8] sm:$0xff]  ;;  %v174_v11 = vld [vmem:[%s165_s23 + $0x10] sm:$0xff] }
  0x12   : > { %v175_v6 = vpack.c.bf16 %v173_v5, %v172_v4  ;;  %v176_v12 = vpack.c.bf16 %v174_v11, %v174_v11 }
  0x13   : > { %389 = vmatpush3.bf16.msra.mxu0 %v414_v3 }
  0x14   : > { %398 = vmatprep.mubr.bf16.mxu0 %v175_v6  ;;  %390 = vmatprep.subr.bf16.mxu0 %v415_v7 }
  0x17   : > { %391 = vmatpush3.bf16.msra.mxu0 %v415_v7 }
  0x18   : > { %392 = vmatprep.subr.bf16.mxu0 %v416_v8 }
  0x1b   : > { %393 = vmatpush3.bf16.msra.mxu0 %v416_v8 }
  0x1c   : > { %394 = vmatprep.subr.bf16.mxu0 %v417_v9 }
  0x1f   : > { %395 = vmatpush3.bf16.msra.mxu0 %v417_v9 }
  0x20   : > { %396 = vmatprep.subr.bf16.mxu0 %v418_v10 }
  0x23   : > { %397 = vmatpush3.bf16.msra.mxu0 %v418_v10 }
  0x26   : > { %399 = vmatmul.mubr.bf16.vlgmr.msra.gmra.mrb[0].mxu0 %v176_v12 }
  0xf9   : > { %v400_v14 = vpop.f32.mrb[0].mxu0 }
  0xfa   : > { %v291_v15 = vadd.f32 %v400_v14, %v361_v13  ;;  %v282_v16 = vpop.f32.mrb[1].mxu0 }
  0xfb   : > { %v283_v17 = vadd.f32 %v361_v13, %v282_v16  ;;  %v401_v18 = vpop.f32.mrb[2].mxu0 }
  0xfc   : > { %298 = vst [vmem:[%s170_s11 + $0x10] sm:$0xff] %v291_v15  ;;  %v285_v19 = vpop.f32.mrb[3].mxu0 }
  0xfd   : > { %296 = vst [vmem:[%s170_s11] sm:$0xff] %v283_v17  ;;  %v286_v20 = vadd.f32 %v361_v13, %v285_v19 }
  0xff   : > { %297 = vst [vmem:[%s170_s11 + $0x8] sm:$0xff] %v286_v20 }
 0x100 PF: > { %s13_s12 = sadd.s32 1, %s425_s12  }
 0x101   : > { %p10_p4 = scmp.ge.s32.totalorder %s13_s12, 4  }
 0x103   :  { %12 = sbr.rel (!%p10_p4) target bundleno = 1 (0x1), region = 62 }

// kernel: _lambda_.21
= control target key start
LH: loop header
LB: loop body
LE: loop exit
PB: predicated region body
PF: predicated region fallthrough
CT: control target
= control target key end

     0   :  { %s815_s12 = smov 0   ;;  %s912_s0 = inlined_call_operand.vmem [shape: f32[2,24,128], index: 0, kind: input, shape index: {}]   ;;  %s913_s1 = inlined_call_operand.vmem [shape: f32[2,24,128], index: 1, kind: input, shape index: {}]   ;;  %s914_s2 = inlined_call_operand.vmem [shape: bf16[384,128], index: 2, kind: input, shape index: {}]   ;;  %s915_s3 = inlined_call_operand.vmem [shape: f32[2,24,128], index: 3, kind: output, shape index: {}]  }
   0x1 LB: > { %s630_s13 = sadd.s32 4294967295, %s793_s12   ;;  %p634_p0 = scmp.ge.s32.totalorder %s793_s12, 1  ;;  %s793_s12 = sphi %s815_s12, %s13_s12  }
   0x2   : > { %p147_p1 = scmp.lt.s32.totalorder %s793_s12, 3 }
   0x4   : > { %p148_p2 = pnand %p634_p0, %p147_p1 }
   0x5   : > { %v763_v0 = vld [vmem:[%s914_s2 + $0x40] sm:$0xff] (!%p148_p2)   ;;  %p176_p3 = scmp.lt.s32.totalorder (!%p148_p2), %s630_s13, 1  ;;  %v765_v2 = vld [vmem:[%s914_s2 + $0x48] sm:$0xff] (!%p148_p2)   ;;  %v767_v4 = vld [vmem:[%s914_s2 + $0x50] sm:$0xff] (!%p148_p2)  }
   0x6   : > { %151 = sbr.rel (%p148_p2) target bundleno = 290 (0x122), region = 32  ;;  %v764_v1 = vld [vmem:[%s914_s2] sm:$0xff] (!%p148_p2)   ;;  %694 = vmatprep.subr.bf16.mxu0 (!%p148_p2), %v763_v0  ;;  %v766_v3 = vld [vmem:[%s914_s2 + $0x8] sm:$0xff] (!%p148_p2)   ;;  %v768_v5 = vld [vmem:[%s914_s2 + $0x10] sm:$0xff] (!%p148_p2)  }
   0x7   : > { %714 = vmatprep.subr.bf16.mxu1 (!%p148_p2), %v764_v1  ;;  %695 = vmatpush3.bf16.msra.mxu0 (!%p148_p2), %v763_v0  ;;  %v769_v6 = vld [vmem:[%s914_s2 + $0x58] sm:$0xff] (!%p148_p2)   ;;  %v771_v8 = vld [vmem:[%s914_s2 + $0x60] sm:$0xff] (!%p148_p2)   ;;  %v773_v10 = vld [vmem:[%s914_s2 + $0x68] sm:$0xff] (!%p148_p2)  }
   0x8   : > { %715 = vmatpush3.bf16.msra.mxu1 (!%p148_p2), %v764_v1  ;;  %696 = vmatprep.subr.bf16.mxu0 (!%p148_p2), %v765_v2  ;;  %v770_v7 = vld [vmem:[%s914_s2 + $0x18] sm:$0xff] (!%p148_p2)   ;;  %v772_v9 = vld [vmem:[%s914_s2 + $0x20] sm:$0xff] (!%p148_p2)   ;;  %v774_v14 = vld [vmem:[%s914_s2 + $0x28] sm:$0xff] (!%p148_p2)  }
   0x9   : > { %716 = vmatprep.subr.bf16.mxu1 (!%p148_p2), %v766_v3  ;;  %v775_v16 = vld [vmem:[%s914_s2 + $0x70] sm:$0xff] (!%p148_p2)   ;;  %v777_v18 = vld [vmem:[%s914_s2 + $0x78] sm:$0xff] (!%p148_p2)   ;;  %v779_v24 = vld [vmem:[%s914_s2 + $0x80] sm:$0xff] (!%p148_p2)  }
   0xa   : > { %v776_v17 = vld [vmem:[%s914_s2 + $0x30] sm:$0xff] (!%p148_p2)   ;;  %v778_v21 = vld [vmem:[%s914_s2 + $0x38] sm:$0xff] (!%p148_p2)   ;;  %v780_v29 = vld [vmem:[%s914_s2 + $0x88] sm:$0xff] (!%p148_p2)  }
   0xb   : > { %697 = vmatpush3.bf16.msra.mxu0 (!%p148_p2), %v765_v2  ;;  %v781_v31 = vld [vmem:[%s914_s2 + $0x90] sm:$0xff] (!%p148_p2)   ;;  %v782_v32 = vld [vmem:[%s914_s2 + $0x98] sm:$0xff] (!%p148_p2)   ;;  %v783_v33 = vld [vmem:[%s914_s2 + $0xa0] sm:$0xff] (!%p148_p2)  }
   0xc   : > { %717 = vmatpush3.bf16.msra.mxu1 (!%p148_p2), %v766_v3  ;;  %698 = vmatprep.subr.bf16.mxu0 (!%p148_p2), %v767_v4  ;;  %v784_v34 = vld [vmem:[%s914_s2 + $0xa8] sm:$0xff] (!%p148_p2)   ;;  %v785_v35 = vld [vmem:[%s914_s2 + $0xb0] sm:$0xff] (!%p148_p2)   ;;  %v786_v36 = vld [vmem:[%s914_s2 + $0xb8] sm:$0xff] (!%p148_p2)  }
   0xd   : > { %s917_s13 = smov (!%p176_p3, %s630_s13), 1  ;;  %718 = vmatprep.subr.bf16.mxu1 %v768_v5 }
   0xe   : > { %s847_s30 = smul.u32 24, %s917_s13 }
   0xf   : > { %699 = vmatpush3.bf16.msra.mxu0 %v767_v4 }
  0x10   : > { %719 = vmatpush3.bf16.msra.mxu1 %v768_v5  ;;  %700 = vmatprep.subr.bf16.mxu0 %v769_v6  ;;  %s180_s10 = scalar_lea.vmem %s912_s0, %s847_s30  ;;  %s185_s17 = scalar_lea.vmem %s913_s1, %s847_s30 }
  0x11   : > { %720 = vmatprep.subr.bf16.mxu1 %v770_v7  ;;  %v192_v11 = vld [vmem:[%s180_s10] sm:$0xff]  ;;  %v193_v12 = vld [vmem:[%s180_s10 + $0x8] sm:$0xff]  ;;  %v194_v13 = vld [vmem:[%s180_s10 + $0x10] sm:$0xff]  ;;  %s190_s20 = scalar_lea.vmem %s915_s3, %s847_s30 }
  0x12   : > { %243 = vst [vmem:[#allocation2 + $0x1] sm:$0xff] %v192_v11  ;;  %244 = vst [vmem:[#allocation2 + $0x9] sm:$0xff] %v193_v12  ;;  %v256_v15 = vpack.c.bf16 %v193_v12, %v192_v11  ;;  %v257_v27 = vpack.c.bf16 %v194_v13, %v194_v13  ;;  %v556_v51 = vld [vmem:[%s185_s17 + $0x10] sm:$0xff]  ;;  %v554_v54 = vld [vmem:[%s185_s17] sm:$0xff] }
  0x13   : > { %701 = vmatpush3.bf16.msra.mxu0 %v769_v6  ;;  %247 = vst [vmem:[#allocation2 + $0x19] sm:$0x1] %v192_v11  ;;  %245 = vst [vmem:[#allocation2 + $0x11] sm:$0xff] %v194_v13  ;;  %v555_v59 = vld [vmem:[%s185_s17 + $0x8] sm:$0xff] }
  0x14   : > { %721 = vmatpush3.bf16.msra.mxu1 %v770_v7  ;;  %702 = vmatprep.subr.bf16.mxu0 %v771_v8  ;;  %246 = vst [vmem:[#allocation2 - $0x7] sm:$0x80] %v194_v13 }
  0x15   : > { %722 = vmatprep.subr.bf16.mxu1 %v772_v9  ;;  %710 = vmatprep.mubr.bf16.mxu0 %v256_v15 }
  0x17   : > { %703 = vmatpush3.bf16.msra.mxu0 %v771_v8 }
  0x18   : > { %723 = vmatpush3.bf16.msra.mxu1 %v772_v9  ;;  %704 = vmatprep.subr.bf16.mxu0 %v773_v10 }
  0x19   : > { %724 = vmatprep.subr.bf16.mxu1 %v774_v14  ;;  %v249_v20 = vld [vmem:[#allocation2 + $0x8] sm:$0xff] }
  0x1a   : > { %v250_v23 = vld [vmem:[#allocation2 + $0x10] sm:$0xff]  ;;  %v450_v25 = vld [vmem:[#allocation2 + $0x2] sm:$0xff] }
  0x1b   : > { %705 = vmatpush3.bf16.msra.mxu0 %v773_v10  ;;  %v248_v19 = vld [vmem:[#allocation2] sm:$0xff]  ;;  %v451_v26 = vld [vmem:[#allocation2 + $0xa] sm:$0xff]  ;;  %v252_v28 = vpack.c.bf16 %v250_v23, %v250_v23  ;;  %v452_v37 = vld [vmem:[#allocation2 + $0x12] sm:$0xff] }
  0x1c   : > { %725 = vmatpush3.bf16.msra.mxu1 %v774_v14  ;;  %706 = vmatprep.subr.bf16.mxu0 %v775_v16  ;;  %v251_v22 = vpack.c.bf16 %v249_v20, %v248_v19  ;;  %v453_v30 = vpack.c.bf16 %v451_v26, %v450_v25  ;;  %v454_v38 = vpack.c.bf16 %v452_v37, %v452_v37 }
  0x1d   : > { %726 = vmatprep.subr.bf16.mxu1 %v776_v17 }
  0x1e   : > { %730 = vmatprep.mubr.bf16.mxu1 %v251_v22 }
  0x1f   : > { %707 = vmatpush3.bf16.msra.mxu0 %v775_v16 }
  0x20   : > { %727 = vmatpush3.bf16.msra.mxu1 %v776_v17  ;;  %708 = vmatprep.subr.bf16.mxu0 %v777_v18 }
  0x21   : > { %728 = vmatprep.subr.bf16.mxu1 %v778_v21 }
  0x23   : > { %709 = vmatpush3.bf16.msra.mxu0 %v777_v18 }
  0x24   : > { %729 = vmatpush3.bf16.msra.mxu1 %v778_v21  ;;  %734 = vmatprep.subr.bf16.mxu0 %v779_v24 }
  0x26   : > { %711 = vmatmul.mubr.bf16.vlgmr.msra.gmra.mrb[0].mxu0 %v257_v27 }
  0x27   : > { %731 = vmatmul.mubr.bf16.vlgmr.msra.gmra.mrb[0].mxu1 %v252_v28  ;;  %735 = vmatpush3.bf16.msra.mxu0 %v779_v24 }
  0x28   : > { %736 = vmatprep.subr.bf16.mxu0 %v780_v29  ;;  %750 = vmatprep.mubr.bf16.mxu0 %v453_v30 }
  0x2b   : > { %737 = vmatpush3.bf16.msra.mxu0 %v780_v29 }
  0x2c   : > { %738 = vmatprep.subr.bf16.mxu0 %v781_v31 }
  0x2f   : > { %739 = vmatpush3.bf16.msra.mxu0 %v781_v31 }
  0x30   : > { %740 = vmatprep.subr.bf16.mxu0 %v782_v32 }
  0x33   : > { %741 = vmatpush3.bf16.msra.mxu0 %v782_v32 }
  0x34   : > { %742 = vmatprep.subr.bf16.mxu0 %v783_v33 }
  0x37   : > { %743 = vmatpush3.bf16.msra.mxu0 %v783_v33 }
  0x38   : > { %744 = vmatprep.subr.bf16.mxu0 %v784_v34 }
  0x3b   : > { %745 = vmatpush3.bf16.msra.mxu0 %v784_v34 }
  0x3c   : > { %746 = vmatprep.subr.bf16.mxu0 %v785_v35 }
  0x3f   : > { %747 = vmatpush3.bf16.msra.mxu0 %v785_v35 }
  0x40   : > { %748 = vmatprep.subr.bf16.mxu0 %v786_v36 }
  0x43   : > { %749 = vmatpush3.bf16.msra.mxu0 %v786_v36 }
  0x46   : > { %751 = vmatmul.mubr.bf16.vlgmr.msra.gmra.mrb[4].mxu0 %v454_v38 }
  0xf9   : > { %v712_v39 = vpop.f32.mrb[0].mxu0 }
  0xfa   : > { %v732_v40 = vpop.f32.mrb[0].mxu1  ;;  %v340_v41 = vpop.f32.mrb[1].mxu0 }
  0xfb   : > { %v445_v42 = vadd.f32 %v732_v40, %v712_v39  ;;  %v436_v43 = vpop.f32.mrb[1].mxu1  ;;  %v713_v44 = vpop.f32.mrb[2].mxu0 }
  0xfc   : > { %v437_v45 = vadd.f32 %v436_v43, %v340_v41  ;;  %v733_v46 = vpop.f32.mrb[2].mxu1  ;;  %v343_v47 = vpop.f32.mrb[3].mxu0 }
  0xfd   : > { %v439_v48 = vpop.f32.mrb[3].mxu1 }
  0xfe   : > { %v440_v49 = vadd.f32 %v439_v48, %v343_v47 }
 0x119   : > { %v752_v50 = vpop.f32.mrb[4].mxu0 }
 0x11a   : > { %v553_v52 = vadd.f32 %v752_v50, %v445_v42  ;;  %v537_v53 = vpop.f32.mrb[5].mxu0 }
 0x11b   : > { %v551_v55 = vadd.f32 %v537_v53, %v437_v45  ;;  %v753_v56 = vpop.f32.mrb[6].mxu0 }
 0x11c   : > { %v559_v57 = vadd.f32 %v556_v51, %v553_v52  ;;  %v540_v58 = vpop.f32.mrb[7].mxu0 }
 0x11d   : > { %v557_v60 = vadd.f32 %v554_v54, %v551_v55  ;;  %v552_v61 = vadd.f32 %v540_v58, %v440_v49 }
 0x11e   : > { %562 = vst [vmem:[%s190_s20 + $0x10] sm:$0xff] %v559_v57 }
 0x11f   : > { %560 = vst [vmem:[%s190_s20] sm:$0xff] %v557_v60  ;;  %v558_v62 = vadd.f32 %v555_v59, %v552_v61 }
 0x121   : > { %561 = vst [vmem:[%s190_s20 + $0x8] sm:$0xff] %v558_v62 }
 0x122 PF: > { %s13_s12 = sadd.s32 1, %s793_s12  }
 0x123   : > { %p10_p4 = scmp.ge.s32.totalorder %s13_s12, 4  }
 0x125   :  { %12 = sbr.rel (!%p10_p4) target bundleno = 1 (0x1), region = 65 }

// kernel: _lambda_.23
= control target key start
LH: loop header
LB: loop body
LE: loop exit
PB: predicated region body
PF: predicated region fallthrough
CT: control target
= control target key end

     0   :  { %s571_s18 = smov 0   ;;  %s609_s0 = inlined_call_operand.vmem [shape: f32[2,24,32], index: 0, kind: input, shape index: {}]   ;;  %s610_s1 = inlined_call_operand.vmem [shape: f32[2,24,128], index: 1, kind: input, shape index: {}]   ;;  %s611_s2 = inlined_call_operand.vmem [shape: bf16[32,128], index: 2, kind: input, shape index: {}]   ;;  %s612_s3 = inlined_call_operand.vmem [shape: f32[1,128], index: 3, kind: input, shape index: {}]   ;;  %s613_s4 = inlined_call_operand.vmem [shape: f32[2,24,128], index: 4, kind: output, shape index: {0}]   ;;  %s614_s5 = inlined_call_operand.vmem [shape: f32[2,24,128], index: 5, kind: output, shape index: {1}]  }
   0x1 LB: > { %s494_s19 = sadd.s32 4294967295, %s539_s18   ;;  %p498_p0 = scmp.ge.s32.totalorder %s539_s18, 1  ;;  %s539_s18 = sphi %s571_s18, %s16_s18  }
   0x2   : > { %p200_p1 = scmp.lt.s32.totalorder %s539_s18, 3 }
   0x4   : > { %p201_p2 = pnand %p498_p0, %p200_p1 }
   0x5   : > { %v531_v0 = vld [vmem:[%s611_s2] sm:$0xff] (!%p201_p2)   ;;  %p238_p3 = scmp.lt.s32.totalorder (!%p201_p2), %s494_s19, 1  ;;  %v532_v1 = vld [vmem:[%s611_s2 + $0x8] sm:$0xff] (!%p201_p2)   ;;  %vm287_vm0 = vcmask (!%p201_p2), 261120  }
   0x6   : > { %204 = sbr.rel (%p201_p2) target bundleno = 263 (0x107), region = 36  ;;  %514 = vmatprep.subr.bf16.mxu0 (!%p201_p2), %v531_v0  ;;  %v503_v7 = vld [vmem:[%s612_s3] ss:$0 sm:$0xff] (!%p201_p2) }
   0x7   : > { %515 = vmatpush3.bf16.msra.mxu0 (!%p201_p2), %v531_v0 }
   0x8   : > { %516 = vmatprep.subr.bf16.mxu0 (!%p201_p2), %v532_v1 }
   0xb   : > { %517 = vmatpush3.bf16.msra.mxu0 (!%p201_p2), %v532_v1 }
   0xd   : > { %s616_s19 = smov (!%p238_p3, %s494_s19), 1 }
   0xe   : > { %s585_s24 = smul.u32 24, %s616_s19 }
  0x10   : > { %s242_s27 = scalar_lea.vmem %s609_s0, %s585_s24  ;;  %s247_s30 = scalar_lea.vmem %s610_s1, %s585_s24 }
  0x11   : > { %v259_v2 = vld [vmem:[%s242_s27] sm:$0xff]  ;;  %v260_v3 = vld [vmem:[%s242_s27 + $0x8] sm:$0xff]  ;;  %v261_v4 = vld [vmem:[%s242_s27 + $0x10] sm:$0xff]  ;;  %s257_s10 = scalar_lea.vmem %s614_s5, %s585_s24  ;;  %s252_s13 = scalar_lea.vmem %s613_s4, %s585_s24 }
  0x12   : > { %v262_v5 = vpack.c.bf16 %v260_v3, %v259_v2  ;;  %v263_v6 = vpack.c.bf16 %v261_v4, %v261_v4  ;;  %v344_v9 = vld [vmem:[%s247_s30 + $0x10] sm:$0xff]  ;;  %v342_v12 = vld [vmem:[%s247_s30] sm:$0xff]  ;;  %v343_v17 = vld [vmem:[%s247_s30 + $0x8] sm:$0xff] }
  0x14   : > { %518 = vmatprep.mubr.msk.bf16.mxu0 %vm287_vm0, %v262_v5 }
  0x15   : > { %519 = vmatmul.mubr.msk.bf16.vlgmr.msra.gmra.mrb[0].mxu0 %vm287_vm0, %v263_v6 }
  0xe8   : > { %v520_v8 = vpop.f32.mrb[0].mxu0 }
  0xe9   : > { %v337_v10 = vadd.f32 %v520_v8, %v503_v7  ;;  %v328_v11 = vpop.f32.mrb[1].mxu0 }
  0xea   : > { %v329_v13 = vadd.f32 %v503_v7, %v328_v11  ;;  %v521_v14 = vpop.f32.mrb[2].mxu0 }
  0xeb   : > { %v347_v15 = vadd.f32 %v344_v9, %v337_v10  ;;  %v331_v16 = vpop.f32.mrb[3].mxu0 }
  0xec   : > { %v345_v18 = vadd.f32 %v342_v12, %v329_v13  ;;  %v332_v19 = vadd.f32 %v503_v7, %v331_v16 }
  0xed   : > { %350 = vst [vmem:[#allocation2 + $0x12] sm:$0xff] %v347_v15  ;;  %353 = vst [vmem:[#allocation2 + $0x13] sm:$0x80] %v347_v15 }
  0xee   : > { %354 = vst [vmem:[#allocation2 + $0x14] sm:$0x80] %v347_v15  ;;  %348 = vst [vmem:[#allocation2 + $0x2] sm:$0xff] %v345_v18  ;;  %v346_v20 = vadd.f32 %v343_v17, %v332_v19 }
  0xef   : > { %351 = vst [vmem:[#allocation2] sm:$0x1] %v345_v18  ;;  %352 = vst [vmem:[#allocation2 + $0x1] sm:$0x1] %v345_v18 }
  0xf0   : > { %349 = vst [vmem:[#allocation2 + $0xa] sm:$0xff] %v346_v20 }
  0xf4   : > { %v372_v37 = vld [vmem:[#allocation2 + $0x13] sm:$0xff] }
  0xf5   : > { %v378_v42 = vld [vmem:[#allocation2 + $0x14] sm:$0xff] }
  0xf6   : > { %v355_v21 = vld [vmem:[#allocation2] sm:$0xff] }
  0xf7   : > { %v358_v22 = vld [vmem:[#allocation2 + $0x1] sm:$0xff]  ;;  %v357_v25 = vld [vmem:[#allocation2 + $0x10] sm:$0xff] }
  0xf8   : > { %v361_v23 = vadd.f32 %v358_v22, %v355_v21  ;;  %v356_v24 = vld [vmem:[#allocation2 + $0x8] sm:$0xff]  ;;  %v360_v27 = vld [vmem:[#allocation2 + $0x11] sm:$0xff] }
  0xf9   : > { %v359_v26 = vld [vmem:[#allocation2 + $0x9] sm:$0xff]  ;;  %v363_v30 = vadd.f32 %v360_v27, %v357_v25 }
  0xfa   : > { %v362_v28 = vadd.f32 %v359_v26, %v356_v24  ;;  %v367_v29 = vadd.f32 %v361_v23, %v345_v18  ;;  %v370_v31 = vld [vmem:[#allocation2 + $0x3] sm:$0xff]  ;;  %v371_v35 = vld [vmem:[#allocation2 + $0xb] sm:$0xff] }
  0xfb   : > { %v369_v34 = vadd.f32 %v363_v30, %v347_v15  ;;  %v376_v36 = vld [vmem:[#allocation2 + $0x4] sm:$0xff]  ;;  %v377_v41 = vld [vmem:[#allocation2 + $0xc] sm:$0xff] }
  0xfc   : > { %v368_v32 = vadd.f32 %v362_v28, %v346_v20  ;;  %v373_v33 = vadd.f32 %v370_v31, %v367_v29 }
  0xfd   : > { %v375_v40 = vadd.f32 %v372_v37, %v369_v34 }
  0xfe   : > { %v374_v38 = vadd.f32 %v371_v35, %v368_v32  ;;  %v379_v39 = vadd.f32 %v376_v36, %v373_v33 }
  0xff   : > { %v381_v45 = vadd.f32 %v378_v42, %v375_v40 }
 0x100   : > { %v380_v43 = vadd.f32 %v377_v41, %v374_v38  ;;  %v382_v44 = vmul.f32 0.2, %v379_v39 }
 0x101   : > { %v384_v48 = vmul.f32 0.2, %v381_v45 }
 0x102   : > { %v383_v46 = vmul.f32 0.2, %v380_v43  ;;  %v385_v47 = vsub.f32 %v345_v18, %v382_v44  ;;  %391 = vst [vmem:[%s257_s10] sm:$0xff] %v382_v44 }
 0x103   : > { %v387_v50 = vsub.f32 %v347_v15, %v384_v48  ;;  %393 = vst [vmem:[%s257_s10 + $0x10] sm:$0xff] %v384_v48 }
 0x104   : > { %v386_v49 = vsub.f32 %v346_v20, %v383_v46  ;;  %388 = vst [vmem:[%s252_s13] sm:$0xff] %v385_v47  ;;  %392 = vst [vmem:[%s257_s10 + $0x8] sm:$0xff] %v383_v46 }
 0x105   : > { %390 = vst [vmem:[%s252_s13 + $0x10] sm:$0xff] %v387_v50 }
 0x106   : > { %389 = vst [vmem:[%s252_s13 + $0x8] sm:$0xff] %v386_v49 }
 0x107 PF: > { %s16_s18 = sadd.s32 1, %s539_s18  }
 0x108   : > { %p13_p4 = scmp.ge.s32.totalorder %s16_s18, 4  }
 0x10a   :  { %15 = sbr.rel (!%p13_p4) target bundleno = 1 (0x1), region = 81 }

// kernel: _lambda_.29
= control target key start
LH: loop header
LB: loop body
LE: loop exit
PB: predicated region body
PF: predicated region fallthrough
CT: control target
= control target key end

     0   :  { %s664_s21 = smov 0   ;;  %s728_s0 = inlined_call_operand.vmem [shape: f32[2,24,128], index: 0, kind: input, shape index: {}]   ;;  %s729_s1 = inlined_call_operand.vmem [shape: f32[2,24,128], index: 1, kind: input, shape index: {}]   ;;  %s730_s2 = inlined_call_operand.vmem [shape: f32[1,1,128], index: 2, kind: input, shape index: {}]   ;;  %s731_s3 = inlined_call_operand.vmem [shape: f32[1,1,128], index: 3, kind: input, shape index: {}]   ;;  %s732_s4 = inlined_call_operand.vmem [shape: bf16[128,128], index: 4, kind: input, shape index: {}]   ;;  %s733_s5 = inlined_call_operand.vmem [shape: f32[1,128], index: 5, kind: input, shape index: {}]   ;;  %s734_s6 = inlined_call_operand.vmem [shape: f32[2,24,128], index: 6, kind: output, shape index: {}]  }
   0x1 LB: > { %s547_s22 = sadd.s32 4294967295, %s627_s21   ;;  %p551_p0 = scmp.ge.s32.totalorder %s627_s21, 1  ;;  %s627_s21 = sphi %s664_s21, %s16_s21  }
   0x2   : > { %p222_p1 = scmp.lt.s32.totalorder %s627_s21, 3 }
   0x4   : > { %p223_p2 = pnand %p551_p0, %p222_p1 }
   0x5   : > { %p257_p3 = scmp.lt.s32.totalorder (!%p223_p2), %s547_s22, 1  ;;  %vm278_vm0 = vcmask (!%p223_p2), 261120   ;;  %v607_v21 = vld [vmem:[%s732_s4] sm:$0xff] (!%p223_p2)   ;;  %v608_v22 = vld [vmem:[%s732_s4 + $0x8] sm:$0xff] (!%p223_p2)   ;;  %v609_v23 = vld [vmem:[%s732_s4 + $0x10] sm:$0xff] (!%p223_p2)  }
   0x6   : > { %226 = sbr.rel (%p223_p2) target bundleno = 579 (0x243), region = 44  ;;  %578 = vmatprep.subr.bf16.mxu0 (!%p223_p2), %v607_v21  ;;  %v610_v24 = vld [vmem:[%s732_s4 + $0x18] sm:$0xff] (!%p223_p2)   ;;  %v611_v25 = vld [vmem:[%s732_s4 + $0x20] sm:$0xff] (!%p223_p2)   ;;  %v612_v26 = vld [vmem:[%s732_s4 + $0x28] sm:$0xff] (!%p223_p2)  }
   0x7   : > { %579 = vmatpush3.bf16.msra.mxu0 (!%p223_p2), %v607_v21  ;;  %v613_v27 = vld [vmem:[%s732_s4 + $0x30] sm:$0xff] (!%p223_p2)   ;;  %v614_v28 = vld [vmem:[%s732_s4 + $0x38] sm:$0xff] (!%p223_p2)   ;;  %v555_v40 = vld [vmem:[%s730_s2] ss:$0 sm:$0xff] (!%p223_p2) }
   0x8   : > { %580 = vmatprep.subr.bf16.mxu0 (!%p223_p2), %v608_v22  ;;  %v556_v46 = vld [vmem:[%s731_s3] ss:$0 sm:$0xff] (!%p223_p2) }
   0xb   : > { %581 = vmatpush3.bf16.msra.mxu0 (!%p223_p2), %v608_v22 }
   0xc   : > { %582 = vmatprep.subr.bf16.mxu0 (!%p223_p2), %v609_v23 }
   0xd   : > { %s736_s22 = smov (!%p257_p3, %s547_s22), 1 }
   0xe   : > { %s672_s23 = smul.u32 24, %s736_s22 }
   0xf   : > { %583 = vmatpush3.bf16.msra.mxu0 %v609_v23 }
  0x10   : > { %s261_s26 = scalar_lea.vmem %s728_s0, %s672_s23  ;;  %584 = vmatprep.subr.bf16.mxu0 %v610_v24  ;;  %s266_s27 = scalar_lea.vmem %s729_s1, %s672_s23 }
  0x11   : > { %v273_v0 = vld [vmem:[%s261_s26] sm:$0xff]  ;;  %v275_v1 = vld [vmem:[%s261_s26 + $0x10] sm:$0xff]  ;;  %v274_v2 = vld [vmem:[%s261_s26 + $0x8] sm:$0xff]  ;;  %s271_s8 = scalar_lea.vmem %s734_s6, %s672_s23 }
  0x12   : > { %v279_v3 = vsel %vm278_vm0, %v273_v0, 0.0  ;;  %v285_v4 = vsel %vm278_vm0, %v275_v1, 0.0  ;;  %v282_v5 = vsel %vm278_vm0, %v274_v2, 0.0 }
  0x13   : > { %280 = vadd.xlane.f32.xlu0 %v279_v3  ;;  %286 = vadd.xlane.f32.xlu1 %v285_v4  ;;  %v473_v4 = vld [vmem:[%s266_s27 + $0x10] sm:$0xff] }
  0x14   : > { %585 = vmatpush3.bf16.msra.mxu0 %v610_v24 }
  0x15   : > { %586 = vmatprep.subr.bf16.mxu0 %v611_v25 }
  0x17   : > { %283 = vadd.xlane.f32.xlu0 %v282_v5 }
  0x18   : > { %587 = vmatpush3.bf16.msra.mxu0 %v611_v25 }
  0x19   : > { %588 = vmatprep.subr.bf16.mxu0 %v612_v26 }
  0x1c   : > { %589 = vmatpush3.bf16.msra.mxu0 %v612_v26 }
  0x1d   : > { %590 = vmatprep.subr.bf16.mxu0 %v613_v27 }
  0x20   : > { %591 = vmatpush3.bf16.msra.mxu0 %v613_v27 }
  0x21   : > { %592 = vmatprep.subr.bf16.mxu0 %v614_v28 }
  0x24   : > { %593 = vmatpush3.bf16.msra.mxu0 %v614_v28 }
  0xa0   : > { %v281_v6 = vpop.xlane.xlu0 %280  ;;  %v287_v7 = vpop.xlane.xlu1 %286 }
  0xa1   : > { %v289_v8 = vmul.f32 0.03125, %v281_v6  ;;  %v291_v9 = vmul.f32 0.03125, %v287_v7  ;;  %v471_v7 = vld [vmem:[%s266_s27] sm:$0xff] }
  0xa3   : > { %v292_v10 = vsub.f32 %v273_v0, %v289_v8  ;;  %v294_v11 = vsub.f32 %v275_v1, %v291_v9 }
  0xa4   : > { %v284_v12 = vpop.xlane.xlu0 %283 }
  0xa5   : > { %v290_v13 = vmul.f32 0.03125, %v284_v12  ;;  %v295_v14 = vmul.f32 %v292_v10, %v292_v10  ;;  %v297_v15 = vmul.f32 %v294_v11, %v294_v11  ;;  %v472_v12 = vld [vmem:[%s266_s27 + $0x8] sm:$0xff] }
  0xa7   : > { %v293_v16 = vsub.f32 %v274_v2, %v290_v13  ;;  %v298_v17 = vsel %vm278_vm0, %v295_v14, 0.0  ;;  %v304_v18 = vsel %vm278_vm0, %v297_v15, 0.0  ;;  %v557_v2 = vld [vmem:[%s733_s5] ss:$0 sm:$0xff] }
  0xa8   : > { %299 = vadd.xlane.f32.xlu1 %v298_v17 }
  0xa9   : > { %v296_v19 = vmul.f32 %v293_v16, %v293_v16 }
  0xab   : > { %v301_v20 = vsel %vm278_vm0, %v296_v19, 0.0 }
  0xac   : > { %305 = vadd.xlane.f32.xlu1 %v304_v18  ;;  %302 = vadd.xlane.f32.xlu0 %v301_v20 }
 0x135   : > { %v300_v29 = vpop.xlane.xlu1 %299 }
 0x136   : > { %v307_v30 = vmul.f32 0.03125, %v300_v29 }
 0x138   : > { %v310_v31 = vadd.f32 1e-05, %v307_v30 }
 0x139   : > { %v306_v32 = vpop.xlane.xlu1 %305  ;;  %v303_v33 = vpop.xlane.xlu0 %302 }
 0x13a   : > { %615 = vrsqrt.f32 %v310_v31  ;;  %v309_v34 = vmul.f32 0.03125, %v306_v32  ;;  %v308_v35 = vmul.f32 0.03125, %v303_v33 }
 0x13c   : > { %v312_v36 = vadd.f32 1e-05, %v309_v34  ;;  %v311_v37 = vadd.f32 1e-05, %v308_v35 }
 0x13e   : > { %617 = vrsqrt.f32 %v312_v36 }
 0x13f   : > { %619 = vrsqrt.f32 %v311_v37 }
 0x144   : > { %v616_v38 = vpop.eup %615 }
 0x145   : > { %v316_v39 = vmul.f32 %v616_v38, %v292_v10 }
 0x147   : > { %v325_v45 = vmul.f32 %v555_v40, %v316_v39 }
 0x148   : > { %v618_v41 = vpop.eup %617 }
 0x149   : > { %v620_v42 = vpop.eup %619  ;;  %v318_v43 = vmul.f32 %v618_v41, %v294_v11  ;;  %v334_v49 = vadd.f32 %v556_v46, %v325_v45 }
 0x14a   : > { %v317_v44 = vmul.f32 %v620_v42, %v293_v16 }
 0x14b   : > { %v327_v48 = vmul.f32 %v555_v40, %v318_v43 }
 0x14c   : > { %v326_v47 = vmul.f32 %v555_v40, %v317_v44 }
 0x14d   : > { %v336_v51 = vadd.f32 %v556_v46, %v327_v48 }
 0x14e   : > { %v335_v50 = vadd.f32 %v556_v46, %v326_v47 }
 0x150   : > { %v337_v52 = vadd.f32 %v335_v50, %v334_v49 }
 0x152   : > { %v338_v53 = vadd.f32 %v337_v52, %v336_v51 }
 0x154   : > { %v339_v54 = vrot.slane %v338_v53, 4 }
 0x156   : > { %v340_v55 = vadd.f32 %v339_v54, %v338_v53 }
 0x158   : > { %v341_v56 = vrot.slane %v340_v55, 2 }
 0x15a   : > { %v342_v57 = vadd.f32 %v341_v56, %v340_v55 }
 0x15c   : > { %v343_v58 = vrot.slane %v342_v57, 1 }
 0x15e   : > { %v344_v59 = vadd.f32 %v343_v58, %v342_v57 }
 0x160   : > { %v346_v60 = vmul.f32 0.041666668, %v344_v59 }
 0x162   : > { %v347_v61 = vsub.f32 %v334_v49, %v346_v60  ;;  %v348_v62 = vsub.f32 %v335_v50, %v346_v60  ;;  %v349_v63 = vsub.f32 %v336_v51, %v346_v60 }
 0x164   : > { %v350_v0 = vpack.c.bf16 %v348_v62, %v347_v61  ;;  %v351_v1 = vpack.c.bf16 %v349_v63, %v349_v63 }
 0x166   : > { %594 = vmatprep.mubr.bf16.mxu0 %v350_v0 }
 0x167   : > { %595 = vmatmul.mubr.bf16.vlgmr.msra.gmra.mrb[0].mxu0 %v351_v1 }
 0x23a   : > { %v596_v3 = vpop.f32.mrb[0].mxu0 }
 0x23b   : > { %v466_v5 = vadd.f32 %v596_v3, %v557_v2  ;;  %v457_v6 = vpop.f32.mrb[1].mxu0 }
 0x23c   : > { %v458_v8 = vadd.f32 %v557_v2, %v457_v6  ;;  %v597_v9 = vpop.f32.mrb[2].mxu0 }
 0x23d   : > { %v476_v10 = vadd.f32 %v473_v4, %v466_v5  ;;  %v460_v11 = vpop.f32.mrb[3].mxu0 }
 0x23e   : > { %v474_v13 = vadd.f32 %v471_v7, %v458_v8  ;;  %v461_v14 = vadd.f32 %v557_v2, %v460_v11 }
 0x23f   : > { %479 = vst [vmem:[%s271_s8 + $0x10] sm:$0xff] %v476_v10 }
 0x240   : > { %477 = vst [vmem:[%s271_s8] sm:$0xff] %v474_v13  ;;  %v475_v15 = vadd.f32 %v472_v12, %v461_v14 }
 0x242   : > { %478 = vst [vmem:[%s271_s8 + $0x8] sm:$0xff] %v475_v15 }
 0x243 PF: > { %s16_s21 = sadd.s32 1, %s627_s21  }
 0x244   : > { %p13_p4 = scmp.ge.s32.totalorder %s16_s21, 4  }
 0x246   :  { %15 = sbr.rel (!%p13_p4) target bundleno = 1 (0x1), region = 77 }

// kernel: _lambda_.27
= control target key start
LH: loop header
LB: loop body
LE: loop exit
PB: predicated region body
PF: predicated region fallthrough
CT: control target
= control target key end

     0   :  { %s757_s15 = smov 0   ;;  %s843_s0 = inlined_call_operand.vmem [shape: f32[2,24,128], index: 0, kind: input, shape index: {}]   ;;  %s844_s1 = inlined_call_operand.vmem [shape: bf16[128,128], index: 1, kind: input, shape index: {}]   ;;  %s845_s2 = inlined_call_operand.vmem [shape: bf16[128,128], index: 2, kind: input, shape index: {}]   ;;  %s846_s3 = inlined_call_operand.vmem [shape: f32[2,24,128], index: 3, kind: output, shape index: {0}]   ;;  %s847_s4 = inlined_call_operand.vmem [shape: f32[2,24,128], index: 4, kind: output, shape index: {1}]  }
   0x1 LB: > { %s607_s16 = sadd.s32 4294967295, %s730_s15   ;;  %p611_p0 = scmp.ge.s32.totalorder %s730_s15, 1  ;;  %s730_s15 = sphi %s757_s15, %s15_s15  }
   0x2   : > { %p165_p1 = scmp.lt.s32.totalorder %s730_s15, 3 }
   0x4   : > { %p166_p2 = pnand %p611_p0, %p165_p1 }
   0x5   : > { %v702_v0 = vld [vmem:[%s844_s1] sm:$0xff] (!%p166_p2)   ;;  %p196_p3 = scmp.lt.s32.totalorder (!%p166_p2), %s607_s16, 1  ;;  %v703_v1 = vld [vmem:[%s844_s1 + $0x8] sm:$0xff] (!%p166_p2)   ;;  %v704_v2 = vld [vmem:[%s844_s1 + $0x10] sm:$0xff] (!%p166_p2)  }
   0x6   : > { %169 = sbr.rel (%p166_p2) target bundleno = 523 (0x20b), region = 32  ;;  %653 = vmatprep.subr.bf16.mxu0 (!%p166_p2), %v702_v0  ;;  %v705_v3 = vld [vmem:[%s844_s1 + $0x18] sm:$0xff] (!%p166_p2)   ;;  %v706_v7 = vld [vmem:[%s844_s1 + $0x20] sm:$0xff] (!%p166_p2)   ;;  %v707_v8 = vld [vmem:[%s844_s1 + $0x28] sm:$0xff] (!%p166_p2)  }
   0x7   : > { %654 = vmatpush3.bf16.msra.mxu0 (!%p166_p2), %v702_v0  ;;  %v708_v9 = vld [vmem:[%s844_s1 + $0x30] sm:$0xff] (!%p166_p2)   ;;  %v709_v10 = vld [vmem:[%s844_s1 + $0x38] sm:$0xff] (!%p166_p2)   ;;  %v710_v13 = vld [vmem:[%s845_s2] sm:$0xff] (!%p166_p2)  }
   0x8   : > { %655 = vmatprep.subr.bf16.mxu0 (!%p166_p2), %v703_v1  ;;  %673 = vmatprep.subr.bf16.mxu1 (!%p166_p2), %v710_v13  ;;  %v711_v14 = vld [vmem:[%s845_s2 + $0x8] sm:$0xff] (!%p166_p2)   ;;  %v712_v15 = vld [vmem:[%s845_s2 + $0x10] sm:$0xff] (!%p166_p2)   ;;  %v713_v16 = vld [vmem:[%s845_s2 + $0x18] sm:$0xff] (!%p166_p2)  }
   0x9   : > { %674 = vmatpush3.bf16.msra.mxu1 (!%p166_p2), %v710_v13  ;;  %v714_v17 = vld [vmem:[%s845_s2 + $0x20] sm:$0xff] (!%p166_p2)   ;;  %v715_v18 = vld [vmem:[%s845_s2 + $0x28] sm:$0xff] (!%p166_p2)   ;;  %v716_v19 = vld [vmem:[%s845_s2 + $0x30] sm:$0xff] (!%p166_p2)  }
   0xa   : > { %675 = vmatprep.subr.bf16.mxu1 (!%p166_p2), %v711_v14  ;;  %v717_v20 = vld [vmem:[%s845_s2 + $0x38] sm:$0xff] (!%p166_p2)  }
   0xb   : > { %656 = vmatpush3.bf16.msra.mxu0 (!%p166_p2), %v703_v1 }
   0xc   : > { %657 = vmatprep.subr.bf16.mxu0 (!%p166_p2), %v704_v2 }
   0xd   : > { %s849_s16 = smov (!%p196_p3, %s607_s16), 1  ;;  %676 = vmatpush3.bf16.msra.mxu1 %v711_v14 }
   0xe   : > { %s774_s23 = smul.u32 24, %s849_s16  ;;  %677 = vmatprep.subr.bf16.mxu1 %v712_v15 }
   0xf   : > { %658 = vmatpush3.bf16.msra.mxu0 %v704_v2 }
  0x10   : > { %s200_s26 = scalar_lea.vmem %s843_s0, %s774_s23  ;;  %659 = vmatprep.subr.bf16.mxu0 %v705_v3  ;;  %s210_s5 = scalar_lea.vmem %s847_s4, %s774_s23 }
  0x11   : > { %v783_v4 = vld [vmem:[%s200_s26] sm:$0xff]  ;;  %v785_v5 = vld [vmem:[%s200_s26 + $0x8] sm:$0xff]  ;;  %v801_v11 = vld [vmem:[%s200_s26 + $0x10] sm:$0xff]  ;;  %678 = vmatpush3.bf16.msra.mxu1 %v712_v15  ;;  %s205_s8 = scalar_lea.vmem %s846_s3, %s774_s23 }
  0x12   : > { %v215_v6 = vpack.c.bf16 %v785_v5, %v783_v4  ;;  %v216_v12 = vpack.c.bf16 %v801_v11, %v801_v11  ;;  %679 = vmatprep.subr.bf16.mxu1 %v713_v16 }
  0x13   : > { %660 = vmatpush3.bf16.msra.mxu0 %v705_v3 }
  0x14   : > { %669 = vmatprep.mubr.bf16.mxu0 %v215_v6  ;;  %661 = vmatprep.subr.bf16.mxu0 %v706_v7 }
  0x15   : > { %680 = vmatpush3.bf16.msra.mxu1 %v713_v16 }
  0x16   : > { %681 = vmatprep.subr.bf16.mxu1 %v714_v17 }
  0x17   : > { %662 = vmatpush3.bf16.msra.mxu0 %v706_v7 }
  0x18   : > { %663 = vmatprep.subr.bf16.mxu0 %v707_v8 }
  0x19   : > { %682 = vmatpush3.bf16.msra.mxu1 %v714_v17 }
  0x1a   : > { %683 = vmatprep.subr.bf16.mxu1 %v715_v18 }
  0x1b   : > { %664 = vmatpush3.bf16.msra.mxu0 %v707_v8 }
  0x1c   : > { %665 = vmatprep.subr.bf16.mxu0 %v708_v9 }
  0x1d   : > { %684 = vmatpush3.bf16.msra.mxu1 %v715_v18 }
  0x1e   : > { %685 = vmatprep.subr.bf16.mxu1 %v716_v19 }
  0x1f   : > { %666 = vmatpush3.bf16.msra.mxu0 %v708_v9 }
  0x20   : > { %667 = vmatprep.subr.bf16.mxu0 %v709_v10 }
  0x21   : > { %686 = vmatpush3.bf16.msra.mxu1 %v716_v19 }
  0x22   : > { %687 = vmatprep.subr.bf16.mxu1 %v717_v20 }
  0x23   : > { %668 = vmatpush3.bf16.msra.mxu0 %v709_v10 }
  0x25   : > { %688 = vmatpush3.bf16.msra.mxu1 %v717_v20 }
  0x26   : > { %670 = vmatmul.mubr.bf16.vlgmr.msra.gmra.mrb[0].mxu0 %v216_v12 }
  0xf9   : > { %v671_v21 = vpop.f32.mrb[0].mxu0 }
  0xfa   : > { %v331_v22 = vmul.f32 %v671_v21, %v671_v21  ;;  %v315_v23 = vpop.f32.mrb[1].mxu0 }
  0xfb   : > { %v329_v24 = vmul.f32 %v315_v23, %v315_v23  ;;  %v672_v25 = vpop.f32.mrb[2].mxu0 }
  0xfc   : > { %v334_v26 = vmul.f32 %v671_v21, %v331_v22  ;;  %v318_v27 = vpop.f32.mrb[3].mxu0 }
  0xfd   : > { %v332_v28 = vmul.f32 %v329_v24, %v315_v23  ;;  %v330_v29 = vmul.f32 %v318_v27, %v318_v27 }
  0xfe   : > { %v337_v30 = vmul.f32 0.044715, %v334_v26 }
  0xff   : > { %v335_v31 = vmul.f32 0.044715, %v332_v28  ;;  %v333_v32 = vmul.f32 %v330_v29, %v318_v27 }
 0x100   : > { %v340_v33 = vadd.f32 %v671_v21, %v337_v30 }
 0x101   : > { %v338_v34 = vadd.f32 %v335_v31, %v315_v23  ;;  %v336_v35 = vmul.f32 0.044715, %v333_v32 }
 0x102   : > { %v343_v36 = vmul.f32 0.7978846, %v340_v33 }
 0x103   : > { %v341_v37 = vmul.f32 0.7978846, %v338_v34  ;;  %v339_v38 = vadd.f32 %v336_v35, %v318_v27 }
 0x104   : > { %718 = vtanh.f32 %v343_v36 }
 0x105   : > { %720 = vtanh.f32 %v341_v37  ;;  %v342_v39 = vmul.f32 0.7978846, %v339_v38 }
 0x107   : > { %722 = vtanh.f32 %v342_v39 }
 0x10e   : > { %v719_v40 = vpop.eup %718 }
 0x10f   : > { %v721_v41 = vpop.eup %720  ;;  %v349_v42 = vadd.f32 1.0, %v719_v40 }
 0x110   : > { %v347_v43 = vadd.f32 1.0, %v721_v41 }
 0x111   : > { %v723_v44 = vpop.eup %722  ;;  %v352_v45 = vmul.f32 0.5, %v349_v42 }
 0x112   : > { %v348_v46 = vadd.f32 1.0, %v723_v44  ;;  %v350_v47 = vmul.f32 0.5, %v347_v43 }
 0x113   : > { %v355_v49 = vmul.f32 %v671_v21, %v352_v45 }
 0x114   : > { %v351_v48 = vmul.f32 0.5, %v348_v46  ;;  %v353_v50 = vmul.f32 %v350_v47, %v315_v23 }
 0x115   : > { %v357_v53 = vpack.c.bf16 %v355_v49, %v355_v49 }
 0x116   : > { %v354_v51 = vmul.f32 %v351_v48, %v318_v27 }
 0x118   : > { %v356_v52 = vpack.c.bf16 %v354_v51, %v353_v50 }
 0x11a   : > { %689 = vmatprep.mubr.bf16.mxu1 %v356_v52 }
 0x11b   : > { %690 = vmatmul.mubr.bf16.vlgmr.msra.gmra.mrb[0].mxu1 %v357_v53 }
 0x1ee   : > { %v691_v54 = vpop.f32.mrb[0].mxu1 }
 0x1ef   : > { %v472_v55 = vadd.f32 %v691_v54, %v801_v11  ;;  %v456_v56 = vpop.f32.mrb[1].mxu1 }
 0x1f0   : > { %v470_v57 = vadd.f32 %v456_v56, %v783_v4  ;;  %v692_v58 = vpop.f32.mrb[2].mxu1 }
 0x1f1   : > { %475 = vst [vmem:[#allocation2 + $0x12] sm:$0xff] %v472_v55  ;;  %478 = vst [vmem:[#allocation2 + $0x13] sm:$0x80] %v472_v55  ;;  %v459_v59 = vpop.f32.mrb[3].mxu1 }
 0x1f2   : > { %479 = vst [vmem:[#allocation2 + $0x14] sm:$0x80] %v472_v55  ;;  %473 = vst [vmem:[#allocation2 + $0x2] sm:$0xff] %v470_v57  ;;  %v471_v60 = vadd.f32 %v459_v59, %v785_v5 }
 0x1f3   : > { %476 = vst [vmem:[#allocation2] sm:$0x1] %v470_v57  ;;  %477 = vst [vmem:[#allocation2 + $0x1] sm:$0x1] %v470_v57 }
 0x1f4   : > { %474 = vst [vmem:[#allocation2 + $0xa] sm:$0xff] %v471_v60 }
 0x1f8   : > { %v497_v5 = vld [vmem:[#allocation2 + $0x13] sm:$0xff] }
 0x1f9   : > { %v503_v18 = vld [vmem:[#allocation2 + $0x14] sm:$0xff] }
 0x1fa   : > { %v480_v61 = vld [vmem:[#allocation2] sm:$0xff] }
 0x1fb   : > { %v483_v62 = vld [vmem:[#allocation2 + $0x1] sm:$0xff]  ;;  %v482_v1 = vld [vmem:[#allocation2 + $0x10] sm:$0xff] }
 0x1fc   : > { %v486_v63 = vadd.f32 %v483_v62, %v480_v61  ;;  %v481_v0 = vld [vmem:[#allocation2 + $0x8] sm:$0xff]  ;;  %v485_v3 = vld [vmem:[#allocation2 + $0x11] sm:$0xff] }
 0x1fd   : > { %v484_v2 = vld [vmem:[#allocation2 + $0x9] sm:$0xff]  ;;  %v488_v7 = vadd.f32 %v485_v3, %v482_v1 }
 0x1fe   : > { %v487_v4 = vadd.f32 %v484_v2, %v481_v0  ;;  %v492_v6 = vadd.f32 %v486_v63, %v470_v57  ;;  %v495_v8 = vld [vmem:[#allocation2 + $0x3] sm:$0xff]  ;;  %v496_v12 = vld [vmem:[#allocation2 + $0xb] sm:$0xff] }
 0x1ff   : > { %v494_v11 = vadd.f32 %v488_v7, %v472_v55  ;;  %v501_v13 = vld [vmem:[#allocation2 + $0x4] sm:$0xff]  ;;  %v502_v17 = vld [vmem:[#allocation2 + $0xc] sm:$0xff] }
 0x200   : > { %v493_v9 = vadd.f32 %v487_v4, %v471_v60  ;;  %v498_v10 = vadd.f32 %v495_v8, %v492_v6 }
 0x201   : > { %v500_v16 = vadd.f32 %v497_v5, %v494_v11 }
 0x202   : > { %v499_v14 = vadd.f32 %v496_v12, %v493_v9  ;;  %v504_v15 = vadd.f32 %v501_v13, %v498_v10 }
 0x203   : > { %v506_v21 = vadd.f32 %v503_v18, %v500_v16 }
 0x204   : > { %v505_v19 = vadd.f32 %v502_v17, %v499_v14  ;;  %v507_v20 = vmul.f32 0.2, %v504_v15 }
 0x205   : > { %v509_v24 = vmul.f32 0.2, %v506_v21 }
 0x206   : > { %v508_v22 = vmul.f32 0.2, %v505_v19  ;;  %v510_v23 = vsub.f32 %v470_v57, %v507_v20  ;;  %516 = vst [vmem:[%s210_s5] sm:$0xff] %v507_v20 }
 0x207   : > { %v512_v26 = vsub.f32 %v472_v55, %v509_v24  ;;  %518 = vst [vmem:[%s210_s5 + $0x10] sm:$0xff] %v509_v24 }
 0x208   : > { %v511_v25 = vsub.f32 %v471_v60, %v508_v22  ;;  %513 = vst [vmem:[%s205_s8] sm:$0xff] %v510_v23  ;;  %517 = vst [vmem:[%s210_s5 + $0x8] sm:$0xff] %v508_v22 }
 0x209   : > { %515 = vst [vmem:[%s205_s8 + $0x10] sm:$0xff] %v512_v26 }
 0x20a   : > { %514 = vst [vmem:[%s205_s8 + $0x8] sm:$0xff] %v511_v25 }
 0x20b PF: > { %s15_s15 = sadd.s32 1, %s730_s15  }
 0x20c   : > { %p12_p4 = scmp.ge.s32.totalorder %s15_s15, 4  }
 0x20e   :  { %14 = sbr.rel (!%p12_p4) target bundleno = 1 (0x1), region = 74 }

// kernel: _lambda_.28
= control target key start
LH: loop header
LB: loop body
LE: loop exit
PB: predicated region body
PF: predicated region fallthrough
CT: control target
= control target key end

     0   :  { %s957_s18 = smov 0   ;;  %s1062_s0 = inlined_call_operand.vmem [shape: f32[2,24,128], index: 0, kind: input, shape index: {}]   ;;  %s1063_s1 = inlined_call_operand.vmem [shape: f32[2,24,128], index: 1, kind: input, shape index: {}]   ;;  %s1064_s2 = inlined_call_operand.vmem [shape: f32[2,24,128], index: 2, kind: input, shape index: {}]   ;;  %s1065_s3 = inlined_call_operand.vmem [shape: f32[2,24,128], index: 3, kind: input, shape index: {}]   ;;  %s1066_s4 = inlined_call_operand.vmem [shape: bf16[384,128], index: 4, kind: input, shape index: {}]   ;;  %s1067_s5 = inlined_call_operand.vmem [shape: f32[2,24,128], index: 5, kind: output, shape index: {}]  }
   0x1 LB: > { %s760_s19 = sadd.s32 4294967295, %s925_s18   ;;  %p764_p0 = scmp.ge.s32.totalorder %s925_s18, 1  ;;  %s925_s18 = sphi %s957_s18, %s15_s18  }
   0x2   : > { %p217_p1 = scmp.lt.s32.totalorder %s925_s18, 3 }
   0x4   : > { %p218_p2 = pnand %p764_p0, %p217_p1 }
   0x5   : > { %v895_v0 = vld [vmem:[%s1066_s4 + $0x40] sm:$0xff] (!%p218_p2)   ;;  %p260_p3 = scmp.lt.s32.totalorder (!%p218_p2), %s760_s19, 1  ;;  %v897_v2 = vld [vmem:[%s1066_s4 + $0x48] sm:$0xff] (!%p218_p2)   ;;  %v899_v4 = vld [vmem:[%s1066_s4 + $0x50] sm:$0xff] (!%p218_p2)  }
   0x6   : > { %221 = sbr.rel (%p218_p2) target bundleno = 290 (0x122), region = 40  ;;  %v896_v1 = vld [vmem:[%s1066_s4] sm:$0xff] (!%p218_p2)   ;;  %826 = vmatprep.subr.bf16.mxu0 (!%p218_p2), %v895_v0  ;;  %v898_v3 = vld [vmem:[%s1066_s4 + $0x8] sm:$0xff] (!%p218_p2)   ;;  %v900_v5 = vld [vmem:[%s1066_s4 + $0x10] sm:$0xff] (!%p218_p2)  }
   0x7   : > { %846 = vmatprep.subr.bf16.mxu1 (!%p218_p2), %v896_v1  ;;  %827 = vmatpush3.bf16.msra.mxu0 (!%p218_p2), %v895_v0  ;;  %v901_v6 = vld [vmem:[%s1066_s4 + $0x58] sm:$0xff] (!%p218_p2)   ;;  %v903_v8 = vld [vmem:[%s1066_s4 + $0x60] sm:$0xff] (!%p218_p2)   ;;  %v905_v10 = vld [vmem:[%s1066_s4 + $0x68] sm:$0xff] (!%p218_p2)  }
   0x8   : > { %847 = vmatpush3.bf16.msra.mxu1 (!%p218_p2), %v896_v1  ;;  %828 = vmatprep.subr.bf16.mxu0 (!%p218_p2), %v897_v2  ;;  %v902_v7 = vld [vmem:[%s1066_s4 + $0x18] sm:$0xff] (!%p218_p2)   ;;  %v904_v9 = vld [vmem:[%s1066_s4 + $0x20] sm:$0xff] (!%p218_p2)   ;;  %v906_v11 = vld [vmem:[%s1066_s4 + $0x28] sm:$0xff] (!%p218_p2)  }
   0x9   : > { %848 = vmatprep.subr.bf16.mxu1 (!%p218_p2), %v898_v3  ;;  %v907_v25 = vld [vmem:[%s1066_s4 + $0x70] sm:$0xff] (!%p218_p2)   ;;  %v909_v30 = vld [vmem:[%s1066_s4 + $0x78] sm:$0xff] (!%p218_p2)   ;;  %v911_v32 = vld [vmem:[%s1066_s4 + $0x80] sm:$0xff] (!%p218_p2)  }
   0xa   : > { %v908_v27 = vld [vmem:[%s1066_s4 + $0x30] sm:$0xff] (!%p218_p2)   ;;  %v910_v31 = vld [vmem:[%s1066_s4 + $0x38] sm:$0xff] (!%p218_p2)   ;;  %v912_v41 = vld [vmem:[%s1066_s4 + $0x88] sm:$0xff] (!%p218_p2)  }
   0xb   : > { %829 = vmatpush3.bf16.msra.mxu0 (!%p218_p2), %v897_v2  ;;  %v913_v43 = vld [vmem:[%s1066_s4 + $0x90] sm:$0xff] (!%p218_p2)   ;;  %v914_v44 = vld [vmem:[%s1066_s4 + $0x98] sm:$0xff] (!%p218_p2)   ;;  %v915_v45 = vld [vmem:[%s1066_s4 + $0xa0] sm:$0xff] (!%p218_p2)  }
   0xc   : > { %849 = vmatpush3.bf16.msra.mxu1 (!%p218_p2), %v898_v3  ;;  %830 = vmatprep.subr.bf16.mxu0 (!%p218_p2), %v899_v4  ;;  %v916_v46 = vld [vmem:[%s1066_s4 + $0xa8] sm:$0xff] (!%p218_p2)   ;;  %v917_v47 = vld [vmem:[%s1066_s4 + $0xb0] sm:$0xff] (!%p218_p2)   ;;  %v918_v48 = vld [vmem:[%s1066_s4 + $0xb8] sm:$0xff] (!%p218_p2)  }
   0xd   : > { %s1069_s19 = smov (!%p260_p3, %s760_s19), 1  ;;  %850 = vmatprep.subr.bf16.mxu1 %v900_v5 }
   0xe   : > { %s989_s11 = smul.u32 24, %s1069_s19 }
   0xf   : > { %831 = vmatpush3.bf16.msra.mxu0 %v899_v4 }
  0x10   : > { %851 = vmatpush3.bf16.msra.mxu1 %v900_v5  ;;  %832 = vmatprep.subr.bf16.mxu0 %v901_v6  ;;  %s264_s19 = scalar_lea.vmem %s1062_s0, %s989_s11  ;;  %s269_s22 = scalar_lea.vmem %s1063_s1, %s989_s11 }
  0x11   : > { %852 = vmatprep.subr.bf16.mxu1 %v902_v7  ;;  %s274_s27 = scalar_lea.vmem %s1064_s2, %s989_s11  ;;  %v286_v12 = vld [vmem:[%s264_s19] sm:$0xff]  ;;  %v287_v13 = vld [vmem:[%s264_s19 + $0x8] sm:$0xff]  ;;  %v288_v20 = vld [vmem:[%s264_s19 + $0x10] sm:$0xff]  ;;  %s279_s8 = scalar_lea.vmem %s1065_s3, %s989_s11 }
  0x12   : > { %v289_v14 = vld [vmem:[%s269_s22] sm:$0xff]  ;;  %v290_v15 = vld [vmem:[%s269_s22 + $0x8] sm:$0xff]  ;;  %v291_v21 = vld [vmem:[%s269_s22 + $0x10] sm:$0xff]  ;;  %s284_s12 = scalar_lea.vmem %s1067_s5, %s989_s11 }
  0x13   : > { %833 = vmatpush3.bf16.msra.mxu0 %v901_v6  ;;  %v292_v16 = vadd.f32 %v289_v14, %v286_v12  ;;  %v295_v17 = vld [vmem:[%s274_s27] sm:$0xff]  ;;  %v296_v18 = vld [vmem:[%s274_s27 + $0x8] sm:$0xff]  ;;  %v293_v19 = vadd.f32 %v290_v15, %v287_v13  ;;  %v297_v22 = vld [vmem:[%s274_s27 + $0x10] sm:$0xff]  ;;  %v294_v24 = vadd.f32 %v291_v21, %v288_v20 }
  0x14   : > { %853 = vmatpush3.bf16.msra.mxu1 %v902_v7  ;;  %834 = vmatprep.subr.bf16.mxu0 %v903_v8  ;;  %v662_v63 = vld [vmem:[%s279_s8 + $0x10] sm:$0xff]  ;;  %v660_v2 = vld [vmem:[%s279_s8] sm:$0xff]  ;;  %v661_v7 = vld [vmem:[%s279_s8 + $0x8] sm:$0xff] }
  0x15   : > { %854 = vmatprep.subr.bf16.mxu1 %v904_v9  ;;  %v298_v23 = vadd.f32 %v295_v17, %v292_v16  ;;  %v299_v26 = vadd.f32 %v296_v18, %v293_v19  ;;  %v300_v28 = vadd.f32 %v297_v22, %v294_v24 }
  0x17   : > { %835 = vmatpush3.bf16.msra.mxu0 %v903_v8  ;;  %349 = vst [vmem:[#allocation2 + $0x1] sm:$0xff] %v298_v23  ;;  %353 = vst [vmem:[#allocation2 + $0x19] sm:$0x1] %v298_v23  ;;  %v362_v29 = vpack.c.bf16 %v299_v26, %v298_v23  ;;  %v363_v36 = vpack.c.bf16 %v300_v28, %v300_v28 }
  0x18   : > { %855 = vmatpush3.bf16.msra.mxu1 %v904_v9  ;;  %836 = vmatprep.subr.bf16.mxu0 %v905_v10  ;;  %350 = vst [vmem:[#allocation2 + $0x9] sm:$0xff] %v299_v26  ;;  %352 = vst [vmem:[#allocation2 - $0x7] sm:$0x80] %v300_v28 }
  0x19   : > { %856 = vmatprep.subr.bf16.mxu1 %v906_v11  ;;  %351 = vst [vmem:[#allocation2 + $0x11] sm:$0xff] %v300_v28  ;;  %842 = vmatprep.mubr.bf16.mxu0 %v362_v29 }
  0x1b   : > { %837 = vmatpush3.bf16.msra.mxu0 %v905_v10 }
  0x1c   : > { %857 = vmatpush3.bf16.msra.mxu1 %v906_v11  ;;  %838 = vmatprep.subr.bf16.mxu0 %v907_v25 }
  0x1d   : > { %858 = vmatprep.subr.bf16.mxu1 %v908_v27 }
  0x1f   : > { %839 = vmatpush3.bf16.msra.mxu0 %v907_v25  ;;  %v355_v33 = vld [vmem:[#allocation2 + $0x8] sm:$0xff]  ;;  %v354_v35 = vld [vmem:[#allocation2] sm:$0xff] }
  0x20   : > { %859 = vmatpush3.bf16.msra.mxu1 %v908_v27  ;;  %840 = vmatprep.subr.bf16.mxu0 %v909_v30  ;;  %v556_v34 = vld [vmem:[#allocation2 + $0x2] sm:$0xff]  ;;  %v356_v37 = vld [vmem:[#allocation2 + $0x10] sm:$0xff]  ;;  %v357_v39 = vpack.c.bf16 %v355_v33, %v354_v35 }
  0x21   : > { %860 = vmatprep.subr.bf16.mxu1 %v910_v31  ;;  %v557_v38 = vld [vmem:[#allocation2 + $0xa] sm:$0xff]  ;;  %v358_v40 = vpack.c.bf16 %v356_v37, %v356_v37  ;;  %v558_v49 = vld [vmem:[#allocation2 + $0x12] sm:$0xff] }
  0x22   : > { %v559_v42 = vpack.c.bf16 %v557_v38, %v556_v34  ;;  %862 = vmatprep.mubr.bf16.mxu1 %v357_v39  ;;  %v560_v50 = vpack.c.bf16 %v558_v49, %v558_v49 }
  0x23   : > { %841 = vmatpush3.bf16.msra.mxu0 %v909_v30 }
  0x24   : > { %861 = vmatpush3.bf16.msra.mxu1 %v910_v31  ;;  %866 = vmatprep.subr.bf16.mxu0 %v911_v32 }
  0x26   : > { %843 = vmatmul.mubr.bf16.vlgmr.msra.gmra.mrb[0].mxu0 %v363_v36 }
  0x27   : > { %863 = vmatmul.mubr.bf16.vlgmr.msra.gmra.mrb[0].mxu1 %v358_v40  ;;  %867 = vmatpush3.bf16.msra.mxu0 %v911_v32 }
  0x28   : > { %868 = vmatprep.subr.bf16.mxu0 %v912_v41  ;;  %882 = vmatprep.mubr.bf16.mxu0 %v559_v42 }
  0x2b   : > { %869 = vmatpush3.bf16.msra.mxu0 %v912_v41 }
  0x2c   : > { %870 = vmatprep.subr.bf16.mxu0 %v913_v43 }
  0x2f   : > { %871 = vmatpush3.bf16.msra.mxu0 %v913_v43 }
  0x30   : > { %872 = vmatprep.subr.bf16.mxu0 %v914_v44 }
  0x33   : > { %873 = vmatpush3.bf16.msra.mxu0 %v914_v44 }
  0x34   : > { %874 = vmatprep.subr.bf16.mxu0 %v915_v45 }
  0x37   : > { %875 = vmatpush3.bf16.msra.mxu0 %v915_v45 }
  0x38   : > { %876 = vmatprep.subr.bf16.mxu0 %v916_v46 }
  0x3b   : > { %877 = vmatpush3.bf16.msra.mxu0 %v916_v46 }
  0x3c   : > { %878 = vmatprep.subr.bf16.mxu0 %v917_v47 }
  0x3f   : > { %879 = vmatpush3.bf16.msra.mxu0 %v917_v47 }
  0x40   : > { %880 = vmatprep.subr.bf16.mxu0 %v918_v48 }
  0x43   : > { %881 = vmatpush3.bf16.msra.mxu0 %v918_v48 }
  0x46   : > { %883 = vmatmul.mubr.bf16.vlgmr.msra.gmra.mrb[4].mxu0 %v560_v50 }
  0xf9   : > { %v844_v51 = vpop.f32.mrb[0].mxu0 }
  0xfa   : > { %v864_v52 = vpop.f32.mrb[0].mxu1  ;;  %v446_v53 = vpop.f32.mrb[1].mxu0 }
  0xfb   : > { %v551_v54 = vadd.f32 %v864_v52, %v844_v51  ;;  %v542_v55 = vpop.f32.mrb[1].mxu1  ;;  %v845_v56 = vpop.f32.mrb[2].mxu0 }
  0xfc   : > { %v543_v57 = vadd.f32 %v542_v55, %v446_v53  ;;  %v865_v58 = vpop.f32.mrb[2].mxu1  ;;  %v449_v59 = vpop.f32.mrb[3].mxu0 }
  0xfd   : > { %v545_v60 = vpop.f32.mrb[3].mxu1 }
  0xfe   : > { %v546_v61 = vadd.f32 %v545_v60, %v449_v59 }
 0x119   : > { %v884_v62 = vpop.f32.mrb[4].mxu0 }
 0x11a   : > { %v659_v0 = vadd.f32 %v884_v62, %v551_v54  ;;  %v643_v1 = vpop.f32.mrb[5].mxu0 }
 0x11b   : > { %v657_v3 = vadd.f32 %v643_v1, %v543_v57  ;;  %v885_v4 = vpop.f32.mrb[6].mxu0 }
 0x11c   : > { %v665_v5 = vadd.f32 %v662_v63, %v659_v0  ;;  %v646_v6 = vpop.f32.mrb[7].mxu0 }
 0x11d   : > { %v663_v8 = vadd.f32 %v660_v2, %v657_v3  ;;  %v658_v9 = vadd.f32 %v646_v6, %v546_v61 }
 0x11e   : > { %668 = vst [vmem:[%s284_s12 + $0x10] sm:$0xff] %v665_v5 }
 0x11f   : > { %666 = vst [vmem:[%s284_s12] sm:$0xff] %v663_v8  ;;  %v664_v10 = vadd.f32 %v661_v7, %v658_v9 }
 0x121   : > { %667 = vst [vmem:[%s284_s12 + $0x8] sm:$0xff] %v664_v10 }
 0x122 PF: > { %s15_s18 = sadd.s32 1, %s925_s18  }
 0x123   : > { %p12_p4 = scmp.ge.s32.totalorder %s15_s18, 4  }
 0x125   :  { %14 = sbr.rel (!%p12_p4) target bundleno = 1 (0x1), region = 79 }

</bundles_post_ra>
